<compile_context>
chip_gen: v7x
topology: tpu7x:2x2x1
jax: 0.10.0
libtpu: 0.0.40
codegen_flags: <defaults>
</compile_context>

<pallas_src>
import functools
import math

import jax
import jax.numpy as jnp
from jax.experimental import pallas as pl
from jax.experimental.pallas import tpu as pltpu

EPS = 1e-5
LANE = 128


def _round_up(x, m):
    return ((x + m - 1) // m) * m


# ---------------------------------------------------------------------------
# Pallas kernels
# ---------------------------------------------------------------------------

def _conv3x3_relu_stats_kernel(x_ref, w_ref, b_ref, m_ref,
                               y_ref, mean_ref, std_ref, *, offs, hw):
    """3x3 'same' conv + bias + ReLU + fused per-channel stats for one image.

    x_ref:    (1, Cin, Lin)   bf16  zero-padded, row-flattened image
                               (row stride Wp = W + 2, plus trailing slack)
    w_ref:    (9, Cout, Cin)  bf16  one (Cout, Cin) weight matrix per tap
    b_ref:    (Cout, 1)       f32   bias
    m_ref:    (1, Lpad)       f32   1.0 at valid output lanes, 0.0 elsewhere
    y_ref:    (1, Cout, Lpad) f32   masked conv+ReLU output (invalid lanes = 0)
    mean_ref/std_ref: (1, Cout, 1)  spatial mean / unbiased std (sqrt(var+EPS))
    offs:     static tuple of 9 lane offsets (dh * Wp + dw)
    hw:       static number of valid spatial positions (H * W)
    """
    _, cout, lpad = y_ref.shape
    x = x_ref[0]                                        # (Cin, Lin) bf16
    acc = jnp.zeros((cout, lpad), jnp.float32)
    for t, off in enumerate(offs):                      # static unroll: 9 taps
        xs = x[:, off:off + lpad]                       # shifted lane slice
        acc = acc + jnp.dot(w_ref[t], xs, preferred_element_type=jnp.float32)
    y = jnp.maximum(acc + b_ref[...], 0.0) * m_ref[...]  # masked ReLU, f32
    y_ref[0] = y

    # One-pass stats (masked lanes are exactly zero so they don't contribute).
    s1 = jnp.sum(y, axis=1, keepdims=True)
    s2 = jnp.sum(y * y, axis=1, keepdims=True)
    mean = s1 * (1.0 / hw)
    m2 = jnp.maximum(s2 - hw * mean * mean, 0.0)
    mean_ref[0] = mean
    std_ref[0] = jnp.sqrt(m2 * (1.0 / (hw - 1.0)) + EPS)   # torch .var() unbiased


def _content_loss_kernel(f_ref, c_ref, o_ref, acc_ref, *, inv_total):
    # Streaming MSE over the deepest feature maps, one (fake, content) image
    # pair per grid step.  Per-step work is a sublane-only partial reduce into
    # a lane-wide accumulator; the lane reduce happens once at finalize.
    @pl.when(pl.program_id(0) == 0)
    def _init():
        acc_ref[...] = jnp.zeros_like(acc_ref)

    d = f_ref[0] - c_ref[0]                             # (C, Lpad)
    acc_ref[...] += jnp.sum(d * d, axis=0, keepdims=True)

    @pl.when(pl.program_id(0) == pl.num_programs(0) - 1)
    def _finalize():
        o_ref[...] = jnp.sum(acc_ref[...], axis=1, keepdims=True) * inv_total


# ---------------------------------------------------------------------------
# Wrappers around pallas_call
# ---------------------------------------------------------------------------

def conv3x3_relu_stats(x, w, b):
    """3x3 'same' conv + ReLU on (B, Cin, H, W) with fused per-channel stats.

    Returns:
      y_flat: (B, Cout, Lpad) f32 row-flattened masked output.  Valid pixels
              sit at lane q = i*(W+2) + j with i < H, j < W; other lanes == 0.
      mean:   (B, Cout, 1) spatial mean
      std:    (B, Cout, 1) unbiased std, sqrt(var + EPS)
      (H, W): spatial extent of the valid region
    """
    B, Cin, H, W = x.shape
    Cout = w.shape[0]
    Wp, Hp = W + 2, H + 2
    lout = H * Wp                                   # valid + row-pad lanes
    lpad = _round_up(lout, LANE)                    # lane-dense output width
    lin = _round_up(lpad + 2 * Wp + 2, LANE)        # slack for the max tap shift

    # Pad once (zero halo) + flatten rows: ~1.3x activation bytes instead of the
    # previous 9x im2col.  bf16 operands feed the native MXU path.
    xpad = jnp.pad(x, ((0, 0), (0, 0), (1, 1), (1, 1))).reshape(B, Cin, Hp * Wp)
    x_flat = jnp.pad(xpad, ((0, 0), (0, 0), (0, lin - Hp * Wp))).astype(jnp.bfloat16)
    w9 = jnp.transpose(w, (2, 3, 0, 1)).reshape(9, Cout, Cin).astype(jnp.bfloat16)
    bcol = b.reshape(Cout, 1).astype(jnp.float32)
    q = jnp.arange(lpad, dtype=jnp.int32)
    mask = ((q < lout) & ((q % Wp) < W)).astype(jnp.float32)[None, :]

    offs = tuple(dh * Wp + dw for dh in range(3) for dw in range(3))
    kernel = functools.partial(_conv3x3_relu_stats_kernel,
                               offs=offs, hw=float(H * W))

    flops = 2 * B * 9 * Cout * Cin * lpad
    bytes_accessed = (B * Cin * lin * 2 + 9 * Cout * Cin * 2
                      + B * Cout * lpad * 4 + 2 * B * Cout * 4 + lpad * 4)

    # TODO(synk): for large images, tile the flat HW (lane) axis with a halo
    # (manual DMA) so blocks fit v7x's 64 MiB VMEM; whole-image blocks are fine
    # at these sizes.  Batching images along the lane axis (one weight push per
    # layer) would further improve MXU fill for the small deep layers.
    y_flat, mean, std = pl.pallas_call(
        kernel,
        out_shape=(jax.ShapeDtypeStruct((B, Cout, lpad), jnp.float32),
                   jax.ShapeDtypeStruct((B, Cout, 1), jnp.float32),
                   jax.ShapeDtypeStruct((B, Cout, 1), jnp.float32)),
        grid=(B,),
        in_specs=[pl.BlockSpec((1, Cin, lin), lambda i: (i, 0, 0)),
                  pl.BlockSpec((9, Cout, Cin), lambda i: (0, 0, 0)),
                  pl.BlockSpec((Cout, 1), lambda i: (0, 0)),
                  pl.BlockSpec((1, lpad), lambda i: (0, 0))],
        out_specs=(pl.BlockSpec((1, Cout, lpad), lambda i: (i, 0, 0)),
                   pl.BlockSpec((1, Cout, 1), lambda i: (i, 0, 0)),
                   pl.BlockSpec((1, Cout, 1), lambda i: (i, 0, 0))),
        compiler_params=pltpu.CompilerParams(
            dimension_semantics=("parallel",),
            vmem_limit_bytes=32 * 1024 * 1024),
        cost_estimate=pl.CostEstimate(flops=flops, transcendentals=B * Cout,
                                      bytes_accessed=bytes_accessed),
    )(x_flat, w9, bcol, mask)
    return y_flat, mean, std, (H, W)


def flat_to_nchw(y_flat, H, W):
    """Dense (B, C, H, W) view of the row-flattened conv output."""
    B, C, _ = y_flat.shape
    Wp = W + 2
    return y_flat[:, :, :H * Wp].reshape(B, C, H, Wp)[:, :, :, :W]


def avg_pool2x2(x):
    B, C, H, W = x.shape
    return x.reshape(B, C, H // 2, 2, W // 2, 2).mean(axis=(3, 5))


def content_loss_pallas(y_flat, n_images, hw_valid):
    """MSE between fake rows [0, N) and content rows [2N, 3N) of (3N, C, Lpad).

    Invalid (masked) lanes are exactly zero in both operands so they contribute
    nothing; the denominator uses the true element count N*C*H*W.
    """
    _, C, L = y_flat.shape
    inv_total = 1.0 / float(n_images * C * hw_valid)
    kernel = functools.partial(_content_loss_kernel, inv_total=inv_total)
    out = pl.pallas_call(
        kernel,
        out_shape=jax.ShapeDtypeStruct((1, 1), jnp.float32),
        grid=(n_images,),
        in_specs=[pl.BlockSpec((1, C, L), lambda i: (i, 0, 0)),
                  pl.BlockSpec((1, C, L), lambda i: (i + 2 * n_images, 0, 0))],
        out_specs=pl.BlockSpec((1, 1), lambda i: (0, 0)),
        scratch_shapes=[pltpu.VMEM((1, L), jnp.float32)],
        compiler_params=pltpu.CompilerParams(
            dimension_semantics=("arbitrary",),
            vmem_limit_bytes=32 * 1024 * 1024),
    )(y_flat, y_flat)
    return out[0, 0]


def style_loss_from_stats(means, stds, n):
    # Tiny O(sum_l N*C_l) MSE over the fused per-channel stats; a dedicated
    # kernel launch would cost more than it computes, so this stays in XLA.
    loss = jnp.float32(0.0)
    for m, s in zip(means, stds):
        loss = loss + jnp.mean((m[:n] - m[n:2 * n]) ** 2) \
                    + jnp.mean((s[:n] - s[n:2 * n]) ** 2)
    return loss


# ---------------------------------------------------------------------------
# Synthetic "VGG19" feature extractor (deterministic weights)
# ---------------------------------------------------------------------------

def make_vgg_params(key, in_ch=3, chans=(8, 16, 32, 64)):
    params = []
    c_in = in_ch
    for c_out in chans:
        key, k1, k2 = jax.random.split(key, 3)
        w = jax.random.normal(k1, (c_out, c_in, 3, 3), jnp.float32)
        w = w * (1.0 / (3.0 * math.sqrt(float(c_in))))
        b = jax.random.normal(k2, (c_out,), jnp.float32) * 0.01
        params.append((w, b))
        c_in = c_out
    return params


def vgg_trunk_pallas(x, params):
    """Synthetic VGG19 stand-in (conv3x3+ReLU, 2x2 avg pool between layers).
    Returns the last layer's masked flat features (content loss input), its
    valid H*W, and the per-layer fused (mean, std) stats."""
    means, stds = [], []
    h = x
    y_flat, H, W = None, None, None
    for i, (w, b) in enumerate(params):
        y_flat, m, s, (H, W) = conv3x3_relu_stats(h, w, b)
        means.append(m)
        stds.append(s)
        if i != len(params) - 1:
            # TODO(synk): fuse the 2x2 avg pool into the conv epilogue (needs a
            # strided lane compaction); kept as a cheap XLA pass on the dense view.
            h = avg_pool2x2(flat_to_nchw(y_flat, H, W))
    return y_flat, H * W, means, stds


# ---------------------------------------------------------------------------
# StyleContentLoss.forward (opt.remove_background == False path)
# ---------------------------------------------------------------------------
# TODO(synk): remove_background=True branch (nearest-interp label masks +
# calc_mean_std_mask) is not implemented; only the default path is covered.

def style_content_loss(fake_image, style_image, content_image, params):
    n = fake_image.shape[0]
    # One batched trunk pass for all three images (3x fewer kernel launches).
    x = jnp.concatenate([fake_image, style_image, content_image], axis=0)
    y_last_flat, hw_last, means, stds = vgg_trunk_pallas(x, params)
    loss_c = content_loss_pallas(y_last_flat, n, hw_last)
    loss_s = style_loss_from_stats(means, stds, n)
    return loss_c, loss_s


# ---------------------------------------------------------------------------
# Pure-JAX references for checking
# ---------------------------------------------------------------------------

def vgg_feats_dense_pallas(x, params):
    """Same Pallas trunk, returning dense (B, C, H, W) features (test only)."""
    feats = []
    h = x
    for i, (w, b) in enumerate(params):
        y_flat, _, _, (H, W) = conv3x3_relu_stats(h, w, b)
        y = flat_to_nchw(y_flat, H, W)
        feats.append(y)
        if i != len(params) - 1:
            h = avg_pool2x2(y)
    return feats


def _ref_mean_std(feat):
    b, c, h, w = feat.shape
    f = feat.reshape(b, c, h * w)
    m = f.mean(axis=2)
    v = f.var(axis=2, ddof=1) + EPS
    return m, jnp.sqrt(v)


def ref_losses_from_feats(feats, n):
    y_last = feats[-1]
    loss_c = jnp.mean((y_last[:n] - y_last[2 * n:3 * n]) ** 2)
    loss_s = jnp.float32(0.0)
    for f in feats:
        m, s = _ref_mean_std(f)
        loss_s = loss_s + jnp.mean((m[:n] - m[n:2 * n]) ** 2) \
                        + jnp.mean((s[:n] - s[n:2 * n]) ** 2)
    return loss_c, loss_s


def ref_vgg_feats(x, params):
    """XLA reference trunk mirroring the kernel's bf16-operand/f32-accum path."""
    feats = []
    h = x
    for i, (w, b) in enumerate(params):
        y = jax.lax.conv_general_dilated(
            h.astype(jnp.bfloat16), w.astype(jnp.bfloat16), (1, 1), "SAME",
            dimension_numbers=("NCHW", "OIHW", "NCHW"),
            preferred_element_type=jnp.float32)
        y = jnp.maximum(y + b[None, :, None, None], 0.0)
        feats.append(y)
        if i != len(params) - 1:
            h = avg_pool2x2(y)
    return feats


if __name__ == "__main__":
    key = jax.random.PRNGKey(0)
    kp, k1, k2, k3 = jax.random.split(key, 4)
    params = make_vgg_params(kp)

    N, C, H, W = 2, 3, 16, 16
    fake_image = jax.random.normal(k1, (N, C, H, W), jnp.float32)
    style_image = jax.random.normal(k2, (N, C, H, W), jnp.float32)
    content_image = jax.random.normal(k3, (N, C, H, W), jnp.float32)

    loss_c, loss_s = jax.jit(style_content_loss)(
        fake_image, style_image, content_image, params)
    jax.block_until_ready((loss_c, loss_s))

    # Tight check of the loss math against a pure-JAX reference evaluated on
    # dense features produced by the same Pallas conv kernels.
    x_all = jnp.concatenate([fake_image, style_image, content_image], axis=0)
    dense_feats = jax.jit(vgg_feats_dense_pallas)(x_all, params)
    ref_c, ref_s = ref_losses_from_feats(dense_feats, N)
    assert bool(jnp.allclose(loss_c, ref_c, rtol=1e-3, atol=1e-6)), (loss_c, ref_c)
    assert bool(jnp.allclose(loss_s, ref_s, rtol=1e-3, atol=1e-6)), (loss_s, ref_s)

    # Loose structural check of the Pallas conv trunk against XLA's conv using
    # the same bf16-operand / f32-accumulate path (catches tap/layout bugs).
    ref_feats = ref_vgg_feats(x_all, params)
    for pf, rf in zip(dense_feats, ref_feats):
        assert bool(jnp.allclose(pf, rf, rtol=2e-2, atol=2e-2)), \
            float(jnp.max(jnp.abs(pf - rf)))

    print("KERNEL_OK")
</pallas_src>

<mosaic_0001>
module attributes {stable_mosaic.version = 11 : i64} {
  func.func @_conv3x3_relu_stats_kernel(%arg0: i32, %arg1: memref<1x3x512xbf16, #tpu.memory_space<vmem>>, %arg2: memref<9x8x3xbf16, #tpu.memory_space<vmem>>, %arg3: memref<8x1xf32, #tpu.memory_space<vmem>>, %arg4: memref<1x384xf32, #tpu.memory_space<vmem>>, %arg5: memref<1x8x384xf32, #tpu.memory_space<vmem>>, %arg6: memref<1x8x1xf32, #tpu.memory_space<vmem>>, %arg7: memref<1x8x1xf32, #tpu.memory_space<vmem>>) attributes {dimension_semantics = [#tpu.dimension_semantics<parallel>], iteration_bounds = array<i64: 6>, scalar_prefetch = 0 : i64, scratch_operands = 0 : i64, tpu.core_type = #tpu.core_type<tc>, window_params = [{transform_indices = @transform_0, window_bounds = array<i64: 1, 3, 512>}, {pipeline_mode = #tpu.pipeline_mode<synchronous>, transform_indices = @transform_1, window_bounds = array<i64: 9, 8, 3>}, {pipeline_mode = #tpu.pipeline_mode<synchronous>, transform_indices = @transform_2, window_bounds = array<i64: 8, 1>}, {pipeline_mode = #tpu.pipeline_mode<synchronous>, transform_indices = @transform_3, window_bounds = array<i64: 1, 384>}, {transform_indices = @transform_4, window_bounds = array<i64: 1, 8, 384>}, {transform_indices = @transform_5, window_bounds = array<i64: 1, 8, 1>}, {transform_indices = @transform_6, window_bounds = array<i64: 1, 8, 1>}]} {
    %c0 = arith.constant 0 : index
    %c0_0 = arith.constant 0 : index
    %c0_1 = arith.constant 0 : index
    %0 = vector.load %arg1[%c0, %c0_0, %c0_1] : memref<1x3x512xbf16, #tpu.memory_space<vmem>>, vector<1x3x512xbf16>
    %1 = vector.shape_cast %0 : vector<1x3x512xbf16> to vector<3x512xbf16>
    %cst = arith.constant 0.000000e+00 : f32
    %2 = vector.broadcast %cst : f32 to vector<8x384xf32>
    %3 = vector.extract_strided_slice %1 {offsets = [0, 0], sizes = [3, 384], strides = [1, 1]} : vector<3x512xbf16> to vector<3x384xbf16>
    %c0_2 = arith.constant 0 : index
    %c0_3 = arith.constant 0 : index
    %c0_4 = arith.constant 0 : index
    %4 = vector.load %arg2[%c0_2, %c0_3, %c0_4] : memref<9x8x3xbf16, #tpu.memory_space<vmem>>, vector<1x8x3xbf16>
    %5 = vector.shape_cast %4 : vector<1x8x3xbf16> to vector<8x3xbf16>
    %cst_5 = arith.constant dense<0.000000e+00> : vector<8x384xf32>
    %6 = tpu.matmul %5, %3, %cst_5 {dimension_numbers = #tpu.dot_dimension_numbers<[1], [0], [0], [1], [0, 0, 1, 1], [], []>} : vector<8x3xbf16>, vector<3x384xbf16>, vector<8x384xf32> -> vector<8x384xf32>
    %7 = arith.addf %2, %6 : vector<8x384xf32>
    %8 = vector.extract_strided_slice %1 {offsets = [0, 1], sizes = [3, 384], strides = [1, 1]} : vector<3x512xbf16> to vector<3x384xbf16>
    %c1 = arith.constant 1 : index
    %c0_6 = arith.constant 0 : index
    %c0_7 = arith.constant 0 : index
    %9 = vector.load %arg2[%c1, %c0_6, %c0_7] : memref<9x8x3xbf16, #tpu.memory_space<vmem>>, vector<1x8x3xbf16>
    %10 = vector.shape_cast %9 : vector<1x8x3xbf16> to vector<8x3xbf16>
    %cst_8 = arith.constant dense<0.000000e+00> : vector<8x384xf32>
    %11 = tpu.matmul %10, %8, %cst_8 {dimension_numbers = #tpu.dot_dimension_numbers<[1], [0], [0], [1], [0, 0, 1, 1], [], []>} : vector<8x3xbf16>, vector<3x384xbf16>, vector<8x384xf32> -> vector<8x384xf32>
    %12 = arith.addf %7, %11 : vector<8x384xf32>
    %13 = vector.extract_strided_slice %1 {offsets = [0, 2], sizes = [3, 384], strides = [1, 1]} : vector<3x512xbf16> to vector<3x384xbf16>
    %c2 = arith.constant 2 : index
    %c0_9 = arith.constant 0 : index
    %c0_10 = arith.constant 0 : index
    %14 = vector.load %arg2[%c2, %c0_9, %c0_10] : memref<9x8x3xbf16, #tpu.memory_space<vmem>>, vector<1x8x3xbf16>
    %15 = vector.shape_cast %14 : vector<1x8x3xbf16> to vector<8x3xbf16>
    %cst_11 = arith.constant dense<0.000000e+00> : vector<8x384xf32>
    %16 = tpu.matmul %15, %13, %cst_11 {dimension_numbers = #tpu.dot_dimension_numbers<[1], [0], [0], [1], [0, 0, 1, 1], [], []>} : vector<8x3xbf16>, vector<3x384xbf16>, vector<8x384xf32> -> vector<8x384xf32>
    %17 = arith.addf %12, %16 : vector<8x384xf32>
    %18 = vector.extract_strided_slice %1 {offsets = [0, 18], sizes = [3, 384], strides = [1, 1]} : vector<3x512xbf16> to vector<3x384xbf16>
    %c3 = arith.constant 3 : index
    %c0_12 = arith.constant 0 : index
    %c0_13 = arith.constant 0 : index
    %19 = vector.load %arg2[%c3, %c0_12, %c0_13] : memref<9x8x3xbf16, #tpu.memory_space<vmem>>, vector<1x8x3xbf16>
    %20 = vector.shape_cast %19 : vector<1x8x3xbf16> to vector<8x3xbf16>
    %cst_14 = arith.constant dense<0.000000e+00> : vector<8x384xf32>
    %21 = tpu.matmul %20, %18, %cst_14 {dimension_numbers = #tpu.dot_dimension_numbers<[1], [0], [0], [1], [0, 0, 1, 1], [], []>} : vector<8x3xbf16>, vector<3x384xbf16>, vector<8x384xf32> -> vector<8x384xf32>
    %22 = arith.addf %17, %21 : vector<8x384xf32>
    %23 = vector.extract_strided_slice %1 {offsets = [0, 19], sizes = [3, 384], strides = [1, 1]} : vector<3x512xbf16> to vector<3x384xbf16>
    %c4 = arith.constant 4 : index
    %c0_15 = arith.constant 0 : index
    %c0_16 = arith.constant 0 : index
    %24 = vector.load %arg2[%c4, %c0_15, %c0_16] : memref<9x8x3xbf16, #tpu.memory_space<vmem>>, vector<1x8x3xbf16>
    %25 = vector.shape_cast %24 : vector<1x8x3xbf16> to vector<8x3xbf16>
    %cst_17 = arith.constant dense<0.000000e+00> : vector<8x384xf32>
    %26 = tpu.matmul %25, %23, %cst_17 {dimension_numbers = #tpu.dot_dimension_numbers<[1], [0], [0], [1], [0, 0, 1, 1], [], []>} : vector<8x3xbf16>, vector<3x384xbf16>, vector<8x384xf32> -> vector<8x384xf32>
    %27 = arith.addf %22, %26 : vector<8x384xf32>
    %28 = vector.extract_strided_slice %1 {offsets = [0, 20], sizes = [3, 384], strides = [1, 1]} : vector<3x512xbf16> to vector<3x384xbf16>
    %c5 = arith.constant 5 : index
    %c0_18 = arith.constant 0 : index
    %c0_19 = arith.constant 0 : index
    %29 = vector.load %arg2[%c5, %c0_18, %c0_19] : memref<9x8x3xbf16, #tpu.memory_space<vmem>>, vector<1x8x3xbf16>
    %30 = vector.shape_cast %29 : vector<1x8x3xbf16> to vector<8x3xbf16>
    %cst_20 = arith.constant dense<0.000000e+00> : vector<8x384xf32>
    %31 = tpu.matmul %30, %28, %cst_20 {dimension_numbers = #tpu.dot_dimension_numbers<[1], [0], [0], [1], [0, 0, 1, 1], [], []>} : vector<8x3xbf16>, vector<3x384xbf16>, vector<8x384xf32> -> vector<8x384xf32>
    %32 = arith.addf %27, %31 : vector<8x384xf32>
    %33 = vector.extract_strided_slice %1 {offsets = [0, 36], sizes = [3, 384], strides = [1, 1]} : vector<3x512xbf16> to vector<3x384xbf16>
    %c6 = arith.constant 6 : index
    %c0_21 = arith.constant 0 : index
    %c0_22 = arith.constant 0 : index
    %34 = vector.load %arg2[%c6, %c0_21, %c0_22] : memref<9x8x3xbf16, #tpu.memory_space<vmem>>, vector<1x8x3xbf16>
    %35 = vector.shape_cast %34 : vector<1x8x3xbf16> to vector<8x3xbf16>
    %cst_23 = arith.constant dense<0.000000e+00> : vector<8x384xf32>
    %36 = tpu.matmul %35, %33, %cst_23 {dimension_numbers = #tpu.dot_dimension_numbers<[1], [0], [0], [1], [0, 0, 1, 1], [], []>} : vector<8x3xbf16>, vector<3x384xbf16>, vector<8x384xf32> -> vector<8x384xf32>
    %37 = arith.addf %32, %36 : vector<8x384xf32>
    %38 = vector.extract_strided_slice %1 {offsets = [0, 37], sizes = [3, 384], strides = [1, 1]} : vector<3x512xbf16> to vector<3x384xbf16>
    %c7 = arith.constant 7 : index
    %c0_24 = arith.constant 0 : index
    %c0_25 = arith.constant 0 : index
    %39 = vector.load %arg2[%c7, %c0_24, %c0_25] : memref<9x8x3xbf16, #tpu.memory_space<vmem>>, vector<1x8x3xbf16>
    %40 = vector.shape_cast %39 : vector<1x8x3xbf16> to vector<8x3xbf16>
    %cst_26 = arith.constant dense<0.000000e+00> : vector<8x384xf32>
    %41 = tpu.matmul %40, %38, %cst_26 {dimension_numbers = #tpu.dot_dimension_numbers<[1], [0], [0], [1], [0, 0, 1, 1], [], []>} : vector<8x3xbf16>, vector<3x384xbf16>, vector<8x384xf32> -> vector<8x384xf32>
    %42 = arith.addf %37, %41 : vector<8x384xf32>
    %43 = vector.extract_strided_slice %1 {offsets = [0, 38], sizes = [3, 384], strides = [1, 1]} : vector<3x512xbf16> to vector<3x384xbf16>
    %c8 = arith.constant 8 : index
    %c0_27 = arith.constant 0 : index
    %c0_28 = arith.constant 0 : index
    %44 = vector.load %arg2[%c8, %c0_27, %c0_28] : memref<9x8x3xbf16, #tpu.memory_space<vmem>>, vector<1x8x3xbf16>
    %45 = vector.shape_cast %44 : vector<1x8x3xbf16> to vector<8x3xbf16>
    %cst_29 = arith.constant dense<0.000000e+00> : vector<8x384xf32>
    %46 = tpu.matmul %45, %43, %cst_29 {dimension_numbers = #tpu.dot_dimension_numbers<[1], [0], [0], [1], [0, 0, 1, 1], [], []>} : vector<8x3xbf16>, vector<3x384xbf16>, vector<8x384xf32> -> vector<8x384xf32>
    %47 = arith.addf %42, %46 : vector<8x384xf32>
    %c0_30 = arith.constant 0 : index
    %c0_31 = arith.constant 0 : index
    %48 = vector.load %arg3[%c0_30, %c0_31] : memref<8x1xf32, #tpu.memory_space<vmem>>, vector<8x1xf32>
    %49 = vector.broadcast %48 : vector<8x1xf32> to vector<8x384xf32>
    %50 = arith.addf %47, %49 : vector<8x384xf32>
    %cst_32 = arith.constant 0.000000e+00 : f32
    %51 = vector.broadcast %cst_32 : f32 to vector<8x384xf32>
    %52 = arith.maximumf %50, %51 : vector<8x384xf32>
    %c0_33 = arith.constant 0 : index
    %c0_34 = arith.constant 0 : index
    %53 = vector.load %arg4[%c0_33, %c0_34] : memref<1x384xf32, #tpu.memory_space<vmem>>, vector<1x384xf32>
    %54 = vector.broadcast %53 : vector<1x384xf32> to vector<8x384xf32>
    %55 = arith.mulf %52, %54 : vector<8x384xf32>
    %c0_35 = arith.constant 0 : index
    %c0_36 = arith.constant 0 : index
    %c0_37 = arith.constant 0 : index
    %56 = vector.load %arg5[%c0_35, %c0_36, %c0_37] : memref<1x8x384xf32, #tpu.memory_space<vmem>>, vector<1x8x384xf32>
    %57 = vector.shape_cast %56 : vector<1x8x384xf32> to vector<8x384xf32>
    %58 = vector.shape_cast %55 : vector<8x384xf32> to vector<1x8x384xf32>
    tpu.vector_store %arg5[%c0_35, %c0_36, %c0_37], %58 {strides = array<i32>} : memref<1x8x384xf32, #tpu.memory_space<vmem>>, vector<1x8x384xf32>,
    %cst_38 = arith.constant dense<0.000000e+00> : vector<8xf32>
    %59 = vector.multi_reduction <add>, %55, %cst_38 [1] : vector<8x384xf32> to vector<8xf32>
    %60 = vector.shape_cast %59 : vector<8xf32> to vector<8x1xf32>
    %61 = arith.mulf %55, %55 : vector<8x384xf32>
    %cst_39 = arith.constant dense<0.000000e+00> : vector<8xf32>
    %62 = vector.multi_reduction <add>, %61, %cst_39 [1] : vector<8x384xf32> to vector<8xf32>
    %63 = vector.shape_cast %62 : vector<8xf32> to vector<8x1xf32>
    %cst_40 = arith.constant 3.906250e-03 : f32
    %64 = vector.broadcast %cst_40 : f32 to vector<8x1xf32>
    %65 = arith.mulf %60, %64 : vector<8x1xf32>
    %cst_41 = arith.constant 2.560000e+02 : f32
    %66 = vector.broadcast %cst_41 : f32 to vector<8x1xf32>
    %67 = arith.mulf %66, %65 : vector<8x1xf32>
    %68 = arith.mulf %67, %65 : vector<8x1xf32>
    %69 = arith.subf %63, %68 : vector<8x1xf32>
    %cst_42 = arith.constant 0.000000e+00 : f32
    %70 = vector.broadcast %cst_42 : f32 to vector<8x1xf32>
    %71 = arith.maximumf %69, %70 : vector<8x1xf32>
    %c0_43 = arith.constant 0 : index
    %c0_44 = arith.constant 0 : index
    %c0_45 = arith.constant 0 : index
    %72 = vector.load %arg6[%c0_43, %c0_44, %c0_45] : memref<1x8x1xf32, #tpu.memory_space<vmem>>, vector<1x8x1xf32>
    %73 = vector.shape_cast %72 : vector<1x8x1xf32> to vector<8x1xf32>
    %74 = vector.shape_cast %65 : vector<8x1xf32> to vector<1x8x1xf32>
    tpu.vector_store %arg6[%c0_43, %c0_44, %c0_45], %74 {strides = array<i32>} : memref<1x8x1xf32, #tpu.memory_space<vmem>>, vector<1x8x1xf32>,
    %cst_46 = arith.constant 0.00392156886 : f32
    %75 = vector.broadcast %cst_46 : f32 to vector<8x1xf32>
    %76 = arith.mulf %71, %75 : vector<8x1xf32>
    %cst_47 = arith.constant 9.99999974E-6 : f32
    %77 = vector.broadcast %cst_47 : f32 to vector<8x1xf32>
    %78 = arith.addf %76, %77 : vector<8x1xf32>
    %79 = math.sqrt %78 : vector<8x1xf32>
    %c0_48 = arith.constant 0 : index
    %c0_49 = arith.constant 0 : index
    %c0_50 = arith.constant 0 : index
    %80 = vector.load %arg7[%c0_48, %c0_49, %c0_50] : memref<1x8x1xf32, #tpu.memory_space<vmem>>, vector<1x8x1xf32>
    %81 = vector.shape_cast %80 : vector<1x8x1xf32> to vector<8x1xf32>
    %82 = vector.shape_cast %79 : vector<8x1xf32> to vector<1x8x1xf32>
    tpu.vector_store %arg7[%c0_48, %c0_49, %c0_50], %82 {strides = array<i32>} : memref<1x8x1xf32, #tpu.memory_space<vmem>>, vector<1x8x1xf32>,
    return
  }
  func.func @transform_0(%arg0: i32) -> (i32, i32, i32) {
    %c0_i32 = arith.constant 0 : i32
    %c0_i32_0 = arith.constant 0 : i32
    %c0_i32_1 = arith.constant 0 : i32
    return %arg0, %c0_i32, %c0_i32_0 : i32, i32, i32
  }
  func.func @transform_1(%arg0: i32) -> (i32, i32, i32) {
    %c0_i32 = arith.constant 0 : i32
    %c0_i32_0 = arith.constant 0 : i32
    %c0_i32_1 = arith.constant 0 : i32
    %c0_i32_2 = arith.constant 0 : i32
    return %c0_i32, %c0_i32_0, %c0_i32_1 : i32, i32, i32
  }
  func.func @transform_2(%arg0: i32) -> (i32, i32) {
    %c0_i32 = arith.constant 0 : i32
    %c0_i32_0 = arith.constant 0 : i32
    %c0_i32_1 = arith.constant 0 : i32
    return %c0_i32, %c0_i32_0 : i32, i32
  }
  func.func @transform_3(%arg0: i32) -> (i32, i32) {
    %c0_i32 = arith.constant 0 : i32
    %c0_i32_0 = arith.constant 0 : i32
    %c0_i32_1 = arith.constant 0 : i32
    return %c0_i32, %c0_i32_0 : i32, i32
  }
  func.func @transform_4(%arg0: i32) -> (i32, i32, i32) {
    %c0_i32 = arith.constant 0 : i32
    %c0_i32_0 = arith.constant 0 : i32
    %c0_i32_1 = arith.constant 0 : i32
    return %arg0, %c0_i32, %c0_i32_0 : i32, i32, i32
  }
  func.func @transform_5(%arg0: i32) -> (i32, i32, i32) {
    %c0_i32 = arith.constant 0 : i32
    %c0_i32_0 = arith.constant 0 : i32
    %c0_i32_1 = arith.constant 0 : i32
    return %arg0, %c0_i32, %c0_i32_0 : i32, i32, i32
  }
  func.func @transform_6(%arg0: i32) -> (i32, i32, i32) {
    %c0_i32 = arith.constant 0 : i32
    %c0_i32_0 = arith.constant 0 : i32
    %c0_i32_1 = arith.constant 0 : i32
    return %arg0, %c0_i32, %c0_i32_0 : i32, i32, i32
  }
}

module attributes {stable_mosaic.version = 11 : i64} {
  func.func @_conv3x3_relu_stats_kernel(%arg0: i32, %arg1: memref<1x8x256xbf16, #tpu.memory_space<vmem>>, %arg2: memref<9x16x8xbf16, #tpu.memory_space<vmem>>, %arg3: memref<16x1xf32, #tpu.memory_space<vmem>>, %arg4: memref<1x128xf32, #tpu.memory_space<vmem>>, %arg5: memref<1x16x128xf32, #tpu.memory_space<vmem>>, %arg6: memref<1x16x1xf32, #tpu.memory_space<vmem>>, %arg7: memref<1x16x1xf32, #tpu.memory_space<vmem>>) attributes {dimension_semantics = [#tpu.dimension_semantics<parallel>], iteration_bounds = array<i64: 6>, scalar_prefetch = 0 : i64, scratch_operands = 0 : i64, tpu.core_type = #tpu.core_type<tc>, window_params = [{transform_indices = @transform_0, window_bounds = array<i64: 1, 8, 256>}, {pipeline_mode = #tpu.pipeline_mode<synchronous>, transform_indices = @transform_1, window_bounds = array<i64: 9, 16, 8>}, {pipeline_mode = #tpu.pipeline_mode<synchronous>, transform_indices = @transform_2, window_bounds = array<i64: 16, 1>}, {pipeline_mode = #tpu.pipeline_mode<synchronous>, transform_indices = @transform_3, window_bounds = array<i64: 1, 128>}, {transform_indices = @transform_4, window_bounds = array<i64: 1, 16, 128>}, {transform_indices = @transform_5, window_bounds = array<i64: 1, 16, 1>}, {transform_indices = @transform_6, window_bounds = array<i64: 1, 16, 1>}]} {
    %c0 = arith.constant 0 : index
    %c0_0 = arith.constant 0 : index
    %c0_1 = arith.constant 0 : index
    %0 = vector.load %arg1[%c0, %c0_0, %c0_1] : memref<1x8x256xbf16, #tpu.memory_space<vmem>>, vector<1x8x256xbf16>
    %1 = vector.shape_cast %0 : vector<1x8x256xbf16> to vector<8x256xbf16>
    %cst = arith.constant 0.000000e+00 : f32
    %2 = vector.broadcast %cst : f32 to vector<16x128xf32>
    %3 = vector.extract_strided_slice %1 {offsets = [0, 0], sizes = [8, 128], strides = [1, 1]} : vector<8x256xbf16> to vector<8x128xbf16>
    %c0_2 = arith.constant 0 : index
    %c0_3 = arith.constant 0 : index
    %c0_4 = arith.constant 0 : index
    %4 = vector.load %arg2[%c0_2, %c0_3, %c0_4] : memref<9x16x8xbf16, #tpu.memory_space<vmem>>, vector<1x16x8xbf16>
    %5 = vector.shape_cast %4 : vector<1x16x8xbf16> to vector<16x8xbf16>
    %cst_5 = arith.constant dense<0.000000e+00> : vector<16x128xf32>
    %6 = tpu.matmul %5, %3, %cst_5 {dimension_numbers = #tpu.dot_dimension_numbers<[1], [0], [0], [1], [0, 0, 1, 1], [], []>} : vector<16x8xbf16>, vector<8x128xbf16>, vector<16x128xf32> -> vector<16x128xf32>
    %7 = arith.addf %2, %6 : vector<16x128xf32>
    %8 = vector.extract_strided_slice %1 {offsets = [0, 1], sizes = [8, 128], strides = [1, 1]} : vector<8x256xbf16> to vector<8x128xbf16>
    %c1 = arith.constant 1 : index
    %c0_6 = arith.constant 0 : index
    %c0_7 = arith.constant 0 : index
    %9 = vector.load %arg2[%c1, %c0_6, %c0_7] : memref<9x16x8xbf16, #tpu.memory_space<vmem>>, vector<1x16x8xbf16>
    %10 = vector.shape_cast %9 : vector<1x16x8xbf16> to vector<16x8xbf16>
    %cst_8 = arith.constant dense<0.000000e+00> : vector<16x128xf32>
    %11 = tpu.matmul %10, %8, %cst_8 {dimension_numbers = #tpu.dot_dimension_numbers<[1], [0], [0], [1], [0, 0, 1, 1], [], []>} : vector<16x8xbf16>, vector<8x128xbf16>, vector<16x128xf32> -> vector<16x128xf32>
    %12 = arith.addf %7, %11 : vector<16x128xf32>
    %13 = vector.extract_strided_slice %1 {offsets = [0, 2], sizes = [8, 128], strides = [1, 1]} : vector<8x256xbf16> to vector<8x128xbf16>
    %c2 = arith.constant 2 : index
    %c0_9 = arith.constant 0 : index
    %c0_10 = arith.constant 0 : index
    %14 = vector.load %arg2[%c2, %c0_9, %c0_10] : memref<9x16x8xbf16, #tpu.memory_space<vmem>>, vector<1x16x8xbf16>
    %15 = vector.shape_cast %14 : vector<1x16x8xbf16> to vector<16x8xbf16>
    %cst_11 = arith.constant dense<0.000000e+00> : vector<16x128xf32>
    %16 = tpu.matmul %15, %13, %cst_11 {dimension_numbers = #tpu.dot_dimension_numbers<[1], [0], [0], [1], [0, 0, 1, 1], [], []>} : vector<16x8xbf16>, vector<8x128xbf16>, vector<16x128xf32> -> vector<16x128xf32>
    %17 = arith.addf %12, %16 : vector<16x128xf32>
    %18 = vector.extract_strided_slice %1 {offsets = [0, 10], sizes = [8, 128], strides = [1, 1]} : vector<8x256xbf16> to vector<8x128xbf16>
    %c3 = arith.constant 3 : index
    %c0_12 = arith.constant 0 : index
    %c0_13 = arith.constant 0 : index
    %19 = vector.load %arg2[%c3, %c0_12, %c0_13] : memref<9x16x8xbf16, #tpu.memory_space<vmem>>, vector<1x16x8xbf16>
    %20 = vector.shape_cast %19 : vector<1x16x8xbf16> to vector<16x8xbf16>
    %cst_14 = arith.constant dense<0.000000e+00> : vector<16x128xf32>
    %21 = tpu.matmul %20, %18, %cst_14 {dimension_numbers = #tpu.dot_dimension_numbers<[1], [0], [0], [1], [0, 0, 1, 1], [], []>} : vector<16x8xbf16>, vector<8x128xbf16>, vector<16x128xf32> -> vector<16x128xf32>
    %22 = arith.addf %17, %21 : vector<16x128xf32>
    %23 = vector.extract_strided_slice %1 {offsets = [0, 11], sizes = [8, 128], strides = [1, 1]} : vector<8x256xbf16> to vector<8x128xbf16>
    %c4 = arith.constant 4 : index
    %c0_15 = arith.constant 0 : index
    %c0_16 = arith.constant 0 : index
    %24 = vector.load %arg2[%c4, %c0_15, %c0_16] : memref<9x16x8xbf16, #tpu.memory_space<vmem>>, vector<1x16x8xbf16>
    %25 = vector.shape_cast %24 : vector<1x16x8xbf16> to vector<16x8xbf16>
    %cst_17 = arith.constant dense<0.000000e+00> : vector<16x128xf32>
    %26 = tpu.matmul %25, %23, %cst_17 {dimension_numbers = #tpu.dot_dimension_numbers<[1], [0], [0], [1], [0, 0, 1, 1], [], []>} : vector<16x8xbf16>, vector<8x128xbf16>, vector<16x128xf32> -> vector<16x128xf32>
    %27 = arith.addf %22, %26 : vector<16x128xf32>
    %28 = vector.extract_strided_slice %1 {offsets = [0, 12], sizes = [8, 128], strides = [1, 1]} : vector<8x256xbf16> to vector<8x128xbf16>
    %c5 = arith.constant 5 : index
    %c0_18 = arith.constant 0 : index
    %c0_19 = arith.constant 0 : index
    %29 = vector.load %arg2[%c5, %c0_18, %c0_19] : memref<9x16x8xbf16, #tpu.memory_space<vmem>>, vector<1x16x8xbf16>
    %30 = vector.shape_cast %29 : vector<1x16x8xbf16> to vector<16x8xbf16>
    %cst_20 = arith.constant dense<0.000000e+00> : vector<16x128xf32>
    %31 = tpu.matmul %30, %28, %cst_20 {dimension_numbers = #tpu.dot_dimension_numbers<[1], [0], [0], [1], [0, 0, 1, 1], [], []>} : vector<16x8xbf16>, vector<8x128xbf16>, vector<16x128xf32> -> vector<16x128xf32>
    %32 = arith.addf %27, %31 : vector<16x128xf32>
    %33 = vector.extract_strided_slice %1 {offsets = [0, 20], sizes = [8, 128], strides = [1, 1]} : vector<8x256xbf16> to vector<8x128xbf16>
    %c6 = arith.constant 6 : index
    %c0_21 = arith.constant 0 : index
    %c0_22 = arith.constant 0 : index
    %34 = vector.load %arg2[%c6, %c0_21, %c0_22] : memref<9x16x8xbf16, #tpu.memory_space<vmem>>, vector<1x16x8xbf16>
    %35 = vector.shape_cast %34 : vector<1x16x8xbf16> to vector<16x8xbf16>
    %cst_23 = arith.constant dense<0.000000e+00> : vector<16x128xf32>
    %36 = tpu.matmul %35, %33, %cst_23 {dimension_numbers = #tpu.dot_dimension_numbers<[1], [0], [0], [1], [0, 0, 1, 1], [], []>} : vector<16x8xbf16>, vector<8x128xbf16>, vector<16x128xf32> -> vector<16x128xf32>
    %37 = arith.addf %32, %36 : vector<16x128xf32>
    %38 = vector.extract_strided_slice %1 {offsets = [0, 21], sizes = [8, 128], strides = [1, 1]} : vector<8x256xbf16> to vector<8x128xbf16>
    %c7 = arith.constant 7 : index
    %c0_24 = arith.constant 0 : index
    %c0_25 = arith.constant 0 : index
    %39 = vector.load %arg2[%c7, %c0_24, %c0_25] : memref<9x16x8xbf16, #tpu.memory_space<vmem>>, vector<1x16x8xbf16>
    %40 = vector.shape_cast %39 : vector<1x16x8xbf16> to vector<16x8xbf16>
    %cst_26 = arith.constant dense<0.000000e+00> : vector<16x128xf32>
    %41 = tpu.matmul %40, %38, %cst_26 {dimension_numbers = #tpu.dot_dimension_numbers<[1], [0], [0], [1], [0, 0, 1, 1], [], []>} : vector<16x8xbf16>, vector<8x128xbf16>, vector<16x128xf32> -> vector<16x128xf32>
    %42 = arith.addf %37, %41 : vector<16x128xf32>
    %43 = vector.extract_strided_slice %1 {offsets = [0, 22], sizes = [8, 128], strides = [1, 1]} : vector<8x256xbf16> to vector<8x128xbf16>
    %c8 = arith.constant 8 : index
    %c0_27 = arith.constant 0 : index
    %c0_28 = arith.constant 0 : index
    %44 = vector.load %arg2[%c8, %c0_27, %c0_28] : memref<9x16x8xbf16, #tpu.memory_space<vmem>>, vector<1x16x8xbf16>
    %45 = vector.shape_cast %44 : vector<1x16x8xbf16> to vector<16x8xbf16>
    %cst_29 = arith.constant dense<0.000000e+00> : vector<16x128xf32>
    %46 = tpu.matmul %45, %43, %cst_29 {dimension_numbers = #tpu.dot_dimension_numbers<[1], [0], [0], [1], [0, 0, 1, 1], [], []>} : vector<16x8xbf16>, vector<8x128xbf16>, vector<16x128xf32> -> vector<16x128xf32>
    %47 = arith.addf %42, %46 : vector<16x128xf32>
    %c0_30 = arith.constant 0 : index
    %c0_31 = arith.constant 0 : index
    %48 = vector.load %arg3[%c0_30, %c0_31] : memref<16x1xf32, #tpu.memory_space<vmem>>, vector<16x1xf32>
    %49 = vector.broadcast %48 : vector<16x1xf32> to vector<16x128xf32>
    %50 = arith.addf %47, %49 : vector<16x128xf32>
    %cst_32 = arith.constant 0.000000e+00 : f32
    %51 = vector.broadcast %cst_32 : f32 to vector<16x128xf32>
    %52 = arith.maximumf %50, %51 : vector<16x128xf32>
    %c0_33 = arith.constant 0 : index
    %c0_34 = arith.constant 0 : index
    %53 = vector.load %arg4[%c0_33, %c0_34] : memref<1x128xf32, #tpu.memory_space<vmem>>, vector<1x128xf32>
    %54 = vector.broadcast %53 : vector<1x128xf32> to vector<16x128xf32>
    %55 = arith.mulf %52, %54 : vector<16x128xf32>
    %c0_35 = arith.constant 0 : index
    %c0_36 = arith.constant 0 : index
    %c0_37 = arith.constant 0 : index
    %56 = vector.load %arg5[%c0_35, %c0_36, %c0_37] : memref<1x16x128xf32, #tpu.memory_space<vmem>>, vector<1x16x128xf32>
    %57 = vector.shape_cast %56 : vector<1x16x128xf32> to vector<16x128xf32>
    %58 = vector.shape_cast %55 : vector<16x128xf32> to vector<1x16x128xf32>
    tpu.vector_store %arg5[%c0_35, %c0_36, %c0_37], %58 {strides = array<i32>} : memref<1x16x128xf32, #tpu.memory_space<vmem>>, vector<1x16x128xf32>,
    %cst_38 = arith.constant dense<0.000000e+00> : vector<16xf32>
    %59 = vector.multi_reduction <add>, %55, %cst_38 [1] : vector<16x128xf32> to vector<16xf32>
    %60 = vector.shape_cast %59 : vector<16xf32> to vector<16x1xf32>
    %61 = arith.mulf %55, %55 : vector<16x128xf32>
    %cst_39 = arith.constant dense<0.000000e+00> : vector<16xf32>
    %62 = vector.multi_reduction <add>, %61, %cst_39 [1] : vector<16x128xf32> to vector<16xf32>
    %63 = vector.shape_cast %62 : vector<16xf32> to vector<16x1xf32>
    %cst_40 = arith.constant 1.562500e-02 : f32
    %64 = vector.broadcast %cst_40 : f32 to vector<16x1xf32>
    %65 = arith.mulf %60, %64 : vector<16x1xf32>
    %cst_41 = arith.constant 6.400000e+01 : f32
    %66 = vector.broadcast %cst_41 : f32 to vector<16x1xf32>
    %67 = arith.mulf %66, %65 : vector<16x1xf32>
    %68 = arith.mulf %67, %65 : vector<16x1xf32>
    %69 = arith.subf %63, %68 : vector<16x1xf32>
    %cst_42 = arith.constant 0.000000e+00 : f32
    %70 = vector.broadcast %cst_42 : f32 to vector<16x1xf32>
    %71 = arith.maximumf %69, %70 : vector<16x1xf32>
    %c0_43 = arith.constant 0 : index
    %c0_44 = arith.constant 0 : index
    %c0_45 = arith.constant 0 : index
    %72 = vector.load %arg6[%c0_43, %c0_44, %c0_45] : memref<1x16x1xf32, #tpu.memory_space<vmem>>, vector<1x16x1xf32>
    %73 = vector.shape_cast %72 : vector<1x16x1xf32> to vector<16x1xf32>
    %74 = vector.shape_cast %65 : vector<16x1xf32> to vector<1x16x1xf32>
    tpu.vector_store %arg6[%c0_43, %c0_44, %c0_45], %74 {strides = array<i32>} : memref<1x16x1xf32, #tpu.memory_space<vmem>>, vector<1x16x1xf32>,
    %cst_46 = arith.constant 0.0158730168 : f32
    %75 = vector.broadcast %cst_46 : f32 to vector<16x1xf32>
    %76 = arith.mulf %71, %75 : vector<16x1xf32>
    %cst_47 = arith.constant 9.99999974E-6 : f32
    %77 = vector.broadcast %cst_47 : f32 to vector<16x1xf32>
    %78 = arith.addf %76, %77 : vector<16x1xf32>
    %79 = math.sqrt %78 : vector<16x1xf32>
    %c0_48 = arith.constant 0 : index
    %c0_49 = arith.constant 0 : index
    %c0_50 = arith.constant 0 : index
    %80 = vector.load %arg7[%c0_48, %c0_49, %c0_50] : memref<1x16x1xf32, #tpu.memory_space<vmem>>, vector<1x16x1xf32>
    %81 = vector.shape_cast %80 : vector<1x16x1xf32> to vector<16x1xf32>
    %82 = vector.shape_cast %79 : vector<16x1xf32> to vector<1x16x1xf32>
    tpu.vector_store %arg7[%c0_48, %c0_49, %c0_50], %82 {strides = array<i32>} : memref<1x16x1xf32, #tpu.memory_space<vmem>>, vector<1x16x1xf32>,
    return
  }
  func.func @transform_0(%arg0: i32) -> (i32, i32, i32) {
    %c0_i32 = arith.constant 0 : i32
    %c0_i32_0 = arith.constant 0 : i32
    %c0_i32_1 = arith.constant 0 : i32
    return %arg0, %c0_i32, %c0_i32_0 : i32, i32, i32
  }
  func.func @transform_1(%arg0: i32) -> (i32, i32, i32) {
    %c0_i32 = arith.constant 0 : i32
    %c0_i32_0 = arith.constant 0 : i32
    %c0_i32_1 = arith.constant 0 : i32
    %c0_i32_2 = arith.constant 0 : i32
    return %c0_i32, %c0_i32_0, %c0_i32_1 : i32, i32, i32
  }
  func.func @transform_2(%arg0: i32) -> (i32, i32) {
    %c0_i32 = arith.constant 0 : i32
    %c0_i32_0 = arith.constant 0 : i32
    %c0_i32_1 = arith.constant 0 : i32
    return %c0_i32, %c0_i32_0 : i32, i32
  }
  func.func @transform_3(%arg0: i32) -> (i32, i32) {
    %c0_i32 = arith.constant 0 : i32
    %c0_i32_0 = arith.constant 0 : i32
    %c0_i32_1 = arith.constant 0 : i32
    return %c0_i32, %c0_i32_0 : i32, i32
  }
  func.func @transform_4(%arg0: i32) -> (i32, i32, i32) {
    %c0_i32 = arith.constant 0 : i32
    %c0_i32_0 = arith.constant 0 : i32
    %c0_i32_1 = arith.constant 0 : i32
    return %arg0, %c0_i32, %c0_i32_0 : i32, i32, i32
  }
  func.func @transform_5(%arg0: i32) -> (i32, i32, i32) {
    %c0_i32 = arith.constant 0 : i32
    %c0_i32_0 = arith.constant 0 : i32
    %c0_i32_1 = arith.constant 0 : i32
    return %arg0, %c0_i32, %c0_i32_0 : i32, i32, i32
  }
  func.func @transform_6(%arg0: i32) -> (i32, i32, i32) {
    %c0_i32 = arith.constant 0 : i32
    %c0_i32_0 = arith.constant 0 : i32
    %c0_i32_1 = arith.constant 0 : i32
    return %arg0, %c0_i32, %c0_i32_0 : i32, i32, i32
  }
}

module attributes {stable_mosaic.version = 11 : i64} {
  func.func @_conv3x3_relu_stats_kernel(%arg0: i32, %arg1: memref<1x16x256xbf16, #tpu.memory_space<vmem>>, %arg2: memref<9x32x16xbf16, #tpu.memory_space<vmem>>, %arg3: memref<32x1xf32, #tpu.memory_space<vmem>>, %arg4: memref<1x128xf32, #tpu.memory_space<vmem>>, %arg5: memref<1x32x128xf32, #tpu.memory_space<vmem>>, %arg6: memref<1x32x1xf32, #tpu.memory_space<vmem>>, %arg7: memref<1x32x1xf32, #tpu.memory_space<vmem>>) attributes {dimension_semantics = [#tpu.dimension_semantics<parallel>], iteration_bounds = array<i64: 6>, scalar_prefetch = 0 : i64, scratch_operands = 0 : i64, tpu.core_type = #tpu.core_type<tc>, window_params = [{transform_indices = @transform_0, window_bounds = array<i64: 1, 16, 256>}, {pipeline_mode = #tpu.pipeline_mode<synchronous>, transform_indices = @transform_1, window_bounds = array<i64: 9, 32, 16>}, {pipeline_mode = #tpu.pipeline_mode<synchronous>, transform_indices = @transform_2, window_bounds = array<i64: 32, 1>}, {pipeline_mode = #tpu.pipeline_mode<synchronous>, transform_indices = @transform_3, window_bounds = array<i64: 1, 128>}, {transform_indices = @transform_4, window_bounds = array<i64: 1, 32, 128>}, {transform_indices = @transform_5, window_bounds = array<i64: 1, 32, 1>}, {transform_indices = @transform_6, window_bounds = array<i64: 1, 32, 1>}]} {
    %c0 = arith.constant 0 : index
    %c0_0 = arith.constant 0 : index
    %c0_1 = arith.constant 0 : index
    %0 = vector.load %arg1[%c0, %c0_0, %c0_1] : memref<1x16x256xbf16, #tpu.memory_space<vmem>>, vector<1x16x256xbf16>
    %1 = vector.shape_cast %0 : vector<1x16x256xbf16> to vector<16x256xbf16>
    %cst = arith.constant 0.000000e+00 : f32
    %2 = vector.broadcast %cst : f32 to vector<32x128xf32>
    %3 = vector.extract_strided_slice %1 {offsets = [0, 0], sizes = [16, 128], strides = [1, 1]} : vector<16x256xbf16> to vector<16x128xbf16>
    %c0_2 = arith.constant 0 : index
    %c0_3 = arith.constant 0 : index
    %c0_4 = arith.constant 0 : index
    %4 = vector.load %arg2[%c0_2, %c0_3, %c0_4] : memref<9x32x16xbf16, #tpu.memory_space<vmem>>, vector<1x32x16xbf16>
    %5 = vector.shape_cast %4 : vector<1x32x16xbf16> to vector<32x16xbf16>
    %cst_5 = arith.constant dense<0.000000e+00> : vector<32x128xf32>
    %6 = tpu.matmul %5, %3, %cst_5 {dimension_numbers = #tpu.dot_dimension_numbers<[1], [0], [0], [1], [0, 0, 1, 1], [], []>} : vector<32x16xbf16>, vector<16x128xbf16>, vector<32x128xf32> -> vector<32x128xf32>
    %7 = arith.addf %2, %6 : vector<32x128xf32>
    %8 = vector.extract_strided_slice %1 {offsets = [0, 1], sizes = [16, 128], strides = [1, 1]} : vector<16x256xbf16> to vector<16x128xbf16>
    %c1 = arith.constant 1 : index
    %c0_6 = arith.constant 0 : index
    %c0_7 = arith.constant 0 : index
    %9 = vector.load %arg2[%c1, %c0_6, %c0_7] : memref<9x32x16xbf16, #tpu.memory_space<vmem>>, vector<1x32x16xbf16>
    %10 = vector.shape_cast %9 : vector<1x32x16xbf16> to vector<32x16xbf16>
    %cst_8 = arith.constant dense<0.000000e+00> : vector<32x128xf32>
    %11 = tpu.matmul %10, %8, %cst_8 {dimension_numbers = #tpu.dot_dimension_numbers<[1], [0], [0], [1], [0, 0, 1, 1], [], []>} : vector<32x16xbf16>, vector<16x128xbf16>, vector<32x128xf32> -> vector<32x128xf32>
    %12 = arith.addf %7, %11 : vector<32x128xf32>
    %13 = vector.extract_strided_slice %1 {offsets = [0, 2], sizes = [16, 128], strides = [1, 1]} : vector<16x256xbf16> to vector<16x128xbf16>
    %c2 = arith.constant 2 : index
    %c0_9 = arith.constant 0 : index
    %c0_10 = arith.constant 0 : index
    %14 = vector.load %arg2[%c2, %c0_9, %c0_10] : memref<9x32x16xbf16, #tpu.memory_space<vmem>>, vector<1x32x16xbf16>
    %15 = vector.shape_cast %14 : vector<1x32x16xbf16> to vector<32x16xbf16>
    %cst_11 = arith.constant dense<0.000000e+00> : vector<32x128xf32>
    %16 = tpu.matmul %15, %13, %cst_11 {dimension_numbers = #tpu.dot_dimension_numbers<[1], [0], [0], [1], [0, 0, 1, 1], [], []>} : vector<32x16xbf16>, vector<16x128xbf16>, vector<32x128xf32> -> vector<32x128xf32>
    %17 = arith.addf %12, %16 : vector<32x128xf32>
    %18 = vector.extract_strided_slice %1 {offsets = [0, 6], sizes = [16, 128], strides = [1, 1]} : vector<16x256xbf16> to vector<16x128xbf16>
    %c3 = arith.constant 3 : index
    %c0_12 = arith.constant 0 : index
    %c0_13 = arith.constant 0 : index
    %19 = vector.load %arg2[%c3, %c0_12, %c0_13] : memref<9x32x16xbf16, #tpu.memory_space<vmem>>, vector<1x32x16xbf16>
    %20 = vector.shape_cast %19 : vector<1x32x16xbf16> to vector<32x16xbf16>
    %cst_14 = arith.constant dense<0.000000e+00> : vector<32x128xf32>
    %21 = tpu.matmul %20, %18, %cst_14 {dimension_numbers = #tpu.dot_dimension_numbers<[1], [0], [0], [1], [0, 0, 1, 1], [], []>} : vector<32x16xbf16>, vector<16x128xbf16>, vector<32x128xf32> -> vector<32x128xf32>
    %22 = arith.addf %17, %21 : vector<32x128xf32>
    %23 = vector.extract_strided_slice %1 {offsets = [0, 7], sizes = [16, 128], strides = [1, 1]} : vector<16x256xbf16> to vector<16x128xbf16>
    %c4 = arith.constant 4 : index
    %c0_15 = arith.constant 0 : index
    %c0_16 = arith.constant 0 : index
    %24 = vector.load %arg2[%c4, %c0_15, %c0_16] : memref<9x32x16xbf16, #tpu.memory_space<vmem>>, vector<1x32x16xbf16>
    %25 = vector.shape_cast %24 : vector<1x32x16xbf16> to vector<32x16xbf16>
    %cst_17 = arith.constant dense<0.000000e+00> : vector<32x128xf32>
    %26 = tpu.matmul %25, %23, %cst_17 {dimension_numbers = #tpu.dot_dimension_numbers<[1], [0], [0], [1], [0, 0, 1, 1], [], []>} : vector<32x16xbf16>, vector<16x128xbf16>, vector<32x128xf32> -> vector<32x128xf32>
    %27 = arith.addf %22, %26 : vector<32x128xf32>
    %28 = vector.extract_strided_slice %1 {offsets = [0, 8], sizes = [16, 128], strides = [1, 1]} : vector<16x256xbf16> to vector<16x128xbf16>
    %c5 = arith.constant 5 : index
    %c0_18 = arith.constant 0 : index
    %c0_19 = arith.constant 0 : index
    %29 = vector.load %arg2[%c5, %c0_18, %c0_19] : memref<9x32x16xbf16, #tpu.memory_space<vmem>>, vector<1x32x16xbf16>
    %30 = vector.shape_cast %29 : vector<1x32x16xbf16> to vector<32x16xbf16>
    %cst_20 = arith.constant dense<0.000000e+00> : vector<32x128xf32>
    %31 = tpu.matmul %30, %28, %cst_20 {dimension_numbers = #tpu.dot_dimension_numbers<[1], [0], [0], [1], [0, 0, 1, 1], [], []>} : vector<32x16xbf16>, vector<16x128xbf16>, vector<32x128xf32> -> vector<32x128xf32>
    %32 = arith.addf %27, %31 : vector<32x128xf32>
    %33 = vector.extract_strided_slice %1 {offsets = [0, 12], sizes = [16, 128], strides = [1, 1]} : vector<16x256xbf16> to vector<16x128xbf16>
    %c6 = arith.constant 6 : index
    %c0_21 = arith.constant 0 : index
    %c0_22 = arith.constant 0 : index
    %34 = vector.load %arg2[%c6, %c0_21, %c0_22] : memref<9x32x16xbf16, #tpu.memory_space<vmem>>, vector<1x32x16xbf16>
    %35 = vector.shape_cast %34 : vector<1x32x16xbf16> to vector<32x16xbf16>
    %cst_23 = arith.constant dense<0.000000e+00> : vector<32x128xf32>
    %36 = tpu.matmul %35, %33, %cst_23 {dimension_numbers = #tpu.dot_dimension_numbers<[1], [0], [0], [1], [0, 0, 1, 1], [], []>} : vector<32x16xbf16>, vector<16x128xbf16>, vector<32x128xf32> -> vector<32x128xf32>
    %37 = arith.addf %32, %36 : vector<32x128xf32>
    %38 = vector.extract_strided_slice %1 {offsets = [0, 13], sizes = [16, 128], strides = [1, 1]} : vector<16x256xbf16> to vector<16x128xbf16>
    %c7 = arith.constant 7 : index
    %c0_24 = arith.constant 0 : index
    %c0_25 = arith.constant 0 : index
    %39 = vector.load %arg2[%c7, %c0_24, %c0_25] : memref<9x32x16xbf16, #tpu.memory_space<vmem>>, vector<1x32x16xbf16>
    %40 = vector.shape_cast %39 : vector<1x32x16xbf16> to vector<32x16xbf16>
    %cst_26 = arith.constant dense<0.000000e+00> : vector<32x128xf32>
    %41 = tpu.matmul %40, %38, %cst_26 {dimension_numbers = #tpu.dot_dimension_numbers<[1], [0], [0], [1], [0, 0, 1, 1], [], []>} : vector<32x16xbf16>, vector<16x128xbf16>, vector<32x128xf32> -> vector<32x128xf32>
    %42 = arith.addf %37, %41 : vector<32x128xf32>
    %43 = vector.extract_strided_slice %1 {offsets = [0, 14], sizes = [16, 128], strides = [1, 1]} : vector<16x256xbf16> to vector<16x128xbf16>
    %c8 = arith.constant 8 : index
    %c0_27 = arith.constant 0 : index
    %c0_28 = arith.constant 0 : index
    %44 = vector.load %arg2[%c8, %c0_27, %c0_28] : memref<9x32x16xbf16, #tpu.memory_space<vmem>>, vector<1x32x16xbf16>
    %45 = vector.shape_cast %44 : vector<1x32x16xbf16> to vector<32x16xbf16>
    %cst_29 = arith.constant dense<0.000000e+00> : vector<32x128xf32>
    %46 = tpu.matmul %45, %43, %cst_29 {dimension_numbers = #tpu.dot_dimension_numbers<[1], [0], [0], [1], [0, 0, 1, 1], [], []>} : vector<32x16xbf16>, vector<16x128xbf16>, vector<32x128xf32> -> vector<32x128xf32>
    %47 = arith.addf %42, %46 : vector<32x128xf32>
    %c0_30 = arith.constant 0 : index
    %c0_31 = arith.constant 0 : index
    %48 = vector.load %arg3[%c0_30, %c0_31] : memref<32x1xf32, #tpu.memory_space<vmem>>, vector<32x1xf32>
    %49 = vector.broadcast %48 : vector<32x1xf32> to vector<32x128xf32>
    %50 = arith.addf %47, %49 : vector<32x128xf32>
    %cst_32 = arith.constant 0.000000e+00 : f32
    %51 = vector.broadcast %cst_32 : f32 to vector<32x128xf32>
    %52 = arith.maximumf %50, %51 : vector<32x128xf32>
    %c0_33 = arith.constant 0 : index
    %c0_34 = arith.constant 0 : index
    %53 = vector.load %arg4[%c0_33, %c0_34] : memref<1x128xf32, #tpu.memory_space<vmem>>, vector<1x128xf32>
    %54 = vector.broadcast %53 : vector<1x128xf32> to vector<32x128xf32>
    %55 = arith.mulf %52, %54 : vector<32x128xf32>
    %c0_35 = arith.constant 0 : index
    %c0_36 = arith.constant 0 : index
    %c0_37 = arith.constant 0 : index
    %56 = vector.load %arg5[%c0_35, %c0_36, %c0_37] : memref<1x32x128xf32, #tpu.memory_space<vmem>>, vector<1x32x128xf32>
    %57 = vector.shape_cast %56 : vector<1x32x128xf32> to vector<32x128xf32>
    %58 = vector.shape_cast %55 : vector<32x128xf32> to vector<1x32x128xf32>
    tpu.vector_store %arg5[%c0_35, %c0_36, %c0_37], %58 {strides = array<i32>} : memref<1x32x128xf32, #tpu.memory_space<vmem>>, vector<1x32x128xf32>,
    %cst_38 = arith.constant dense<0.000000e+00> : vector<32xf32>
    %59 = vector.multi_reduction <add>, %55, %cst_38 [1] : vector<32x128xf32> to vector<32xf32>
    %60 = vector.shape_cast %59 : vector<32xf32> to vector<32x1xf32>
    %61 = arith.mulf %55, %55 : vector<32x128xf32>
    %cst_39 = arith.constant dense<0.000000e+00> : vector<32xf32>
    %62 = vector.multi_reduction <add>, %61, %cst_39 [1] : vector<32x128xf32> to vector<32xf32>
    %63 = vector.shape_cast %62 : vector<32xf32> to vector<32x1xf32>
    %cst_40 = arith.constant 6.250000e-02 : f32
    %64 = vector.broadcast %cst_40 : f32 to vector<32x1xf32>
    %65 = arith.mulf %60, %64 : vector<32x1xf32>
    %cst_41 = arith.constant 1.600000e+01 : f32
    %66 = vector.broadcast %cst_41 : f32 to vector<32x1xf32>
    %67 = arith.mulf %66, %65 : vector<32x1xf32>
    %68 = arith.mulf %67, %65 : vector<32x1xf32>
    %69 = arith.subf %63, %68 : vector<32x1xf32>
    %cst_42 = arith.constant 0.000000e+00 : f32
    %70 = vector.broadcast %cst_42 : f32 to vector<32x1xf32>
    %71 = arith.maximumf %69, %70 : vector<32x1xf32>
    %c0_43 = arith.constant 0 : index
    %c0_44 = arith.constant 0 : index
    %c0_45 = arith.constant 0 : index
    %72 = vector.load %arg6[%c0_43, %c0_44, %c0_45] : memref<1x32x1xf32, #tpu.memory_space<vmem>>, vector<1x32x1xf32>
    %73 = vector.shape_cast %72 : vector<1x32x1xf32> to vector<32x1xf32>
    %74 = vector.shape_cast %65 : vector<32x1xf32> to vector<1x32x1xf32>
    tpu.vector_store %arg6[%c0_43, %c0_44, %c0_45], %74 {strides = array<i32>} : memref<1x32x1xf32, #tpu.memory_space<vmem>>, vector<1x32x1xf32>,
    %cst_46 = arith.constant 0.0666666701 : f32
    %75 = vector.broadcast %cst_46 : f32 to vector<32x1xf32>
    %76 = arith.mulf %71, %75 : vector<32x1xf32>
    %cst_47 = arith.constant 9.99999974E-6 : f32
    %77 = vector.broadcast %cst_47 : f32 to vector<32x1xf32>
    %78 = arith.addf %76, %77 : vector<32x1xf32>
    %79 = math.sqrt %78 : vector<32x1xf32>
    %c0_48 = arith.constant 0 : index
    %c0_49 = arith.constant 0 : index
    %c0_50 = arith.constant 0 : index
    %80 = vector.load %arg7[%c0_48, %c0_49, %c0_50] : memref<1x32x1xf32, #tpu.memory_space<vmem>>, vector<1x32x1xf32>
    %81 = vector.shape_cast %80 : vector<1x32x1xf32> to vector<32x1xf32>
    %82 = vector.shape_cast %79 : vector<32x1xf32> to vector<1x32x1xf32>
    tpu.vector_store %arg7[%c0_48, %c0_49, %c0_50], %82 {strides = array<i32>} : memref<1x32x1xf32, #tpu.memory_space<vmem>>, vector<1x32x1xf32>,
    return
  }
  func.func @transform_0(%arg0: i32) -> (i32, i32, i32) {
    %c0_i32 = arith.constant 0 : i32
    %c0_i32_0 = arith.constant 0 : i32
    %c0_i32_1 = arith.constant 0 : i32
    return %arg0, %c0_i32, %c0_i32_0 : i32, i32, i32
  }
  func.func @transform_1(%arg0: i32) -> (i32, i32, i32) {
    %c0_i32 = arith.constant 0 : i32
    %c0_i32_0 = arith.constant 0 : i32
    %c0_i32_1 = arith.constant 0 : i32
    %c0_i32_2 = arith.constant 0 : i32
    return %c0_i32, %c0_i32_0, %c0_i32_1 : i32, i32, i32
  }
  func.func @transform_2(%arg0: i32) -> (i32, i32) {
    %c0_i32 = arith.constant 0 : i32
    %c0_i32_0 = arith.constant 0 : i32
    %c0_i32_1 = arith.constant 0 : i32
    return %c0_i32, %c0_i32_0 : i32, i32
  }
  func.func @transform_3(%arg0: i32) -> (i32, i32) {
    %c0_i32 = arith.constant 0 : i32
    %c0_i32_0 = arith.constant 0 : i32
    %c0_i32_1 = arith.constant 0 : i32
    return %c0_i32, %c0_i32_0 : i32, i32
  }
  func.func @transform_4(%arg0: i32) -> (i32, i32, i32) {
    %c0_i32 = arith.constant 0 : i32
    %c0_i32_0 = arith.constant 0 : i32
    %c0_i32_1 = arith.constant 0 : i32
    return %arg0, %c0_i32, %c0_i32_0 : i32, i32, i32
  }
  func.func @transform_5(%arg0: i32) -> (i32, i32, i32) {
    %c0_i32 = arith.constant 0 : i32
    %c0_i32_0 = arith.constant 0 : i32
    %c0_i32_1 = arith.constant 0 : i32
    return %arg0, %c0_i32, %c0_i32_0 : i32, i32, i32
  }
  func.func @transform_6(%arg0: i32) -> (i32, i32, i32) {
    %c0_i32 = arith.constant 0 : i32
    %c0_i32_0 = arith.constant 0 : i32
    %c0_i32_1 = arith.constant 0 : i32
    return %arg0, %c0_i32, %c0_i32_0 : i32, i32, i32
  }
}

module attributes {stable_mosaic.version = 11 : i64} {
  func.func @_conv3x3_relu_stats_kernel(%arg0: i32, %arg1: memref<1x32x256xbf16, #tpu.memory_space<vmem>>, %arg2: memref<9x64x32xbf16, #tpu.memory_space<vmem>>, %arg3: memref<64x1xf32, #tpu.memory_space<vmem>>, %arg4: memref<1x128xf32, #tpu.memory_space<vmem>>, %arg5: memref<1x64x128xf32, #tpu.memory_space<vmem>>, %arg6: memref<1x64x1xf32, #tpu.memory_space<vmem>>, %arg7: memref<1x64x1xf32, #tpu.memory_space<vmem>>) attributes {dimension_semantics = [#tpu.dimension_semantics<parallel>], iteration_bounds = array<i64: 6>, scalar_prefetch = 0 : i64, scratch_operands = 0 : i64, tpu.core_type = #tpu.core_type<tc>, window_params = [{transform_indices = @transform_0, window_bounds = array<i64: 1, 32, 256>}, {pipeline_mode = #tpu.pipeline_mode<synchronous>, transform_indices = @transform_1, window_bounds = array<i64: 9, 64, 32>}, {pipeline_mode = #tpu.pipeline_mode<synchronous>, transform_indices = @transform_2, window_bounds = array<i64: 64, 1>}, {pipeline_mode = #tpu.pipeline_mode<synchronous>, transform_indices = @transform_3, window_bounds = array<i64: 1, 128>}, {transform_indices = @transform_4, window_bounds = array<i64: 1, 64, 128>}, {transform_indices = @transform_5, window_bounds = array<i64: 1, 64, 1>}, {transform_indices = @transform_6, window_bounds = array<i64: 1, 64, 1>}]} {
    %c0 = arith.constant 0 : index
    %c0_0 = arith.constant 0 : index
    %c0_1 = arith.constant 0 : index
    %0 = vector.load %arg1[%c0, %c0_0, %c0_1] : memref<1x32x256xbf16, #tpu.memory_space<vmem>>, vector<1x32x256xbf16>
    %1 = vector.shape_cast %0 : vector<1x32x256xbf16> to vector<32x256xbf16>
    %cst = arith.constant 0.000000e+00 : f32
    %2 = vector.broadcast %cst : f32 to vector<64x128xf32>
    %3 = vector.extract_strided_slice %1 {offsets = [0, 0], sizes = [32, 128], strides = [1, 1]} : vector<32x256xbf16> to vector<32x128xbf16>
    %c0_2 = arith.constant 0 : index
    %c0_3 = arith.constant 0 : index
    %c0_4 = arith.constant 0 : index
    %4 = vector.load %arg2[%c0_2, %c0_3, %c0_4] : memref<9x64x32xbf16, #tpu.memory_space<vmem>>, vector<1x64x32xbf16>
    %5 = vector.shape_cast %4 : vector<1x64x32xbf16> to vector<64x32xbf16>
    %cst_5 = arith.constant dense<0.000000e+00> : vector<64x128xf32>
    %6 = tpu.matmul %5, %3, %cst_5 {dimension_numbers = #tpu.dot_dimension_numbers<[1], [0], [0], [1], [0, 0, 1, 1], [], []>} : vector<64x32xbf16>, vector<32x128xbf16>, vector<64x128xf32> -> vector<64x128xf32>
    %7 = arith.addf %2, %6 : vector<64x128xf32>
    %8 = vector.extract_strided_slice %1 {offsets = [0, 1], sizes = [32, 128], strides = [1, 1]} : vector<32x256xbf16> to vector<32x128xbf16>
    %c1 = arith.constant 1 : index
    %c0_6 = arith.constant 0 : index
    %c0_7 = arith.constant 0 : index
    %9 = vector.load %arg2[%c1, %c0_6, %c0_7] : memref<9x64x32xbf16, #tpu.memory_space<vmem>>, vector<1x64x32xbf16>
    %10 = vector.shape_cast %9 : vector<1x64x32xbf16> to vector<64x32xbf16>
    %cst_8 = arith.constant dense<0.000000e+00> : vector<64x128xf32>
    %11 = tpu.matmul %10, %8, %cst_8 {dimension_numbers = #tpu.dot_dimension_numbers<[1], [0], [0], [1], [0, 0, 1, 1], [], []>} : vector<64x32xbf16>, vector<32x128xbf16>, vector<64x128xf32> -> vector<64x128xf32>
    %12 = arith.addf %7, %11 : vector<64x128xf32>
    %13 = vector.extract_strided_slice %1 {offsets = [0, 2], sizes = [32, 128], strides = [1, 1]} : vector<32x256xbf16> to vector<32x128xbf16>
    %c2 = arith.constant 2 : index
    %c0_9 = arith.constant 0 : index
    %c0_10 = arith.constant 0 : index
    %14 = vector.load %arg2[%c2, %c0_9, %c0_10] : memref<9x64x32xbf16, #tpu.memory_space<vmem>>, vector<1x64x32xbf16>
    %15 = vector.shape_cast %14 : vector<1x64x32xbf16> to vector<64x32xbf16>
    %cst_11 = arith.constant dense<0.000000e+00> : vector<64x128xf32>
    %16 = tpu.matmul %15, %13, %cst_11 {dimension_numbers = #tpu.dot_dimension_numbers<[1], [0], [0], [1], [0, 0, 1, 1], [], []>} : vector<64x32xbf16>, vector<32x128xbf16>, vector<64x128xf32> -> vector<64x128xf32>
    %17 = arith.addf %12, %16 : vector<64x128xf32>
    %18 = vector.extract_strided_slice %1 {offsets = [0, 4], sizes = [32, 128], strides = [1, 1]} : vector<32x256xbf16> to vector<32x128xbf16>
    %c3 = arith.constant 3 : index
    %c0_12 = arith.constant 0 : index
    %c0_13 = arith.constant 0 : index
    %19 = vector.load %arg2[%c3, %c0_12, %c0_13] : memref<9x64x32xbf16, #tpu.memory_space<vmem>>, vector<1x64x32xbf16>
    %20 = vector.shape_cast %19 : vector<1x64x32xbf16> to vector<64x32xbf16>
    %cst_14 = arith.constant dense<0.000000e+00> : vector<64x128xf32>
    %21 = tpu.matmul %20, %18, %cst_14 {dimension_numbers = #tpu.dot_dimension_numbers<[1], [0], [0], [1], [0, 0, 1, 1], [], []>} : vector<64x32xbf16>, vector<32x128xbf16>, vector<64x128xf32> -> vector<64x128xf32>
    %22 = arith.addf %17, %21 : vector<64x128xf32>
    %23 = vector.extract_strided_slice %1 {offsets = [0, 5], sizes = [32, 128], strides = [1, 1]} : vector<32x256xbf16> to vector<32x128xbf16>
    %c4 = arith.constant 4 : index
    %c0_15 = arith.constant 0 : index
    %c0_16 = arith.constant 0 : index
    %24 = vector.load %arg2[%c4, %c0_15, %c0_16] : memref<9x64x32xbf16, #tpu.memory_space<vmem>>, vector<1x64x32xbf16>
    %25 = vector.shape_cast %24 : vector<1x64x32xbf16> to vector<64x32xbf16>
    %cst_17 = arith.constant dense<0.000000e+00> : vector<64x128xf32>
    %26 = tpu.matmul %25, %23, %cst_17 {dimension_numbers = #tpu.dot_dimension_numbers<[1], [0], [0], [1], [0, 0, 1, 1], [], []>} : vector<64x32xbf16>, vector<32x128xbf16>, vector<64x128xf32> -> vector<64x128xf32>
    %27 = arith.addf %22, %26 : vector<64x128xf32>
    %28 = vector.extract_strided_slice %1 {offsets = [0, 6], sizes = [32, 128], strides = [1, 1]} : vector<32x256xbf16> to vector<32x128xbf16>
    %c5 = arith.constant 5 : index
    %c0_18 = arith.constant 0 : index
    %c0_19 = arith.constant 0 : index
    %29 = vector.load %arg2[%c5, %c0_18, %c0_19] : memref<9x64x32xbf16, #tpu.memory_space<vmem>>, vector<1x64x32xbf16>
    %30 = vector.shape_cast %29 : vector<1x64x32xbf16> to vector<64x32xbf16>
    %cst_20 = arith.constant dense<0.000000e+00> : vector<64x128xf32>
    %31 = tpu.matmul %30, %28, %cst_20 {dimension_numbers = #tpu.dot_dimension_numbers<[1], [0], [0], [1], [0, 0, 1, 1], [], []>} : vector<64x32xbf16>, vector<32x128xbf16>, vector<64x128xf32> -> vector<64x128xf32>
    %32 = arith.addf %27, %31 : vector<64x128xf32>
    %33 = vector.extract_strided_slice %1 {offsets = [0, 8], sizes = [32, 128], strides = [1, 1]} : vector<32x256xbf16> to vector<32x128xbf16>
    %c6 = arith.constant 6 : index
    %c0_21 = arith.constant 0 : index
    %c0_22 = arith.constant 0 : index
    %34 = vector.load %arg2[%c6, %c0_21, %c0_22] : memref<9x64x32xbf16, #tpu.memory_space<vmem>>, vector<1x64x32xbf16>
    %35 = vector.shape_cast %34 : vector<1x64x32xbf16> to vector<64x32xbf16>
    %cst_23 = arith.constant dense<0.000000e+00> : vector<64x128xf32>
    %36 = tpu.matmul %35, %33, %cst_23 {dimension_numbers = #tpu.dot_dimension_numbers<[1], [0], [0], [1], [0, 0, 1, 1], [], []>} : vector<64x32xbf16>, vector<32x128xbf16>, vector<64x128xf32> -> vector<64x128xf32>
    %37 = arith.addf %32, %36 : vector<64x128xf32>
    %38 = vector.extract_strided_slice %1 {offsets = [0, 9], sizes = [32, 128], strides = [1, 1]} : vector<32x256xbf16> to vector<32x128xbf16>
    %c7 = arith.constant 7 : index
    %c0_24 = arith.constant 0 : index
    %c0_25 = arith.constant 0 : index
    %39 = vector.load %arg2[%c7, %c0_24, %c0_25] : memref<9x64x32xbf16, #tpu.memory_space<vmem>>, vector<1x64x32xbf16>
    %40 = vector.shape_cast %39 : vector<1x64x32xbf16> to vector<64x32xbf16>
    %cst_26 = arith.constant dense<0.000000e+00> : vector<64x128xf32>
    %41 = tpu.matmul %40, %38, %cst_26 {dimension_numbers = #tpu.dot_dimension_numbers<[1], [0], [0], [1], [0, 0, 1, 1], [], []>} : vector<64x32xbf16>, vector<32x128xbf16>, vector<64x128xf32> -> vector<64x128xf32>
    %42 = arith.addf %37, %41 : vector<64x128xf32>
    %43 = vector.extract_strided_slice %1 {offsets = [0, 10], sizes = [32, 128], strides = [1, 1]} : vector<32x256xbf16> to vector<32x128xbf16>
    %c8 = arith.constant 8 : index
    %c0_27 = arith.constant 0 : index
    %c0_28 = arith.constant 0 : index
    %44 = vector.load %arg2[%c8, %c0_27, %c0_28] : memref<9x64x32xbf16, #tpu.memory_space<vmem>>, vector<1x64x32xbf16>
    %45 = vector.shape_cast %44 : vector<1x64x32xbf16> to vector<64x32xbf16>
    %cst_29 = arith.constant dense<0.000000e+00> : vector<64x128xf32>
    %46 = tpu.matmul %45, %43, %cst_29 {dimension_numbers = #tpu.dot_dimension_numbers<[1], [0], [0], [1], [0, 0, 1, 1], [], []>} : vector<64x32xbf16>, vector<32x128xbf16>, vector<64x128xf32> -> vector<64x128xf32>
    %47 = arith.addf %42, %46 : vector<64x128xf32>
    %c0_30 = arith.constant 0 : index
    %c0_31 = arith.constant 0 : index
    %48 = vector.load %arg3[%c0_30, %c0_31] : memref<64x1xf32, #tpu.memory_space<vmem>>, vector<64x1xf32>
    %49 = vector.broadcast %48 : vector<64x1xf32> to vector<64x128xf32>
    %50 = arith.addf %47, %49 : vector<64x128xf32>
    %cst_32 = arith.constant 0.000000e+00 : f32
    %51 = vector.broadcast %cst_32 : f32 to vector<64x128xf32>
    %52 = arith.maximumf %50, %51 : vector<64x128xf32>
    %c0_33 = arith.constant 0 : index
    %c0_34 = arith.constant 0 : index
    %53 = vector.load %arg4[%c0_33, %c0_34] : memref<1x128xf32, #tpu.memory_space<vmem>>, vector<1x128xf32>
    %54 = vector.broadcast %53 : vector<1x128xf32> to vector<64x128xf32>
    %55 = arith.mulf %52, %54 : vector<64x128xf32>
    %c0_35 = arith.constant 0 : index
    %c0_36 = arith.constant 0 : index
    %c0_37 = arith.constant 0 : index
    %56 = vector.load %arg5[%c0_35, %c0_36, %c0_37] : memref<1x64x128xf32, #tpu.memory_space<vmem>>, vector<1x64x128xf32>
    %57 = vector.shape_cast %56 : vector<1x64x128xf32> to vector<64x128xf32>
    %58 = vector.shape_cast %55 : vector<64x128xf32> to vector<1x64x128xf32>
    tpu.vector_store %arg5[%c0_35, %c0_36, %c0_37], %58 {strides = array<i32>} : memref<1x64x128xf32, #tpu.memory_space<vmem>>, vector<1x64x128xf32>,
    %cst_38 = arith.constant dense<0.000000e+00> : vector<64xf32>
    %59 = vector.multi_reduction <add>, %55, %cst_38 [1] : vector<64x128xf32> to vector<64xf32>
    %60 = vector.shape_cast %59 : vector<64xf32> to vector<64x1xf32>
    %61 = arith.mulf %55, %55 : vector<64x128xf32>
    %cst_39 = arith.constant dense<0.000000e+00> : vector<64xf32>
    %62 = vector.multi_reduction <add>, %61, %cst_39 [1] : vector<64x128xf32> to vector<64xf32>
    %63 = vector.shape_cast %62 : vector<64xf32> to vector<64x1xf32>
    %cst_40 = arith.constant 2.500000e-01 : f32
    %64 = vector.broadcast %cst_40 : f32 to vector<64x1xf32>
    %65 = arith.mulf %60, %64 : vector<64x1xf32>
    %cst_41 = arith.constant 4.000000e+00 : f32
    %66 = vector.broadcast %cst_41 : f32 to vector<64x1xf32>
    %67 = arith.mulf %66, %65 : vector<64x1xf32>
    %68 = arith.mulf %67, %65 : vector<64x1xf32>
    %69 = arith.subf %63, %68 : vector<64x1xf32>
    %cst_42 = arith.constant 0.000000e+00 : f32
    %70 = vector.broadcast %cst_42 : f32 to vector<64x1xf32>
    %71 = arith.maximumf %69, %70 : vector<64x1xf32>
    %c0_43 = arith.constant 0 : index
    %c0_44 = arith.constant 0 : index
    %c0_45 = arith.constant 0 : index
    %72 = vector.load %arg6[%c0_43, %c0_44, %c0_45] : memref<1x64x1xf32, #tpu.memory_space<vmem>>, vector<1x64x1xf32>
    %73 = vector.shape_cast %72 : vector<1x64x1xf32> to vector<64x1xf32>
    %74 = vector.shape_cast %65 : vector<64x1xf32> to vector<1x64x1xf32>
    tpu.vector_store %arg6[%c0_43, %c0_44, %c0_45], %74 {strides = array<i32>} : memref<1x64x1xf32, #tpu.memory_space<vmem>>, vector<1x64x1xf32>,
    %cst_46 = arith.constant 0.333333343 : f32
    %75 = vector.broadcast %cst_46 : f32 to vector<64x1xf32>
    %76 = arith.mulf %71, %75 : vector<64x1xf32>
    %cst_47 = arith.constant 9.99999974E-6 : f32
    %77 = vector.broadcast %cst_47 : f32 to vector<64x1xf32>
    %78 = arith.addf %76, %77 : vector<64x1xf32>
    %79 = math.sqrt %78 : vector<64x1xf32>
    %c0_48 = arith.constant 0 : index
    %c0_49 = arith.constant 0 : index
    %c0_50 = arith.constant 0 : index
    %80 = vector.load %arg7[%c0_48, %c0_49, %c0_50] : memref<1x64x1xf32, #tpu.memory_space<vmem>>, vector<1x64x1xf32>
    %81 = vector.shape_cast %80 : vector<1x64x1xf32> to vector<64x1xf32>
    %82 = vector.shape_cast %79 : vector<64x1xf32> to vector<1x64x1xf32>
    tpu.vector_store %arg7[%c0_48, %c0_49, %c0_50], %82 {strides = array<i32>} : memref<1x64x1xf32, #tpu.memory_space<vmem>>, vector<1x64x1xf32>,
    return
  }
  func.func @transform_0(%arg0: i32) -> (i32, i32, i32) {
    %c0_i32 = arith.constant 0 : i32
    %c0_i32_0 = arith.constant 0 : i32
    %c0_i32_1 = arith.constant 0 : i32
    return %arg0, %c0_i32, %c0_i32_0 : i32, i32, i32
  }
  func.func @transform_1(%arg0: i32) -> (i32, i32, i32) {
    %c0_i32 = arith.constant 0 : i32
    %c0_i32_0 = arith.constant 0 : i32
    %c0_i32_1 = arith.constant 0 : i32
    %c0_i32_2 = arith.constant 0 : i32
    return %c0_i32, %c0_i32_0, %c0_i32_1 : i32, i32, i32
  }
  func.func @transform_2(%arg0: i32) -> (i32, i32) {
    %c0_i32 = arith.constant 0 : i32
    %c0_i32_0 = arith.constant 0 : i32
    %c0_i32_1 = arith.constant 0 : i32
    return %c0_i32, %c0_i32_0 : i32, i32
  }
  func.func @transform_3(%arg0: i32) -> (i32, i32) {
    %c0_i32 = arith.constant 0 : i32
    %c0_i32_0 = arith.constant 0 : i32
    %c0_i32_1 = arith.constant 0 : i32
    return %c0_i32, %c0_i32_0 : i32, i32
  }
  func.func @transform_4(%arg0: i32) -> (i32, i32, i32) {
    %c0_i32 = arith.constant 0 : i32
    %c0_i32_0 = arith.constant 0 : i32
    %c0_i32_1 = arith.constant 0 : i32
    return %arg0, %c0_i32, %c0_i32_0 : i32, i32, i32
  }
  func.func @transform_5(%arg0: i32) -> (i32, i32, i32) {
    %c0_i32 = arith.constant 0 : i32
    %c0_i32_0 = arith.constant 0 : i32
    %c0_i32_1 = arith.constant 0 : i32
    return %arg0, %c0_i32, %c0_i32_0 : i32, i32, i32
  }
  func.func @transform_6(%arg0: i32) -> (i32, i32, i32) {
    %c0_i32 = arith.constant 0 : i32
    %c0_i32_0 = arith.constant 0 : i32
    %c0_i32_1 = arith.constant 0 : i32
    return %arg0, %c0_i32, %c0_i32_0 : i32, i32, i32
  }
}

module attributes {stable_mosaic.version = 11 : i64} {
  func.func @_content_loss_kernel(%arg0: i32, %arg1: memref<1x64x128xf32, #tpu.memory_space<vmem>>, %arg2: memref<1x64x128xf32, #tpu.memory_space<vmem>>, %arg3: memref<1x1xf32, #tpu.memory_space<vmem>>, %arg4: memref<1x128xf32, #tpu.memory_space<vmem>>) attributes {dimension_semantics = [#tpu.dimension_semantics<arbitrary>], iteration_bounds = array<i64: 2>, scalar_prefetch = 0 : i64, scratch_operands = 1 : i64, tpu.core_type = #tpu.core_type<tc>, window_params = [{transform_indices = @transform_0, window_bounds = array<i64: 1, 64, 128>}, {transform_indices = @transform_1, window_bounds = array<i64: 1, 64, 128>}, {pipeline_mode = #tpu.pipeline_mode<synchronous>, transform_indices = @transform_2, window_bounds = array<i64: 1, 1>}]} {
    %c0_i32 = arith.constant 0 : i32
    %0 = arith.cmpi eq, %arg0, %c0_i32 : i32
    %1 = arith.extui %0 : i1 to i32
    %c0_i32_0 = arith.constant 0 : i32
    %2 = arith.cmpi ne, %1, %c0_i32_0 : i32
    scf.if %2 {
      %cst_11 = arith.constant 0.000000e+00 : f32
      %17 = vector.broadcast %cst_11 : f32 to vector<1x128xf32>
      %c0_12 = arith.constant 0 : index
      %c0_13 = arith.constant 0 : index
      %18 = vector.load %arg4[%c0_12, %c0_13] : memref<1x128xf32, #tpu.memory_space<vmem>>, vector<1x128xf32>
      tpu.vector_store %arg4[%c0_12, %c0_13], %17 {strides = array<i32>} : memref<1x128xf32, #tpu.memory_space<vmem>>, vector<1x128xf32>,
    } else {
    }
    %c0 = arith.constant 0 : index
    %c0_1 = arith.constant 0 : index
    %c0_2 = arith.constant 0 : index
    %3 = vector.load %arg1[%c0, %c0_1, %c0_2] : memref<1x64x128xf32, #tpu.memory_space<vmem>>, vector<1x64x128xf32>
    %4 = vector.shape_cast %3 : vector<1x64x128xf32> to vector<64x128xf32>
    %c0_3 = arith.constant 0 : index
    %c0_4 = arith.constant 0 : index
    %c0_5 = arith.constant 0 : index
    %5 = vector.load %arg2[%c0_3, %c0_4, %c0_5] : memref<1x64x128xf32, #tpu.memory_space<vmem>>, vector<1x64x128xf32>
    %6 = vector.shape_cast %5 : vector<1x64x128xf32> to vector<64x128xf32>
    %7 = arith.subf %4, %6 : vector<64x128xf32>
    %c0_6 = arith.constant 0 : index
    %c0_7 = arith.constant 0 : index
    %8 = vector.load %arg4[%c0_6, %c0_7] : memref<1x128xf32, #tpu.memory_space<vmem>>, vector<1x128xf32>
    %9 = arith.mulf %7, %7 : vector<64x128xf32>
    %cst = arith.constant dense<0.000000e+00> : vector<128xf32>
    %10 = vector.multi_reduction <add>, %9, %cst [0] : vector<64x128xf32> to vector<128xf32>
    %11 = vector.shape_cast %10 : vector<128xf32> to vector<1x128xf32>
    %12 = arith.addf %8, %11 : vector<1x128xf32>
    %c0_8 = arith.constant 0 : index
    %c0_9 = arith.constant 0 : index
    %13 = vector.load %arg4[%c0_8, %c0_9] : memref<1x128xf32, #tpu.memory_space<vmem>>, vector<1x128xf32>
    tpu.vector_store %arg4[%c0_8, %c0_9], %12 {strides = array<i32>} : memref<1x128xf32, #tpu.memory_space<vmem>>, vector<1x128xf32>,
    %c1_i32 = arith.constant 1 : i32
    %14 = arith.cmpi eq, %arg0, %c1_i32 : i32
    %15 = arith.extui %14 : i1 to i32
    %c0_i32_10 = arith.constant 0 : i32
    %16 = arith.cmpi ne, %15, %c0_i32_10 : i32
    scf.if %16 {
      %c0_11 = arith.constant 0 : index
      %c0_12 = arith.constant 0 : index
      %17 = vector.load %arg4[%c0_11, %c0_12] : memref<1x128xf32, #tpu.memory_space<vmem>>, vector<1x128xf32>
      %cst_13 = arith.constant dense<0.000000e+00> : vector<1xf32>
      %18 = vector.multi_reduction <add>, %17, %cst_13 [1] : vector<1x128xf32> to vector<1xf32>
      %19 = vector.shape_cast %18 : vector<1xf32> to vector<1x1xf32>
      %cst_14 = arith.constant 0.001953125 : f32
      %20 = vector.broadcast %cst_14 : f32 to vector<1x1xf32>
      %21 = arith.mulf %19, %20 : vector<1x1xf32>
      %c0_15 = arith.constant 0 : index
      %c0_16 = arith.constant 0 : index
      %22 = vector.load %arg3[%c0_15, %c0_16] : memref<1x1xf32, #tpu.memory_space<vmem>>, vector<1x1xf32>
      tpu.vector_store %arg3[%c0_15, %c0_16], %21 {strides = array<i32>} : memref<1x1xf32, #tpu.memory_space<vmem>>, vector<1x1xf32>,
    } else {
    }
    return
  }
  func.func @transform_0(%arg0: i32) -> (i32, i32, i32) {
    %c0_i32 = arith.constant 0 : i32
    %c0_i32_0 = arith.constant 0 : i32
    %c0_i32_1 = arith.constant 0 : i32
    return %arg0, %c0_i32, %c0_i32_0 : i32, i32, i32
  }
  func.func @transform_1(%arg0: i32) -> (i32, i32, i32) {
    %c4_i32 = arith.constant 4 : i32
    %0 = arith.addi %arg0, %c4_i32 : i32
    %c0_i32 = arith.constant 0 : i32
    %c0_i32_0 = arith.constant 0 : i32
    %c0_i32_1 = arith.constant 0 : i32
    return %0, %c0_i32, %c0_i32_0 : i32, i32, i32
  }
  func.func @transform_2(%arg0: i32) -> (i32, i32) {
    %c0_i32 = arith.constant 0 : i32
    %c0_i32_0 = arith.constant 0 : i32
    %c0_i32_1 = arith.constant 0 : i32
    return %c0_i32, %c0_i32_0 : i32, i32
  }
}

</mosaic_0001>

<bundles_post_ra>
// kernel: style_content_loss.5
= control target key start
LH: loop header
LB: loop body
LE: loop exit
PB: predicated region body
PF: predicated region fallthrough
CT: control target
= control target key end

     0   :  { %s1642_s21 = smov 0   ;;  %s1857_s0 = inlined_call_operand.vmem [shape: bf16[6,3,512], index: 0, kind: input, shape index: {}]   ;;  %s1858_s1 = inlined_call_operand.vmem [shape: bf16[9,8,3], index: 1, kind: input, shape index: {}]   ;;  %s1859_s2 = inlined_call_operand.vmem [shape: f32[8,1], index: 2, kind: input, shape index: {}]   ;;  %s1860_s3 = inlined_call_operand.vmem [shape: f32[1,384], index: 3, kind: input, shape index: {}]   ;;  %s1861_s4 = inlined_call_operand.vmem [shape: f32[6,8,384], index: 4, kind: output, shape index: {0}]   ;;  %s1862_s5 = inlined_call_operand.vmem [shape: f32[6,8,1], index: 5, kind: output, shape index: {1}]   ;;  %s1863_s6 = inlined_call_operand.vmem [shape: f32[6,8,1], index: 6, kind: output, shape index: {2}]  }
   0x1 LB: > { %s1449_s22 = sadd.s32 4294967295, %s1592_s21   ;;  %p1453_p0 = scmp.ge.s32.totalorder %s1592_s21, 1  ;;  %s1592_s21 = sphi %s1642_s21, %s17_s21  }
   0x2   : > { %p217_p1 = scmp.lt.s32.totalorder %s1592_s21, 7 }
   0x4   : > { %p218_p2 = pnand %p1453_p0, %p217_p1 }
   0x5   : > { %p255_p3 = scmp.lt.s32.totalorder (!%p218_p2), %s1449_s22, 5  ;;  %v283_v0 = vlaneseq (!%p218_p2)  ;;  %v1594_v1 = vmov (!%p218_p2), 1983009808   ;;  %v1595_v5 = vmov (!%p218_p2), 0.0   ;;  %vm1596_vm0 = vmmov (!%p218_p2), 0   ;;  %s1598_s27 = smov (!%p218_p2), 127  }
   0x6   : > { %221 = sbr.rel (%p218_p2) target bundleno = 608 (0x260), region = 36  ;;  %v281_v2 = vunpack.c.l.s4 (!%p218_p2), %v1594_v1  ;;  %1506 = vmatprep.subr.bf16.mxu1 (!%p218_p2), %v1595_v5  ;;  %1508 = vmatprep.mubr.msk.bf16.mxu1 (!%p218_p2), %vm1596_vm0, %v1595_v5  ;;  %v1597_v10 = vmov (!%p218_p2), 0   ;;  %s1599_s28 = smov (!%p218_p2), 126   ;;  %v1269_v14 = vld [vmem:[%s1859_s2] sm:$0xff] (!%p218_p2)  ;;  %vm312_vm1 = vcmask (!%p218_p2), 1040384   ;;  %vm304_vm2 = vcmask (!%p218_p2), 1039360  }
   0x7   : > { %v1652_v3 = vshrl.u32 (!%p218_p2), %v283_v0, 7  ;;  %357 = vmatprep.mubr.bf16.mxu0 (!%p218_p2), %v1597_v10  ;;  %1582 = vset.pattern.permute.xlu0 (!%p218_p2), %v1597_v10  ;;  %s1600_s29 = smov (!%p218_p2), 110   ;;  %s1601_s30 = smov (!%p218_p2), 109   ;;  %vm313_vm3 = vcmask (!%p218_p2), 1041408   ;;  %v1606_v17 = vmov (!%p218_p2), 65535   ;;  %vm509_vm4 = vcmask (!%p218_p2), 1031168  }
   0x8   : > { %v282_v4 = vunpack.c.0.s8 (!%p218_p2), %v281_v2  ;;  %s1602_s7 = smov (!%p218_p2), 108   ;;  %s1603_s8 = smov (!%p218_p2), 92   ;;  %v314_v18 = vsel (!%p218_p2), %vm312_vm1, 4294967295, %v1606_v17  ;;  %v1459_v31 = vld [vmem:[%s1858_s1 + $0x4] sm:$0xf] (!%p218_p2)  ;;  %vm308_vm5 = vcmask (!%p218_p2), 23552  }
   0x9   : > { %s1604_s9 = smov (!%p218_p2), 91   ;;  %s1605_s10 = smov (!%p218_p2), 90   ;;  %v1704_v22 = vsel (!%p218_p2), %vm313_vm3, %v314_v18, 0  ;;  %vm619_vm6 = vcmask (!%p218_p2), 900096   ;;  %v275_v43 = vld [vmem:[%s1858_s1] sm:$0xf] (!%p218_p2) }
   0xa   : > { %v285_v6 = vsub.s32 (!%p218_p2), %v282_v4, %v1652_v3  ;;  %vm729_vm7 = vcmask (!%p218_p2), 891904   ;;  %v1464_v54 = vld [vmem:[%s1858_s1 + $0x8] sm:$0xf] (!%p218_p2)  ;;  %vm839_vm8 = vcmask (!%p218_p2), 883712   ;;  %v1467_v1 = vld [vmem:[%s1858_s1 + $0xc] sm:$0xf] (!%p218_p2) }
   0xb   : > { %vm949_vm9 = vcmask (!%p218_p2), 752640   ;;  %vm1059_vm10 = vcmask (!%p218_p2), 744448   ;;  %vm1169_vm11 = vcmask (!%p218_p2), 736256   ;;  %vm1320_vm12 = vcmask (!%p218_p2), 7168  }
   0xd   : > { %s1865_s22 = smov (!%p255_p3, %s1449_s22), 5 }
   0xe   : > { %s1656_s23 = sshll.u32 %s1865_s22, 3  ;;  %s1560_s12 = smul.u32 24, %s1865_s22 }
   0xf   : > { %s259_s26 = scalar_lea.vmem %s1857_s0, %s1656_s23  ;;  %s268_s17 = scalar_lea.vmem %s1862_s5, %s1656_s23 }
  0x10   : > { %v274_v7 = vld [vmem:[%s259_s26] sm:$0xff]  ;;  %s264_s15 = scalar_lea.vmem %s1861_s4, %s1560_s12  ;;  %s272_s20 = scalar_lea.vmem %s1863_s6, %s1656_s23 }
  0x11   : > { %v1663_v8 = vrot.slane %v274_v7, %v285_v6  ;;  %v279_v9 = vcombine.high %v274_v7, %v274_v7 }
  0x13   : > { %296 = vrot.lane.b32.xlu1 %v1663_v8, %s1598_s27  ;;  %v1672_v11 = vcombine.high %v1663_v8, %v1663_v8  ;;  %v1674_v12 = vrot.slane %v279_v9, %v285_v6  ;;  %v410_v34 = vand.u32 %v1704_v22, %v1663_v8 }
  0x15   : > { %298 = vrot.lane.b32.xlu0 %v1672_v11, %s1598_s27  ;;  %v295_v13 = vcombine.high %v1674_v12, %v1674_v12  ;;  %v413_v27 = vand.u32 %v1704_v22, %v1672_v11  ;;  %v416_v32 = vand.u32 %v1704_v22, %v1674_v12 }
  0x17   : > { %302 = vrot.lane.b32.xlu1 %v295_v13, %s1598_s27 }
  0x19   : > { %300 = vrot.lane.b32.xlu0 %v1674_v12, %s1598_s27 }
  0x1b   : > { %505 = vrot.lane.b32.xlu1 %v1674_v12, %s1599_s28 }
  0x1d   : > { %503 = vrot.lane.b32.xlu0 %v1672_v11, %s1599_s28 }
  0x1f   : > { %507 = vrot.lane.b32.xlu1 %v295_v13, %s1599_s28 }
  0x21   : > { %501 = vrot.lane.b32.xlu0 %v1663_v8, %s1599_s28 }
  0x23   : > { %615 = vrot.lane.b32.xlu1 %v1674_v12, %s1600_s29 }
  0x25   : > { %613 = vrot.lane.b32.xlu0 %v1672_v11, %s1600_s29 }
  0x27   : > { %617 = vrot.lane.b32.xlu1 %v295_v13, %s1600_s29 }
  0x29   : > { %611 = vrot.lane.b32.xlu0 %v1663_v8, %s1600_s29 }
  0x2b   : > { %725 = vrot.lane.b32.xlu1 %v1674_v12, %s1601_s30 }
  0x2d   : > { %723 = vrot.lane.b32.xlu0 %v1672_v11, %s1601_s30 }
  0x2f   : > { %727 = vrot.lane.b32.xlu1 %v295_v13, %s1601_s30 }
  0x31   : > { %721 = vrot.lane.b32.xlu0 %v1663_v8, %s1601_s30 }
  0x33   : > { %835 = vrot.lane.b32.xlu1 %v1674_v12, %s1602_s7 }
  0x35   : > { %833 = vrot.lane.b32.xlu0 %v1672_v11, %s1602_s7 }
  0x37   : > { %837 = vrot.lane.b32.xlu1 %v295_v13, %s1602_s7 }
  0x39   : > { %831 = vrot.lane.b32.xlu0 %v1663_v8, %s1602_s7 }
  0x3b   : > { %945 = vrot.lane.b32.xlu1 %v1674_v12, %s1603_s8 }
  0x3d   : > { %943 = vrot.lane.b32.xlu0 %v1672_v11, %s1603_s8 }
  0x3f   : > { %947 = vrot.lane.b32.xlu1 %v295_v13, %s1603_s8 }
  0x41   : > { %941 = vrot.lane.b32.xlu0 %v1663_v8, %s1603_s8 }
  0x43   : > { %1055 = vrot.lane.b32.xlu1 %v1674_v12, %s1604_s9 }
  0x45   : > { %1053 = vrot.lane.b32.xlu0 %v1672_v11, %s1604_s9 }
  0x47   : > { %1057 = vrot.lane.b32.xlu1 %v295_v13, %s1604_s9 }
  0x49   : > { %1051 = vrot.lane.b32.xlu0 %v1663_v8, %s1604_s9 }
  0x4b   : > { %1165 = vrot.lane.b32.xlu1 %v1674_v12, %s1605_s10 }
  0x4d   : > { %1163 = vrot.lane.b32.xlu0 %v1672_v11, %s1605_s10 }
  0x4f   : > { %1167 = vrot.lane.b32.xlu1 %v295_v13, %s1605_s10 }
  0x51   : > { %1161 = vrot.lane.b32.xlu0 %v1663_v8, %s1605_s10 }
  0x55   : > { %1272 = vperm.xlu0 %1582, %v1269_v14  }
  0x85   : > { %v297_v15 = vpop.permute.xlu1 %296 }
  0x87   : > { %v299_v16 = vpop.permute.xlu0 %298 }
  0x88   : > { %v305_v20 = vsel %vm304_vm2, %v297_v15, %v299_v16  ;;  %v1470_v15 = vld [vmem:[%s1858_s1 + $0x10] sm:$0xf] }
  0x89   : > { %v303_v19 = vpop.permute.xlu1 %302  ;;  %v317_v29 = vand.u32 %v1704_v22, %v305_v20 }
  0x8b   : > { %v301_v21 = vpop.permute.xlu0 %300 }
  0x8c   : > { %v307_v23 = vsel %vm304_vm2, %v301_v21, %v303_v19  ;;  %v306_v24 = vsel %vm304_vm2, %v299_v16, %v301_v21 }
  0x8d   : > { %v320_v25 = vand.u32 %v1704_v22, %v306_v24  ;;  %v323_v26 = vand.u32 %v1704_v22, %v307_v23  ;;  %v506_v28 = vpop.permute.xlu1 %505 }
  0x8f   : > { %325 = vmatprep.subr.bf16.mxu0 %v320_v25  ;;  %1507 = vmatpush3.bf16.msra.mxu1 %v323_v26  ;;  %v504_v30 = vpop.permute.xlu0 %503 }
  0x90   : > { %326 = vmatpush1.bf16.msra.mxu0 %v317_v29  ;;  %v511_v33 = vsel %vm509_vm4, %v504_v30, %v506_v28  ;;  %1512 = vmatprep.subr.bf16.mxu1 %v1595_v5 }
  0x91   : > { %418 = vmatprep.subr.bf16.mxu0 %v413_v27  ;;  %v520_v35 = vand.u32 %v511_v33, %v1704_v22  ;;  %v508_v36 = vpop.permute.xlu1 %507  ;;  %v1473_v27 = vld [vmem:[%s1858_s1 + $0x14] sm:$0xf] }
  0x92   : > { %1509 = vmatmul.mubr.msk.bf16.vlgmr.msra.gmra.mrb[0].mxu1 %vm308_vm5, %v1459_v31  ;;  %v512_v38 = vsel %vm509_vm4, %v506_v28, %v508_v36 }
  0x93   : > { %1460 = vmatmul.mubr.msk.bf16.vlgmr.msra.gmra.mrb[0].mxu0 %vm308_vm5, %v1459_v31  ;;  %v502_v37 = vpop.permute.xlu0 %501  ;;  %1513 = vmatpush3.bf16.msra.mxu1 %v416_v32  ;;  %v523_v41 = vand.u32 %v512_v38, %v1704_v22  ;;  %v1476_v38 = vld [vmem:[%s1858_s1 + $0x18] sm:$0xf] }
  0x94   : > { %419 = vmatpush1.bf16.msra.mxu0 %v410_v34  ;;  %1514 = vmatprep.mubr.msk.bf16.mxu1 %vm1596_vm0, %v1595_v5  ;;  %v510_v39 = vsel %vm509_vm4, %v502_v37, %v504_v30 }
  0x95   : > { %525 = vmatprep.subr.bf16.mxu0 %v520_v35  ;;  %450 = vmatprep.mubr.bf16.mxu0 %v1597_v10  ;;  %v616_v40 = vpop.permute.xlu1 %615  ;;  %v517_v44 = vand.u32 %v510_v39, %v1704_v22 }
  0x96   : > { %1518 = vmatprep.subr.bf16.mxu1 %v1595_v5 }
  0x97   : > { %v614_v42 = vpop.permute.xlu0 %613 }
  0x98   : > { %v621_v45 = vsel %vm619_vm6, %v614_v42, %v616_v40 }
  0x99   : > { %v630_v46 = vand.u32 %v621_v45, %v1704_v22  ;;  %v618_v47 = vpop.permute.xlu1 %617 }
  0x9a   : > { %1515 = vmatmul.mubr.msk.bf16.vlgmr.msra.gmra.mrb[4].mxu1 %vm308_vm5, %v275_v43  ;;  %v622_v49 = vsel %vm619_vm6, %v616_v40, %v618_v47  ;;  %v1479_v47 = vld [vmem:[%s1858_s1 + $0x1c] sm:$0xf] }
  0x9b   : > { %1462 = vmatmul.mubr.msk.bf16.vlgmr.msra.gmra.mrb[4].mxu0 %vm308_vm5, %v275_v43  ;;  %1519 = vmatpush3.bf16.msra.mxu1 %v523_v41  ;;  %v612_v48 = vpop.permute.xlu0 %611  ;;  %v633_v52 = vand.u32 %v622_v49, %v1704_v22  ;;  %v1482_v49 = vld [vmem:[%s1858_s1 + $0x20] sm:$0xf] }
  0x9c   : > { %526 = vmatpush1.bf16.msra.mxu0 %v517_v44  ;;  %1520 = vmatprep.mubr.msk.bf16.mxu1 %vm1596_vm0, %v1595_v5  ;;  %v620_v50 = vsel %vm619_vm6, %v612_v48, %v614_v42 }
  0x9d   : > { %635 = vmatprep.subr.bf16.mxu0 %v630_v46  ;;  %557 = vmatprep.mubr.bf16.mxu0 %v1597_v10  ;;  %v726_v51 = vpop.permute.xlu1 %725  ;;  %v627_v55 = vand.u32 %v620_v50, %v1704_v22 }
  0x9e   : > { %1524 = vmatprep.subr.bf16.mxu1 %v1595_v5 }
  0x9f   : > { %v724_v53 = vpop.permute.xlu0 %723 }
  0xa0   : > { %v731_v56 = vsel %vm729_vm7, %v724_v53, %v726_v51 }
  0xa1   : > { %v740_v57 = vand.u32 %v731_v56, %v1704_v22  ;;  %v728_v58 = vpop.permute.xlu1 %727 }
  0xa2   : > { %1521 = vmatmul.mubr.msk.bf16.vlgmr.msra.gmra.mrb[8].mxu1 %vm308_vm5, %v1464_v54  ;;  %v732_v60 = vsel %vm729_vm7, %v726_v51, %v728_v58 }
  0xa3   : > { %1465 = vmatmul.mubr.msk.bf16.vlgmr.msra.gmra.mrb[8].mxu0 %vm308_vm5, %v1464_v54  ;;  %1525 = vmatpush3.bf16.msra.mxu1 %v633_v52  ;;  %v722_v59 = vpop.permute.xlu0 %721  ;;  %v743_v63 = vand.u32 %v732_v60, %v1704_v22 }
  0xa4   : > { %636 = vmatpush1.bf16.msra.mxu0 %v627_v55  ;;  %1526 = vmatprep.mubr.msk.bf16.mxu1 %vm1596_vm0, %v1595_v5  ;;  %v730_v61 = vsel %vm729_vm7, %v722_v59, %v724_v53 }
  0xa5   : > { %745 = vmatprep.subr.bf16.mxu0 %v740_v57  ;;  %667 = vmatprep.mubr.bf16.mxu0 %v1597_v10  ;;  %v836_v62 = vpop.permute.xlu1 %835  ;;  %v737_v2 = vand.u32 %v730_v61, %v1704_v22 }
  0xa6   : > { %1530 = vmatprep.subr.bf16.mxu1 %v1595_v5 }
  0xa7   : > { %v834_v0 = vpop.permute.xlu0 %833 }
  0xa8   : > { %v841_v4 = vsel %vm839_vm8, %v834_v0, %v836_v62 }
  0xa9   : > { %v850_v6 = vand.u32 %v841_v4, %v1704_v22  ;;  %v838_v7 = vpop.permute.xlu1 %837 }
  0xaa   : > { %1527 = vmatmul.mubr.msk.bf16.vlgmr.msra.gmra.mrb[12].mxu1 %vm308_vm5, %v1467_v1  ;;  %v842_v9 = vsel %vm839_vm8, %v836_v62, %v838_v7 }
  0xab   : > { %1468 = vmatmul.mubr.msk.bf16.vlgmr.msra.gmra.mrb[12].mxu0 %vm308_vm5, %v1467_v1  ;;  %1531 = vmatpush3.bf16.msra.mxu1 %v743_v63  ;;  %v832_v8 = vpop.permute.xlu0 %831  ;;  %v853_v13 = vand.u32 %v842_v9, %v1704_v22 }
  0xac   : > { %746 = vmatpush1.bf16.msra.mxu0 %v737_v2  ;;  %1532 = vmatprep.mubr.msk.bf16.mxu1 %vm1596_vm0, %v1595_v5  ;;  %v840_v11 = vsel %vm839_vm8, %v832_v8, %v834_v0 }
  0xad   : > { %855 = vmatprep.subr.bf16.mxu0 %v850_v6  ;;  %777 = vmatprep.mubr.bf16.mxu0 %v1597_v10  ;;  %v946_v12 = vpop.permute.xlu1 %945  ;;  %v847_v16 = vand.u32 %v840_v11, %v1704_v22 }
  0xae   : > { %1536 = vmatprep.subr.bf16.mxu1 %v1595_v5 }
  0xaf   : > { %v944_v14 = vpop.permute.xlu0 %943 }
  0xb0   : > { %v951_v17 = vsel %vm949_vm9, %v944_v14, %v946_v12 }
  0xb1   : > { %v960_v18 = vand.u32 %v951_v17, %v1704_v22  ;;  %v948_v19 = vpop.permute.xlu1 %947 }
  0xb2   : > { %1533 = vmatmul.mubr.msk.bf16.vlgmr.msra.gmra.mrb[16].mxu1 %vm308_vm5, %v1470_v15  ;;  %v952_v21 = vsel %vm949_vm9, %v946_v12, %v948_v19 }
  0xb3   : > { %1471 = vmatmul.mubr.msk.bf16.vlgmr.msra.gmra.mrb[16].mxu0 %vm308_vm5, %v1470_v15  ;;  %1537 = vmatpush3.bf16.msra.mxu1 %v853_v13  ;;  %v942_v20 = vpop.permute.xlu0 %941  ;;  %v963_v25 = vand.u32 %v952_v21, %v1704_v22 }
  0xb4   : > { %856 = vmatpush1.bf16.msra.mxu0 %v847_v16  ;;  %1538 = vmatprep.mubr.msk.bf16.mxu1 %vm1596_vm0, %v1595_v5  ;;  %v950_v23 = vsel %vm949_vm9, %v942_v20, %v944_v14 }
  0xb5   : > { %965 = vmatprep.subr.bf16.mxu0 %v960_v18  ;;  %887 = vmatprep.mubr.bf16.mxu0 %v1597_v10  ;;  %v1056_v24 = vpop.permute.xlu1 %1055  ;;  %v957_v28 = vand.u32 %v950_v23, %v1704_v22 }
  0xb6   : > { %1542 = vmatprep.subr.bf16.mxu1 %v1595_v5 }
  0xb7   : > { %v1054_v26 = vpop.permute.xlu0 %1053 }
  0xb8   : > { %v1061_v29 = vsel %vm1059_vm10, %v1054_v26, %v1056_v24 }
  0xb9   : > { %v1070_v30 = vand.u32 %v1061_v29, %v1704_v22  ;;  %v1058_v31 = vpop.permute.xlu1 %1057 }
  0xba   : > { %1539 = vmatmul.mubr.msk.bf16.vlgmr.msra.gmra.mrb[20].mxu1 %vm308_vm5, %v1473_v27  ;;  %v1062_v33 = vsel %vm1059_vm10, %v1056_v24, %v1058_v31 }
  0xbb   : > { %1474 = vmatmul.mubr.msk.bf16.vlgmr.msra.gmra.mrb[20].mxu0 %vm308_vm5, %v1473_v27  ;;  %1543 = vmatpush3.bf16.msra.mxu1 %v963_v25  ;;  %v1052_v32 = vpop.permute.xlu0 %1051  ;;  %v1073_v36 = vand.u32 %v1062_v33, %v1704_v22 }
  0xbc   : > { %966 = vmatpush1.bf16.msra.mxu0 %v957_v28  ;;  %1544 = vmatprep.mubr.msk.bf16.mxu1 %vm1596_vm0, %v1595_v5  ;;  %v1060_v34 = vsel %vm1059_vm10, %v1052_v32, %v1054_v26 }
  0xbd   : > { %1075 = vmatprep.subr.bf16.mxu0 %v1070_v30  ;;  %997 = vmatprep.mubr.bf16.mxu0 %v1597_v10  ;;  %v1166_v35 = vpop.permute.xlu1 %1165  ;;  %v1067_v39 = vand.u32 %v1060_v34, %v1704_v22 }
  0xbe   : > { %1548 = vmatprep.subr.bf16.mxu1 %v1595_v5 }
  0xbf   : > { %v1164_v37 = vpop.permute.xlu0 %1163 }
  0xc0   : > { %v1171_v40 = vsel %vm1169_vm11, %v1164_v37, %v1166_v35 }
  0xc1   : > { %v1180_v41 = vand.u32 %v1171_v40, %v1704_v22  ;;  %v1168_v42 = vpop.permute.xlu1 %1167 }
  0xc2   : > { %1545 = vmatmul.mubr.msk.bf16.vlgmr.msra.gmra.mrb[24].mxu1 %vm308_vm5, %v1476_v38  ;;  %v1172_v44 = vsel %vm1169_vm11, %v1166_v35, %v1168_v42 }
  0xc3   : > { %1477 = vmatmul.mubr.msk.bf16.vlgmr.msra.gmra.mrb[24].mxu0 %vm308_vm5, %v1476_v38  ;;  %1549 = vmatpush3.bf16.msra.mxu1 %v1073_v36  ;;  %v1162_v43 = vpop.permute.xlu0 %1161  ;;  %v1183_v46 = vand.u32 %v1172_v44, %v1704_v22 }
  0xc4   : > { %1076 = vmatpush1.bf16.msra.mxu0 %v1067_v39  ;;  %1550 = vmatprep.mubr.msk.bf16.mxu1 %vm1596_vm0, %v1595_v5  ;;  %v1170_v45 = vsel %vm1169_vm11, %v1162_v43, %v1164_v37 }
  0xc5   : > { %1185 = vmatprep.subr.bf16.mxu0 %v1180_v41  ;;  %1107 = vmatprep.mubr.bf16.mxu0 %v1597_v10  ;;  %v1177_v48 = vand.u32 %v1170_v45, %v1704_v22 }
  0xc6   : > { %1554 = vmatprep.subr.bf16.mxu1 %v1595_v5 }
  0xca   : > { %1551 = vmatmul.mubr.msk.bf16.vlgmr.msra.gmra.mrb[28].mxu1 %vm308_vm5, %v1479_v47 }
  0xcb   : > { %1480 = vmatmul.mubr.msk.bf16.vlgmr.msra.gmra.mrb[28].mxu0 %vm308_vm5, %v1479_v47  ;;  %1555 = vmatpush3.bf16.msra.mxu1 %v1183_v46 }
  0xcc   : > { %1186 = vmatpush1.bf16.msra.mxu0 %v1177_v48  ;;  %1556 = vmatprep.mubr.msk.bf16.mxu1 %vm1596_vm0, %v1595_v5 }
  0xcd   : > { %1217 = vmatprep.mubr.bf16.mxu0 %v1597_v10 }
  0xd2   : > { %1557 = vmatmul.mubr.msk.bf16.vlgmr.msra.gmra.mrb[32].mxu1 %vm308_vm5, %v1482_v49 }
  0xd3   : > { %1483 = vmatmul.mubr.msk.bf16.vlgmr.msra.gmra.mrb[32].mxu0 %vm308_vm5, %v1482_v49 }
 0x165   : > { %v400_v22 = vpop.f32.mrb[0].mxu1 }
 0x166   : > { %v359_v50 = vpop.f32.mrb[0].mxu0  ;;  %v1510_v51 = vpop.f32.mrb[1].mxu1 }
 0x167   : > { %v361_v52 = vpop.f32.mrb[1].mxu0  ;;  %v403_v53 = vpop.f32.mrb[2].mxu1 }
 0x168   : > { %v363_v54 = vpop.f32.mrb[2].mxu0  ;;  %v1511_v55 = vpop.f32.mrb[3].mxu1 }
 0x169   : > { %v364_v56 = vpop.f32.mrb[3].mxu0 }
 0x16d   : > { %v493_v57 = vpop.f32.mrb[4].mxu1 }
 0x16e   : > { %v494_v5 = vadd.f32 %v493_v57, %v400_v22  ;;  %v452_v58 = vpop.f32.mrb[4].mxu0  ;;  %v1516_v10 = vpop.f32.mrb[5].mxu1 }
 0x16f   : > { %v453_v59 = vadd.f32 %v452_v58, %v359_v50  ;;  %v454_v60 = vpop.f32.mrb[5].mxu0  ;;  %v496_v61 = vpop.f32.mrb[6].mxu1 }
 0x170   : > { %v455_v62 = vadd.f32 %v454_v60, %v361_v52  ;;  %v456_v63 = vpop.f32.mrb[6].mxu0  ;;  %v1517_v0 = vpop.f32.mrb[7].mxu1 }
 0x171   : > { %v457_v1 = vpop.f32.mrb[7].mxu0 }
 0x175   : > { %v600_v2 = vpop.f32.mrb[8].mxu1 }
 0x176   : > { %v608_v4 = vadd.f32 %v600_v2, %v494_v5  ;;  %v559_v6 = vpop.f32.mrb[8].mxu0  ;;  %v1522_v7 = vpop.f32.mrb[9].mxu1 }
 0x177   : > { %v606_v8 = vadd.f32 %v559_v6, %v453_v59  ;;  %v561_v9 = vpop.f32.mrb[9].mxu0  ;;  %v603_v11 = vpop.f32.mrb[10].mxu1  ;;  %v1293_v7 = vsub.s32 2, %v1652_v3 }
 0x178   : > { %v607_v12 = vadd.f32 %v561_v9, %v455_v62  ;;  %v563_v13 = vpop.f32.mrb[10].mxu0  ;;  %v1523_v14 = vpop.f32.mrb[11].mxu1  ;;  %v1281_v9 = vld [vmem:[%s1860_s3] sm:$0x7]  ;;  %v1285_v11 = vsub.s32 0, %v1652_v3 }
 0x179   : > { %v564_v15 = vpop.f32.mrb[11].mxu0 }
 0x17a   : > { %v1289_v15 = vsub.s32 1, %v1652_v3 }
 0x17d   : > { %v710_v16 = vpop.f32.mrb[12].mxu1 }
 0x17e   : > { %v718_v17 = vadd.f32 %v710_v16, %v608_v4  ;;  %v669_v18 = vpop.f32.mrb[12].mxu0  ;;  %v1528_v19 = vpop.f32.mrb[13].mxu1 }
 0x17f   : > { %v716_v20 = vadd.f32 %v669_v18, %v606_v8  ;;  %v671_v21 = vpop.f32.mrb[13].mxu0  ;;  %v713_v23 = vpop.f32.mrb[14].mxu1 }
 0x180   : > { %v717_v24 = vadd.f32 %v671_v21, %v607_v12  ;;  %v673_v25 = vpop.f32.mrb[14].mxu0  ;;  %v1529_v26 = vpop.f32.mrb[15].mxu1 }
 0x181   : > { %v674_v27 = vpop.f32.mrb[15].mxu0  ;;  %v1273_v12 = vpop.permute.xlu0 %1272  ;;  %v1294_v25 = vrot.slane %v1281_v9, %v1293_v7  ;;  %v1286_v26 = vrot.slane %v1281_v9, %v1285_v11 }
 0x185   : > { %v820_v28 = vpop.f32.mrb[16].mxu1 }
 0x186   : > { %v828_v29 = vadd.f32 %v820_v28, %v718_v17  ;;  %v779_v30 = vpop.f32.mrb[16].mxu0  ;;  %v1534_v31 = vpop.f32.mrb[17].mxu1 }
 0x187   : > { %v826_v32 = vadd.f32 %v779_v30, %v716_v20  ;;  %v781_v33 = vpop.f32.mrb[17].mxu0  ;;  %v823_v34 = vpop.f32.mrb[18].mxu1  ;;  %v1290_v31 = vrot.slane %v1281_v9, %v1289_v15 }
 0x188   : > { %v827_v35 = vadd.f32 %v781_v33, %v717_v24  ;;  %v783_v36 = vpop.f32.mrb[18].mxu0  ;;  %v1535_v37 = vpop.f32.mrb[19].mxu1 }
 0x189   : > { %v784_v38 = vpop.f32.mrb[19].mxu0 }
 0x18d   : > { %v930_v39 = vpop.f32.mrb[20].mxu1 }
 0x18e   : > { %v938_v40 = vadd.f32 %v930_v39, %v828_v29  ;;  %v889_v41 = vpop.f32.mrb[20].mxu0  ;;  %v1540_v42 = vpop.f32.mrb[21].mxu1 }
 0x18f   : > { %v936_v43 = vadd.f32 %v889_v41, %v826_v32  ;;  %v891_v44 = vpop.f32.mrb[21].mxu0  ;;  %v933_v45 = vpop.f32.mrb[22].mxu1 }
 0x190   : > { %v937_v46 = vadd.f32 %v891_v44, %v827_v35  ;;  %v893_v47 = vpop.f32.mrb[22].mxu0  ;;  %v1541_v48 = vpop.f32.mrb[23].mxu1 }
 0x191   : > { %v894_v49 = vpop.f32.mrb[23].mxu0 }
 0x195   : > { %v1040_v22 = vpop.f32.mrb[24].mxu1 }
 0x196   : > { %v1048_v50 = vadd.f32 %v1040_v22, %v938_v40  ;;  %v999_v51 = vpop.f32.mrb[24].mxu0  ;;  %v1546_v52 = vpop.f32.mrb[25].mxu1 }
 0x197   : > { %v1046_v53 = vadd.f32 %v999_v51, %v936_v43  ;;  %v1001_v54 = vpop.f32.mrb[25].mxu0  ;;  %v1043_v55 = vpop.f32.mrb[26].mxu1 }
 0x198   : > { %v1047_v56 = vadd.f32 %v1001_v54, %v937_v46  ;;  %v1003_v57 = vpop.f32.mrb[26].mxu0  ;;  %v1547_v5 = vpop.f32.mrb[27].mxu1 }
 0x199   : > { %v1004_v58 = vpop.f32.mrb[27].mxu0 }
 0x19d   : > { %v1150_v10 = vpop.f32.mrb[28].mxu1 }
 0x19e   : > { %v1158_v59 = vadd.f32 %v1150_v10, %v1048_v50  ;;  %v1109_v60 = vpop.f32.mrb[28].mxu0  ;;  %v1552_v61 = vpop.f32.mrb[29].mxu1 }
 0x19f   : > { %v1156_v62 = vadd.f32 %v1109_v60, %v1046_v53  ;;  %v1111_v63 = vpop.f32.mrb[29].mxu0  ;;  %v1153_v0 = vpop.f32.mrb[30].mxu1 }
 0x1a0   : > { %v1157_v1 = vadd.f32 %v1111_v63, %v1047_v56  ;;  %v1113_v2 = vpop.f32.mrb[30].mxu0  ;;  %v1553_v4 = vpop.f32.mrb[31].mxu1 }
 0x1a1   : > { %v1114_v6 = vpop.f32.mrb[31].mxu0 }
 0x1a5   : > { %v1260_v8 = vpop.f32.mrb[32].mxu1 }
 0x1a6   : > { %v1268_v13 = vadd.f32 %v1260_v8, %v1158_v59  ;;  %v1219_v14 = vpop.f32.mrb[32].mxu0  ;;  %v1558_v16 = vpop.f32.mrb[33].mxu1 }
 0x1a7   : > { %v1266_v17 = vadd.f32 %v1219_v14, %v1156_v62  ;;  %v1221_v18 = vpop.f32.mrb[33].mxu0  ;;  %v1263_v19 = vpop.f32.mrb[34].mxu1 }
 0x1a8   : > { %v1277_v20 = vadd.f32 %v1273_v12, %v1268_v13  ;;  %v1267_v21 = vadd.f32 %v1221_v18, %v1157_v1  ;;  %v1223_v23 = vpop.f32.mrb[34].mxu0  ;;  %v1559_v24 = vpop.f32.mrb[35].mxu1 }
 0x1a9   : > { %v1275_v27 = vadd.f32 %v1273_v12, %v1266_v17  ;;  %v1224_v28 = vpop.f32.mrb[35].mxu0 }
 0x1aa   : > { %v1280_v29 = vmax.f32 %v1277_v20, 0.0  ;;  %v1276_v30 = vadd.f32 %v1273_v12, %v1267_v21 }
 0x1ab   : > { %v1278_v3 = vmax.f32 %v1275_v27, 0.0 }
 0x1ac   : > { %v1279_v32 = vmax.f32 %v1276_v30, 0.0  ;;  %v1300_v33 = vmul.f32 %v1294_v25, %v1280_v29 }
 0x1ad   : > { %v1298_v34 = vmul.f32 %v1286_v26, %v1278_v3 }
 0x1ae   : > { %v1299_v35 = vmul.f32 %v1290_v31, %v1279_v32  ;;  %1303 = vst [vmem:[%s264_s15 + $0x10] sm:$0xff] %v1300_v33  ;;  %v1310_v40 = vmul.f32 %v1300_v33, %v1300_v33 }
 0x1af   : > { %1301 = vst [vmem:[%s264_s15] sm:$0xff] %v1298_v34  ;;  %v1308_v36 = vmul.f32 %v1298_v34, %v1298_v34 }
 0x1b0   : > { %1302 = vst [vmem:[%s264_s15 + $0x8] sm:$0xff] %v1299_v35  ;;  %v1304_v37 = vadd.f32 %v1299_v35, %v1298_v34  ;;  %v1309_v38 = vmul.f32 %v1299_v35, %v1299_v35 }
 0x1b2   : > { %v1305_v39 = vadd.f32 %v1304_v37, %v1300_v33  ;;  %v1311_v41 = vadd.f32 %v1309_v38, %v1308_v36 }
 0x1b4   : > { %1306 = vadd.xlane.f32.xlu1 %v1305_v39  ;;  %v1312_v42 = vadd.f32 %v1311_v41, %v1310_v40 }
 0x1b6   : > { %1313 = vadd.xlane.f32.xlu0 %v1312_v42 }
 0x241   : > { %v1307_v43 = vpop.xlane.xlu1 %1306 }
 0x242   : > { %v1315_v44 = vmul.f32 0.00390625, %v1307_v43 }
 0x243   : > { %v1314_v47 = vpop.xlane.xlu0 %1313 }
 0x244   : > { %v1316_v45 = vmul.f32 256.0, %v1315_v44  ;;  %1321 = vst.msk [vmem:[%s268_s17] sm:$0xff] %vm1320_vm12, %v1315_v44 }
 0x246   : > { %v1317_v46 = vmul.f32 %v1316_v45, %v1315_v44 }
 0x248   : > { %v1318_v48 = vsub.f32 %v1314_v47, %v1317_v46 }
 0x24a   : > { %v1319_v49 = vmax.f32 %v1318_v48, 0.0 }
 0x24c   : > { %v1322_v22 = vmul.f32 0.003921569, %v1319_v49 }
 0x24e   : > { %v1323_v50 = vadd.f32 1e-05, %v1322_v22 }
 0x250   : > { %1584 = vrsqrt.f32 %v1323_v50  ;;  %vm1326_vm13 = vcmp.eq.f32.partialorder %v1323_v50, inf  ;;  %v1329_v53 = vand.u32 2147483648, %v1323_v50  ;;  %vm1328_vm14 = vcmp.eq.f32.partialorder %v1323_v50, 0.0 }
 0x25a   : > { %v1585_v51 = vpop.eup %1584 }
 0x25b   : > { %v1325_v52 = vmul.f32 %v1585_v51, %v1323_v50 }
 0x25d   : > { %v1327_v54 = vsel %vm1326_vm13, %v1323_v50, %v1325_v52 }
 0x25e   : > { %v1330_v55 = vsel %vm1328_vm14, %v1329_v53, %v1327_v54 }
 0x25f   : > { %1331 = vst.msk [vmem:[%s272_s20] sm:$0xff] %vm1320_vm12, %v1330_v55 }
 0x260 PF: > { %s17_s21 = sadd.s32 1, %s1592_s21  }
 0x261   : > { %p14_p4 = scmp.ge.s32.totalorder %s17_s21, 8  }
 0x263   :  { %16 = sbr.rel (!%p14_p4) target bundleno = 1 (0x1), region = 98 }

// kernel: style_content_loss.6
= control target key start
LH: loop header
LB: loop body
LE: loop exit
PB: predicated region body
PF: predicated region fallthrough
CT: control target
= control target key end

     0   :  { %s1251_s21 = smov 0   ;;  %s1368_s0 = inlined_call_operand.vmem [shape: bf16[6,8,256], index: 0, kind: input, shape index: {}]   ;;  %s1369_s1 = inlined_call_operand.vmem [shape: bf16[9,16,8], index: 1, kind: input, shape index: {}]   ;;  %s1370_s2 = inlined_call_operand.vmem [shape: f32[16,1], index: 2, kind: input, shape index: {}]   ;;  %s1371_s3 = inlined_call_operand.vmem [shape: f32[1,128], index: 3, kind: input, shape index: {}]   ;;  %s1372_s4 = inlined_call_operand.vmem [shape: f32[6,16,128], index: 4, kind: output, shape index: {0}]   ;;  %s1373_s5 = inlined_call_operand.vmem [shape: f32[6,16,1], index: 5, kind: output, shape index: {1}]   ;;  %s1374_s6 = inlined_call_operand.vmem [shape: f32[6,16,1], index: 6, kind: output, shape index: {2}]  }
   0x1 LB: > { %s1033_s22 = sadd.s32 4294967295, %s1203_s21   ;;  %p1037_p0 = scmp.ge.s32.totalorder %s1203_s21, 1  ;;  %s1203_s21 = sphi %s1251_s21, %s17_s21  }
   0x2   : > { %p217_p1 = scmp.lt.s32.totalorder %s1203_s21, 7 }
   0x4   : > { %p218_p2 = pnand %p1037_p0, %p217_p1 }
   0x5   : > { %p257_p3 = scmp.lt.s32.totalorder (!%p218_p2), %s1033_s22, 5  ;;  %v1205_v0 = vmov (!%p218_p2), 0.0   ;;  %vm1206_vm0 = vmmov (!%p218_p2), 0   ;;  %vm304_vm1 = vcmask (!%p218_p2), 1043456   ;;  %vm300_vm2 = vcmask (!%p218_p2), 64512   ;;  %v1185_v4 = vld [vmem:[%s1369_s1] sm:$0xff] (!%p218_p2)  }
   0x6   : > { %221 = sbr.rel (%p218_p2) target bundleno = 569 (0x239), region = 36  ;;  %1107 = vmatprep.subr.bf16.mxu0 (!%p218_p2), %v1205_v0  ;;  %1113 = vmatprep.subr.bf16.mxu1 (!%p218_p2), %v1205_v0  ;;  %s1207_s29 = smov (!%p218_p2), 126   ;;  %v1215_v6 = vmov (!%p218_p2), 0   ;;  %v842_v7 = vld [vmem:[%s1370_s2] sm:$0xff] (!%p218_p2)  ;;  %v843_v8 = vld [vmem:[%s1370_s2 + $0x8] sm:$0xff] (!%p218_p2)  ;;  %vm413_vm3 = vcmask (!%p218_p2), 1031168  }
   0x7   : > { %1109 = vmatprep.mubr.msk.bf16.mxu0 (!%p218_p2), %vm1206_vm0, %v1205_v0  ;;  %1115 = vmatprep.mubr.msk.bf16.mxu1 (!%p218_p2), %vm1206_vm0, %v1205_v0  ;;  %s1208_s30 = smov (!%p218_p2), 127   ;;  %s1209_s7 = smov (!%p218_p2), 118   ;;  %vm298_vm4 = vcmask (!%p218_p2), 1039360   ;;  %v1184_v16 = vld [vmem:[%s1369_s1 + $0x8] sm:$0xff] (!%p218_p2)   ;;  %vm476_vm5 = vcmask (!%p218_p2), 965632   ;;  %vm539_vm6 = vcmask (!%p218_p2), 957440  }
   0x8   : > { %s1210_s8 = smov (!%p218_p2), 117   ;;  %s1211_s9 = smov (!%p218_p2), 116   ;;  %1180 = vset.pattern.permute.xlu0 (!%p218_p2), %v1215_v6  ;;  %1181 = vset.pattern.permute.xlu1 (!%p218_p2), %v1215_v6  ;;  %v1187_v22 = vld [vmem:[%s1369_s1 + $0x18] sm:$0xff] (!%p218_p2)   ;;  %v1186_v26 = vld [vmem:[%s1369_s1 + $0x10] sm:$0xff] (!%p218_p2)   ;;  %vm602_vm7 = vcmask (!%p218_p2), 949248   ;;  %vm665_vm8 = vcmask (!%p218_p2), 883712  }
   0x9   : > { %s1212_s10 = smov (!%p218_p2), 108   ;;  %s1213_s11 = smov (!%p218_p2), 107   ;;  %v1189_v32 = vld [vmem:[%s1369_s1 + $0x28] sm:$0xff] (!%p218_p2)   ;;  %v1188_v36 = vld [vmem:[%s1369_s1 + $0x20] sm:$0xff] (!%p218_p2)   ;;  %vm728_vm9 = vcmask (!%p218_p2), 875520   ;;  %vm791_vm10 = vcmask (!%p218_p2), 867328  }
   0xa   : > { %s1214_s12 = smov (!%p218_p2), 106   ;;  %v1191_v42 = vld [vmem:[%s1369_s1 + $0x38] sm:$0xff] (!%p218_p2)   ;;  %v1190_v46 = vld [vmem:[%s1369_s1 + $0x30] sm:$0xff] (!%p218_p2)   ;;  %v1192_v48 = vld [vmem:[%s1369_s1 + $0x40] sm:$0xff] (!%p218_p2)   ;;  %vm889_vm11 = vcmask (!%p218_p2), 7168  }
   0xd   : > { %s1376_s22 = smov (!%p257_p3, %s1033_s22), 5 }
   0xe   : > { %s1085_s23 = sshll.u32 %s1376_s22, 3 }
   0xf   : > { %s261_s26 = scalar_lea.vmem %s1368_s0, %s1085_s23 }
  0x10   : > { %v278_v1 = vld [vmem:[%s261_s26] sm:$0xff] }
  0x11   : > { %v1049_v2 = vcombine.low %v278_v1, %v278_v1  ;;  %v358_v3 = vsel %vm304_vm1, %v278_v1, 0  ;;  %v1050_v5 = vcombine.high %v278_v1, %v278_v1 }
  0x12   : > { %1114 = vmatpush3.bf16.msra.mxu1 %v358_v3 }
  0x13   : > { %409 = vrot.lane.b32.xlu1 %v1049_v2, %s1207_s29  ;;  %294 = vrot.lane.b32.xlu0 %v1049_v2, %s1208_s30 }
  0x14   : > { %1125 = vmatprep.subr.bf16.mxu1 %v1205_v0 }
  0x15   : > { %1116 = vmatmul.mubr.msk.bf16.vlgmr.msra.gmra.mrb[0].mxu1 %vm300_vm2, %v1185_v4 }
  0x16   : > { %1127 = vmatprep.mubr.msk.bf16.mxu1 %vm1206_vm0, %v1205_v0 }
  0x17   : > { %411 = vrot.lane.b32.xlu1 %v1050_v5, %s1207_s29  ;;  %296 = vrot.lane.b32.xlu0 %v1050_v5, %s1208_s30 }
  0x1b   : > { %474 = vrot.lane.b32.xlu1 %v1050_v5, %s1209_s7  ;;  %472 = vrot.lane.b32.xlu0 %v1049_v2, %s1209_s7 }
  0x1f   : > { %537 = vrot.lane.b32.xlu1 %v1050_v5, %s1210_s8  ;;  %535 = vrot.lane.b32.xlu0 %v1049_v2, %s1210_s8 }
  0x23   : > { %600 = vrot.lane.b32.xlu1 %v1050_v5, %s1211_s9  ;;  %598 = vrot.lane.b32.xlu0 %v1049_v2, %s1211_s9 }
  0x27   : > { %663 = vrot.lane.b32.xlu1 %v1050_v5, %s1212_s10  ;;  %661 = vrot.lane.b32.xlu0 %v1049_v2, %s1212_s10 }
  0x2b   : > { %726 = vrot.lane.b32.xlu1 %v1050_v5, %s1213_s11  ;;  %724 = vrot.lane.b32.xlu0 %v1049_v2, %s1213_s11  ;;  %s1344_s11 = sshll.u32 %s1376_s22, 4 }
  0x2c   : > { %s266_s16 = scalar_lea.vmem %s1372_s4, %s1344_s11  ;;  %s271_s18 = scalar_lea.vmem %s1373_s5, %s1344_s11 }
  0x2d   : > { %s276_s23 = scalar_lea.vmem %s1374_s6, %s1344_s11 }
  0x2f   : > { %789 = vrot.lane.b32.xlu1 %v1050_v5, %s1214_s12  ;;  %787 = vrot.lane.b32.xlu0 %v1049_v2, %s1214_s12 }
  0x33   : > { %846 = vperm.xlu0 %1180, %v842_v7   ;;  %851 = vperm.xlu1 %1181, %v843_v8  }
  0x85   : > { %v410_v9 = vpop.permute.xlu1 %409  ;;  %v295_v10 = vpop.permute.xlu0 %294 }
  0x89   : > { %v412_v11 = vpop.permute.xlu1 %411  ;;  %v297_v12 = vpop.permute.xlu0 %296 }
  0x8a   : > { %v414_v13 = vsel %vm413_vm3, %v410_v9, %v412_v11  ;;  %v299_v14 = vsel %vm298_vm4, %v295_v10, %v297_v12 }
  0x8b   : > { %v306_v15 = vsel %vm304_vm1, %v299_v14, 0  ;;  %v419_v17 = vsel %vm304_vm1, %v414_v13, 0 }
  0x8c   : > { %1108 = vmatpush3.bf16.msra.mxu0 %v306_v15 }
  0x8d   : > { %1119 = vmatprep.subr.bf16.mxu0 %v1205_v0  ;;  %v475_v18 = vpop.permute.xlu1 %474  ;;  %v473_v19 = vpop.permute.xlu0 %472 }
  0x8e   : > { %v477_v20 = vsel %vm476_vm5, %v473_v19, %v475_v18 }
  0x8f   : > { %1110 = vmatmul.mubr.msk.bf16.vlgmr.msra.gmra.mrb[0].mxu0 %vm300_vm2, %v1184_v16  ;;  %v482_v21 = vsel %vm304_vm1, %v477_v20, 0 }
  0x90   : > { %1120 = vmatpush3.bf16.msra.mxu0 %v419_v17  ;;  %1126 = vmatpush3.bf16.msra.mxu1 %v482_v21 }
  0x91   : > { %v538_v23 = vpop.permute.xlu1 %537  ;;  %v536_v24 = vpop.permute.xlu0 %535  ;;  %1121 = vmatprep.mubr.msk.bf16.mxu0 %vm1206_vm0, %v1205_v0  ;;  %1131 = vmatprep.subr.bf16.mxu0 %v1205_v0 }
  0x92   : > { %v540_v25 = vsel %vm539_vm6, %v536_v24, %v538_v23  ;;  %1137 = vmatprep.subr.bf16.mxu1 %v1205_v0 }
  0x93   : > { %1128 = vmatmul.mubr.msk.bf16.vlgmr.msra.gmra.mrb[4].mxu1 %vm300_vm2, %v1187_v22  ;;  %v545_v27 = vsel %vm304_vm1, %v540_v25, 0 }
  0x94   : > { %1139 = vmatprep.mubr.msk.bf16.mxu1 %vm1206_vm0, %v1205_v0 }
  0x95   : > { %v601_v28 = vpop.permute.xlu1 %600  ;;  %v599_v29 = vpop.permute.xlu0 %598 }
  0x96   : > { %v603_v30 = vsel %vm602_vm7, %v599_v29, %v601_v28 }
  0x97   : > { %1122 = vmatmul.mubr.msk.bf16.vlgmr.msra.gmra.mrb[4].mxu0 %vm300_vm2, %v1186_v26  ;;  %v608_v31 = vsel %vm304_vm1, %v603_v30, 0 }
  0x98   : > { %1132 = vmatpush3.bf16.msra.mxu0 %v545_v27  ;;  %1138 = vmatpush3.bf16.msra.mxu1 %v608_v31 }
  0x99   : > { %v664_v33 = vpop.permute.xlu1 %663  ;;  %v662_v34 = vpop.permute.xlu0 %661  ;;  %1133 = vmatprep.mubr.msk.bf16.mxu0 %vm1206_vm0, %v1205_v0  ;;  %1143 = vmatprep.subr.bf16.mxu0 %v1205_v0 }
  0x9a   : > { %v666_v35 = vsel %vm665_vm8, %v662_v34, %v664_v33  ;;  %1149 = vmatprep.subr.bf16.mxu1 %v1205_v0 }
  0x9b   : > { %1140 = vmatmul.mubr.msk.bf16.vlgmr.msra.gmra.mrb[8].mxu1 %vm300_vm2, %v1189_v32  ;;  %v671_v37 = vsel %vm304_vm1, %v666_v35, 0 }
  0x9c   : > { %1151 = vmatprep.mubr.msk.bf16.mxu1 %vm1206_vm0, %v1205_v0 }
  0x9d   : > { %v727_v38 = vpop.permute.xlu1 %726  ;;  %v725_v39 = vpop.permute.xlu0 %724 }
  0x9e   : > { %v729_v40 = vsel %vm728_vm9, %v725_v39, %v727_v38 }
  0x9f   : > { %1134 = vmatmul.mubr.msk.bf16.vlgmr.msra.gmra.mrb[8].mxu0 %vm300_vm2, %v1188_v36  ;;  %v734_v41 = vsel %vm304_vm1, %v729_v40, 0  ;;  %v1082_v40 = vld [vmem:[%s1371_s3] ss:$0 sm:$0xff] }
  0xa0   : > { %1144 = vmatpush3.bf16.msra.mxu0 %v671_v37  ;;  %1150 = vmatpush3.bf16.msra.mxu1 %v734_v41 }
  0xa1   : > { %v790_v43 = vpop.permute.xlu1 %789  ;;  %v788_v44 = vpop.permute.xlu0 %787  ;;  %1145 = vmatprep.mubr.msk.bf16.mxu0 %vm1206_vm0, %v1205_v0  ;;  %1155 = vmatprep.subr.bf16.mxu0 %v1205_v0 }
  0xa2   : > { %v792_v45 = vsel %vm791_vm10, %v788_v44, %v790_v43 }
  0xa3   : > { %1152 = vmatmul.mubr.msk.bf16.vlgmr.msra.gmra.mrb[12].mxu1 %vm300_vm2, %v1191_v42  ;;  %v797_v47 = vsel %vm304_vm1, %v792_v45, 0 }
  0xa7   : > { %1146 = vmatmul.mubr.msk.bf16.vlgmr.msra.gmra.mrb[12].mxu0 %vm300_vm2, %v1190_v46 }
  0xa8   : > { %1156 = vmatpush3.bf16.msra.mxu0 %v797_v47  ;;  %1157 = vmatprep.mubr.msk.bf16.mxu0 %vm1206_vm0, %v1205_v0 }
  0xaf   : > { %1158 = vmatmul.mubr.msk.bf16.vlgmr.msra.gmra.mrb[16].mxu0 %vm300_vm2, %v1192_v48 }
  0xb2   : > { %v847_v32 = vpop.permute.xlu0 %846  ;;  %v852_v36 = vpop.permute.xlu1 %851 }
  0xe8   : > { %v394_v49 = vpop.f32.mrb[0].mxu1 }
  0xe9   : > { %v1117_v50 = vpop.f32.mrb[1].mxu1 }
  0xea   : > { %v397_v51 = vpop.f32.mrb[2].mxu1 }
  0xeb   : > { %v1118_v52 = vpop.f32.mrb[3].mxu1 }
 0x162   : > { %v342_v53 = vpop.f32.mrb[0].mxu0 }
 0x163   : > { %v395_v54 = vadd.f32 %v394_v49, %v342_v53  ;;  %v1111_v55 = vpop.f32.mrb[1].mxu0 }
 0x164   : > { %v345_v56 = vpop.f32.mrb[2].mxu0 }
 0x165   : > { %v398_v57 = vadd.f32 %v397_v51, %v345_v56  ;;  %v1112_v58 = vpop.f32.mrb[3].mxu0 }
 0x166   : > { %v518_v59 = vpop.f32.mrb[4].mxu1 }
 0x167   : > { %v1129_v60 = vpop.f32.mrb[5].mxu1 }
 0x168   : > { %v521_v61 = vpop.f32.mrb[6].mxu1 }
 0x169   : > { %v1130_v62 = vpop.f32.mrb[7].mxu1 }
 0x16a   : > { %v455_v63 = vpop.f32.mrb[4].mxu0 }
 0x16b   : > { %v462_v0 = vadd.f32 %v455_v63, %v395_v54  ;;  %v1123_v1 = vpop.f32.mrb[5].mxu0 }
 0x16c   : > { %v458_v2 = vpop.f32.mrb[6].mxu0 }
 0x16d   : > { %v463_v3 = vadd.f32 %v458_v2, %v398_v57  ;;  %v525_v4 = vadd.f32 %v518_v59, %v462_v0  ;;  %v1124_v5 = vpop.f32.mrb[7].mxu0 }
 0x16e   : > { %v644_v6 = vpop.f32.mrb[8].mxu1 }
 0x16f   : > { %v526_v7 = vadd.f32 %v521_v61, %v463_v3  ;;  %v1141_v8 = vpop.f32.mrb[9].mxu1 }
 0x170   : > { %v647_v9 = vpop.f32.mrb[10].mxu1 }
 0x171   : > { %v1142_v10 = vpop.f32.mrb[11].mxu1 }
 0x172   : > { %v581_v11 = vpop.f32.mrb[8].mxu0 }
 0x173   : > { %v588_v12 = vadd.f32 %v581_v11, %v525_v4  ;;  %v1135_v13 = vpop.f32.mrb[9].mxu0 }
 0x174   : > { %v584_v14 = vpop.f32.mrb[10].mxu0 }
 0x175   : > { %v589_v15 = vadd.f32 %v584_v14, %v526_v7  ;;  %v651_v16 = vadd.f32 %v644_v6, %v588_v12  ;;  %v1136_v17 = vpop.f32.mrb[11].mxu0 }
 0x176   : > { %v770_v18 = vpop.f32.mrb[12].mxu1 }
 0x177   : > { %v652_v19 = vadd.f32 %v647_v9, %v589_v15  ;;  %v1153_v20 = vpop.f32.mrb[13].mxu1 }
 0x178   : > { %v773_v21 = vpop.f32.mrb[14].mxu1 }
 0x179   : > { %v1154_v22 = vpop.f32.mrb[15].mxu1 }
 0x17a   : > { %v707_v23 = vpop.f32.mrb[12].mxu0 }
 0x17b   : > { %v714_v24 = vadd.f32 %v707_v23, %v651_v16  ;;  %v1147_v25 = vpop.f32.mrb[13].mxu0 }
 0x17c   : > { %v710_v26 = vpop.f32.mrb[14].mxu0 }
 0x17d   : > { %v715_v27 = vadd.f32 %v710_v26, %v652_v19  ;;  %v777_v28 = vadd.f32 %v770_v18, %v714_v24  ;;  %v1148_v29 = vpop.f32.mrb[15].mxu0 }
 0x17f   : > { %v778_v30 = vadd.f32 %v773_v21, %v715_v27 }
 0x182   : > { %v833_v31 = vpop.f32.mrb[16].mxu0 }
 0x183   : > { %v840_v33 = vadd.f32 %v833_v31, %v777_v28  ;;  %v1159_v34 = vpop.f32.mrb[17].mxu0 }
 0x184   : > { %v836_v35 = vpop.f32.mrb[18].mxu0 }
 0x185   : > { %v841_v37 = vadd.f32 %v836_v35, %v778_v30  ;;  %v854_v38 = vadd.f32 %v847_v32, %v840_v33  ;;  %v1160_v39 = vpop.f32.mrb[19].mxu0 }
 0x187   : > { %v856_v41 = vmax.f32 %v854_v38, 0.0  ;;  %v855_v42 = vadd.f32 %v852_v36, %v841_v37 }
 0x189   : > { %v865_v43 = vmul.f32 %v1082_v40, %v856_v41  ;;  %v857_v44 = vmax.f32 %v855_v42, 0.0 }
 0x18b   : > { %867 = vst [vmem:[%s266_s16] sm:$0xff] %v865_v43  ;;  %v866_v45 = vmul.f32 %v1082_v40, %v857_v44  ;;  %869 = vadd.xlane.f32.xlu1 %v865_v43  ;;  %v873_v47 = vmul.f32 %v865_v43, %v865_v43 }
 0x18d   : > { %868 = vst [vmem:[%s266_s16 + $0x8] sm:$0xff] %v866_v45  ;;  %871 = vadd.xlane.f32.xlu0 %v866_v45  ;;  %v874_v46 = vmul.f32 %v866_v45, %v866_v45 }
 0x18f   : > { %877 = vadd.xlane.f32.xlu1 %v874_v46 }
 0x191   : > { %875 = vadd.xlane.f32.xlu0 %v873_v47 }
 0x218   : > { %v870_v48 = vpop.xlane.xlu1 %869 }
 0x219   : > { %v879_v49 = vmul.f32 0.015625, %v870_v48 }
 0x21a   : > { %v872_v50 = vpop.xlane.xlu0 %871 }
 0x21b   : > { %890 = vst.msk [vmem:[%s271_s18] sm:$0xff] %vm889_vm11, %v879_v49  ;;  %v880_v51 = vmul.f32 0.015625, %v872_v50  ;;  %v881_v52 = vmul.f32 64.0, %v879_v49 }
 0x21c   : > { %v878_v58 = vpop.xlane.xlu1 %877 }
 0x21d   : > { %891 = vst.msk [vmem:[%s271_s18 + $0x8] sm:$0xff] %vm889_vm11, %v880_v51  ;;  %v882_v53 = vmul.f32 64.0, %v880_v51  ;;  %v883_v54 = vmul.f32 %v881_v52, %v879_v49 }
 0x21e   : > { %v876_v55 = vpop.xlane.xlu0 %875 }
 0x21f   : > { %v884_v56 = vmul.f32 %v882_v53, %v880_v51  ;;  %v885_v57 = vsub.f32 %v876_v55, %v883_v54 }
 0x221   : > { %v886_v59 = vsub.f32 %v878_v58, %v884_v56  ;;  %v887_v60 = vmax.f32 %v885_v57, 0.0 }
 0x223   : > { %v888_v61 = vmax.f32 %v886_v59, 0.0  ;;  %v892_v62 = vmul.f32 0.015873017, %v887_v60 }
 0x225   : > { %v893_v63 = vmul.f32 0.015873017, %v888_v61  ;;  %v894_v0 = vadd.f32 1e-05, %v892_v62 }
 0x227   : > { %v895_v1 = vadd.f32 1e-05, %v893_v63  ;;  %1193 = vrsqrt.f32 %v894_v0  ;;  %vm898_vm12 = vcmp.eq.f32.partialorder %v894_v0, inf  ;;  %v901_v5 = vand.u32 2147483648, %v894_v0 }
 0x228   : > { %vm900_vm13 = vcmp.eq.f32.partialorder %v894_v0, 0.0 }
 0x229   : > { %1195 = vrsqrt.f32 %v895_v1  ;;  %vm905_vm14 = vcmp.eq.f32.partialorder %v895_v1, inf  ;;  %v908_v8 = vand.u32 2147483648, %v895_v1  ;;  %vm907_vm15 = vcmp.eq.f32.partialorder %v895_v1, 0.0 }
 0x231   : > { %v1194_v2 = vpop.eup %1193 }
 0x232   : > { %v897_v3 = vmul.f32 %v1194_v2, %v894_v0 }
 0x233   : > { %v1196_v4 = vpop.eup %1195 }
 0x234   : > { %v904_v6 = vmul.f32 %v1196_v4, %v895_v1  ;;  %v899_v7 = vsel %vm898_vm12, %v894_v0, %v897_v3 }
 0x235   : > { %v902_v9 = vsel %vm900_vm13, %v901_v5, %v899_v7 }
 0x236   : > { %v906_v10 = vsel %vm905_vm14, %v895_v1, %v904_v6  ;;  %910 = vst.msk [vmem:[%s276_s23] sm:$0xff] %vm889_vm11, %v902_v9 }
 0x237   : > { %v909_v11 = vsel %vm907_vm15, %v908_v8, %v906_v10 }
 0x238   : > { %911 = vst.msk [vmem:[%s276_s23 + $0x8] sm:$0xff] %vm889_vm11, %v909_v11 }
 0x239 PF: > { %s17_s21 = sadd.s32 1, %s1203_s21  }
 0x23a   : > { %p14_p4 = scmp.ge.s32.totalorder %s17_s21, 8  }
 0x23c   :  { %16 = sbr.rel (!%p14_p4) target bundleno = 1 (0x1), region = 98 }

// kernel: style_content_loss.7
= control target key start
LH: loop header
LB: loop body
LE: loop exit
PB: predicated region body
PF: predicated region fallthrough
CT: control target
= control target key end

     0   :  { %s1559_s21 = smov 0   ;;  %s1686_s0 = inlined_call_operand.vmem [shape: bf16[6,16,256], index: 0, kind: input, shape index: {}]   ;;  %s1687_s1 = inlined_call_operand.vmem [shape: bf16[9,32,16], index: 1, kind: input, shape index: {}]   ;;  %s1688_s2 = inlined_call_operand.vmem [shape: f32[32,1], index: 2, kind: input, shape index: {}]   ;;  %s1689_s3 = inlined_call_operand.vmem [shape: f32[1,128], index: 3, kind: input, shape index: {}]   ;;  %s1690_s4 = inlined_call_operand.vmem [shape: f32[6,32,128], index: 4, kind: output, shape index: {0}]   ;;  %s1691_s5 = inlined_call_operand.vmem [shape: f32[6,32,1], index: 5, kind: output, shape index: {1}]   ;;  %s1692_s6 = inlined_call_operand.vmem [shape: f32[6,32,1], index: 6, kind: output, shape index: {2}]  }
   0x1 LB: > { %s1256_s22 = sadd.s32 4294967295, %s1513_s21   ;;  %p1260_p0 = scmp.ge.s32.totalorder %s1513_s21, 1  ;;  %s1513_s21 = sphi %s1559_s21, %s17_s21  }
   0x2   : > { %p217_p1 = scmp.lt.s32.totalorder %s1513_s21, 7 }
   0x4   : > { %p218_p2 = pnand %p1260_p0, %p217_p1 }
   0x5   : > { %p257_p3 = scmp.lt.s32.totalorder (!%p218_p2), %s1256_s22, 5  ;;  %v1481_v0 = vld [vmem:[%s1687_s1 + $0x10] sm:$0xff] (!%p218_p2)   ;;  %v1482_v1 = vld [vmem:[%s1687_s1 + $0x40] sm:$0xff] (!%p218_p2)   ;;  %vm314_vm0 = vcmask (!%p218_p2), 130048   ;;  %s1515_s7 = smov (!%p218_p2), 127   ;;  %v1004_v4 = vld [vmem:[%s1688_s2 + $0x8] sm:$0xff] (!%p218_p2) }
   0x6   : > { %221 = sbr.rel (%p218_p2) target bundleno = 588 (0x24c), region = 36  ;;  %1375 = vmatprep.mubr.msk.bf16.mxu1 (!%p218_p2), %vm314_vm0, %v1481_v0  ;;  %1399 = vmatprep.mubr.msk.bf16.mxu0 (!%p218_p2), %vm314_vm0, %v1482_v1  ;;  %s1516_s8 = smov (!%p218_p2), 121   ;;  %v1003_v5 = vld [vmem:[%s1688_s2] sm:$0xff] (!%p218_p2)  ;;  %v1523_v6 = vmov (!%p218_p2), 0   ;;  %v1005_v7 = vld [vmem:[%s1688_s2 + $0x10] sm:$0xff] (!%p218_p2)  ;;  %v1006_v8 = vld [vmem:[%s1688_s2 + $0x18] sm:$0xff] (!%p218_p2) }
   0x7   : > { %s1517_s9 = smov (!%p218_p2), 120   ;;  %s1518_s10 = smov (!%p218_p2), 116   ;;  %1477 = vset.pattern.permute.xlu1 (!%p218_p2), %v1523_v6  ;;  %1476 = vset.pattern.permute.xlu0 (!%p218_p2), %v1523_v6  ;;  %vm311_vm1 = vcmask (!%p218_p2), 1039360   ;;  %vm617_vm2 = vcmask (!%p218_p2), 990208   ;;  %v1483_v15 = vld [vmem:[%s1687_s1 + $0x18] sm:$0xff] (!%p218_p2)   ;;  %v1484_v16 = vld [vmem:[%s1687_s1 + $0x48] sm:$0xff] (!%p218_p2)  }
   0x8   : > { %s1519_s11 = smov (!%p218_p2), 126   ;;  %s1520_s12 = smov (!%p218_p2), 115   ;;  %vm698_vm3 = vcmask (!%p218_p2), 982016   ;;  %v1485_v19 = vld [vmem:[%s1687_s1] sm:$0xff] (!%p218_p2)   ;;  %v1486_v21 = vld [vmem:[%s1687_s1 + $0x50] sm:$0xff] (!%p218_p2)   ;;  %vm779_vm4 = vcmask (!%p218_p2), 949248  }
   0x9   : > { %s1521_s13 = smov (!%p218_p2), 122   ;;  %s1522_s14 = smov (!%p218_p2), 114   ;;  %vm455_vm5 = vcmask (!%p218_p2), 1031168   ;;  %v1487_v28 = vld [vmem:[%s1687_s1 + $0x8] sm:$0xff] (!%p218_p2)   ;;  %v1488_v29 = vld [vmem:[%s1687_s1 + $0x58] sm:$0xff] (!%p218_p2)   ;;  %vm860_vm6 = vcmask (!%p218_p2), 941056  }
   0xa   : > { %v1489_v32 = vld [vmem:[%s1687_s1 + $0x20] sm:$0xff] (!%p218_p2)   ;;  %vm536_vm7 = vcmask (!%p218_p2), 998400   ;;  %v1491_v38 = vld [vmem:[%s1687_s1 + $0x28] sm:$0xff] (!%p218_p2)   ;;  %vm941_vm8 = vcmask (!%p218_p2), 932864   ;;  %v1493_v42 = vld [vmem:[%s1687_s1 + $0x30] sm:$0xff] (!%p218_p2)   ;;  %vm1090_vm9 = vcmask (!%p218_p2), 7168  }
   0xb   : > { %v1490_v33 = vld [vmem:[%s1687_s1 + $0x60] sm:$0xff] (!%p218_p2)   ;;  %v1492_v39 = vld [vmem:[%s1687_s1 + $0x68] sm:$0xff] (!%p218_p2)   ;;  %v1494_v43 = vld [vmem:[%s1687_s1 + $0x70] sm:$0xff] (!%p218_p2)  }
   0xc   : > { %v1495_v45 = vld [vmem:[%s1687_s1 + $0x38] sm:$0xff] (!%p218_p2)   ;;  %v1497_v47 = vld [vmem:[%s1687_s1 + $0x80] sm:$0xff] (!%p218_p2)   ;;  %v1498_v48 = vld [vmem:[%s1687_s1 + $0x88] sm:$0xff] (!%p218_p2)  }
   0xd   : > { %s1694_s22 = smov (!%p257_p3, %s1256_s22), 5  ;;  %v1496_v46 = vld [vmem:[%s1687_s1 + $0x78] sm:$0xff]  }
   0xe   : > { %s1342_s27 = sshll.u32 %s1694_s22, 4 }
   0xf   : > { %s261_s30 = scalar_lea.vmem %s1686_s0, %s1342_s27 }
  0x10   : > { %v1478_v2 = vld [vmem:[%s261_s30] ss:$8 sps:$4 sm:$0xff]   ;;  %v1480_v3 = vld [vmem:[%s261_s30 + $0x4] ss:$8 sps:$4 sm:$0xff]  }
  0x11   : > { %307 = vrot.lane.b32.xlu1 %v1478_v2, %s1515_s7  ;;  %613 = vrot.lane.b32.xlu0 %v1478_v2, %s1516_s8 }
  0x15   : > { %309 = vrot.lane.b32.xlu1 %v1480_v3, %s1515_s7  ;;  %615 = vrot.lane.b32.xlu0 %v1480_v3, %s1516_s8 }
  0x19   : > { %696 = vrot.lane.b32.xlu1 %v1480_v3, %s1517_s9  ;;  %694 = vrot.lane.b32.xlu0 %v1478_v2, %s1517_s9 }
  0x1d   : > { %777 = vrot.lane.b32.xlu1 %v1480_v3, %s1518_s10  ;;  %775 = vrot.lane.b32.xlu0 %v1478_v2, %s1518_s10 }
  0x21   : > { %453 = vrot.lane.b32.xlu1 %v1480_v3, %s1519_s11  ;;  %451 = vrot.lane.b32.xlu0 %v1478_v2, %s1519_s11  ;;  %s1658_s11 = sshll.u32 %s1694_s22, 5 }
  0x22   : > { %s266_s16 = scalar_lea.vmem %s1690_s4, %s1658_s11  ;;  %s271_s18 = scalar_lea.vmem %s1691_s5, %s1658_s11 }
  0x23   : > { %s276_s23 = scalar_lea.vmem %s1692_s6, %s1658_s11 }
  0x25   : > { %858 = vrot.lane.b32.xlu1 %v1480_v3, %s1520_s12  ;;  %856 = vrot.lane.b32.xlu0 %v1478_v2, %s1520_s12 }
  0x29   : > { %534 = vrot.lane.b32.xlu1 %v1480_v3, %s1521_s13  ;;  %532 = vrot.lane.b32.xlu0 %v1478_v2, %s1521_s13 }
  0x2d   : > { %939 = vrot.lane.b32.xlu1 %v1480_v3, %s1522_s14  ;;  %937 = vrot.lane.b32.xlu0 %v1478_v2, %s1522_s14  ;;  %v1339_v3 = vld [vmem:[%s1689_s3] ss:$0 sm:$0xff] }
  0x31   : > { %1014 = vperm.xlu1 %1477, %v1004_v4   ;;  %1009 = vperm.xlu0 %1476, %v1003_v5  }
  0x35   : > { %1019 = vperm.xlu1 %1477, %v1005_v7   ;;  %1024 = vperm.xlu0 %1476, %v1006_v8  }
  0x83   : > { %v308_v9 = vpop.permute.xlu1 %307  ;;  %v614_v10 = vpop.permute.xlu0 %613 }
  0x87   : > { %v310_v11 = vpop.permute.xlu1 %309  ;;  %v616_v12 = vpop.permute.xlu0 %615 }
  0x88   : > { %v312_v13 = vsel %vm311_vm1, %v308_v9, %v310_v11  ;;  %v618_v14 = vsel %vm617_vm2, %v614_v10, %v616_v12 }
  0x89   : > { %1373 = vmatprep.subr.bf16.mxu1 %v312_v13  ;;  %1397 = vmatprep.subr.bf16.mxu0 %v618_v14 }
  0x8a   : > { %1374 = vmatpush3.bf16.msra.mxu1 %v312_v13  ;;  %1398 = vmatpush3.bf16.msra.mxu0 %v618_v14 }
  0x8b   : > { %v697_v17 = vpop.permute.xlu1 %696  ;;  %v695_v18 = vpop.permute.xlu0 %694  ;;  %1379 = vmatprep.subr.bf16.mxu1 %v1478_v2 }
  0x8c   : > { %v699_v20 = vsel %vm698_vm3, %v695_v18, %v697_v17 }
  0x8d   : > { %1376 = vmatmul.mubr.msk.bf16.vlgmr.msra.gmra.mrb[0].mxu1 %vm314_vm0, %v1483_v15  ;;  %1400 = vmatmul.mubr.msk.bf16.vlgmr.msra.gmra.mrb[0].mxu0 %vm314_vm0, %v1484_v16 }
  0x8e   : > { %1403 = vmatprep.subr.bf16.mxu0 %v699_v20  ;;  %1380 = vmatpush3.bf16.msra.mxu1 %v1478_v2 }
  0x8f   : > { %1404 = vmatpush3.bf16.msra.mxu0 %v699_v20  ;;  %v778_v22 = vpop.permute.xlu1 %777  ;;  %v776_v23 = vpop.permute.xlu0 %775  ;;  %1381 = vmatprep.mubr.msk.bf16.mxu1 %vm314_vm0, %v1485_v19 }
  0x90   : > { %1405 = vmatprep.mubr.msk.bf16.mxu0 %vm314_vm0, %v1486_v21  ;;  %v780_v24 = vsel %vm779_vm4, %v776_v23, %v778_v22 }
  0x91   : > { %1409 = vmatprep.subr.bf16.mxu0 %v780_v24 }
  0x93   : > { %v454_v25 = vpop.permute.xlu1 %453  ;;  %v452_v26 = vpop.permute.xlu0 %451 }
  0x94   : > { %v456_v27 = vsel %vm455_vm5, %v452_v26, %v454_v25 }
  0x95   : > { %1385 = vmatprep.subr.bf16.mxu1 %v456_v27 }
  0x97   : > { %v859_v30 = vpop.permute.xlu1 %858  ;;  %v857_v31 = vpop.permute.xlu0 %856 }
  0x98   : > { %v861_v34 = vsel %vm860_vm6, %v857_v31, %v859_v30 }
  0x99   : > { %1382 = vmatmul.mubr.msk.bf16.vlgmr.msra.gmra.mrb[0].mxu1 %vm314_vm0, %v1487_v28  ;;  %1406 = vmatmul.mubr.msk.bf16.vlgmr.msra.gmra.mrb[0].mxu0 %vm314_vm0, %v1488_v29 }
  0x9a   : > { %1410 = vmatpush3.bf16.msra.mxu0 %v780_v24  ;;  %1386 = vmatpush3.bf16.msra.mxu1 %v456_v27 }
  0x9b   : > { %1387 = vmatprep.mubr.msk.bf16.mxu1 %vm314_vm0, %v1489_v32  ;;  %1411 = vmatprep.mubr.msk.bf16.mxu0 %vm314_vm0, %v1490_v33  ;;  %v535_v35 = vpop.permute.xlu1 %534  ;;  %v533_v36 = vpop.permute.xlu0 %532 }
  0x9c   : > { %1415 = vmatprep.subr.bf16.mxu0 %v861_v34  ;;  %v537_v37 = vsel %vm536_vm7, %v533_v36, %v535_v35 }
  0x9d   : > { %1391 = vmatprep.subr.bf16.mxu1 %v537_v37 }
  0x9f   : > { %v940_v40 = vpop.permute.xlu1 %939  ;;  %v938_v41 = vpop.permute.xlu0 %937 }
  0xa0   : > { %v942_v44 = vsel %vm941_vm8, %v938_v41, %v940_v40 }
  0xa5   : > { %1388 = vmatmul.mubr.msk.bf16.vlgmr.msra.gmra.mrb[0].mxu1 %vm314_vm0, %v1491_v38  ;;  %1412 = vmatmul.mubr.msk.bf16.vlgmr.msra.gmra.mrb[0].mxu0 %vm314_vm0, %v1492_v39 }
  0xa6   : > { %1416 = vmatpush3.bf16.msra.mxu0 %v861_v34  ;;  %1392 = vmatpush3.bf16.msra.mxu1 %v537_v37 }
  0xa7   : > { %1393 = vmatprep.mubr.msk.bf16.mxu1 %vm314_vm0, %v1493_v42  ;;  %1417 = vmatprep.mubr.msk.bf16.mxu0 %vm314_vm0, %v1494_v43 }
  0xa8   : > { %1421 = vmatprep.subr.bf16.mxu0 %v942_v44 }
  0xb0   : > { %v1015_v53 = vpop.permute.xlu1 %1014  ;;  %v1010_v54 = vpop.permute.xlu0 %1009 }
  0xb1   : > { %1394 = vmatmul.mubr.msk.bf16.vlgmr.msra.gmra.mrb[0].mxu1 %vm314_vm0, %v1495_v45  ;;  %1418 = vmatmul.mubr.msk.bf16.vlgmr.msra.gmra.mrb[0].mxu0 %vm314_vm0, %v1496_v46 }
  0xb2   : > { %1422 = vmatpush3.bf16.msra.mxu0 %v942_v44  ;;  %1423 = vmatprep.mubr.msk.bf16.mxu0 %vm314_vm0, %v1497_v47 }
  0xb4   : > { %v1020_v56 = vpop.permute.xlu1 %1019  ;;  %v1025_v61 = vpop.permute.xlu0 %1024 }
  0xbd   : > { %1424 = vmatmul.mubr.msk.bf16.vlgmr.msra.gmra.mrb[0].mxu0 %vm314_vm0, %v1498_v48 }
 0x184   : > { %v1395_v49 = vpop.f32.mrb[0].mxu1 }
 0x185   : > { %v579_v50 = vpop.f32.mrb[1].mxu1 }
 0x186   : > { %v1396_v51 = vpop.f32.mrb[2].mxu1 }
 0x187   : > { %v582_v52 = vpop.f32.mrb[3].mxu1 }
 0x190   : > { %v1425_v55 = vpop.f32.mrb[0].mxu0 }
 0x191   : > { %v1427_v57 = vadd.f32 %v1425_v55, %v1395_v49  ;;  %v984_v58 = vpop.f32.mrb[1].mxu0 }
 0x192   : > { %v1428_v59 = vadd.f32 %v984_v58, %v579_v50  ;;  %v1426_v60 = vpop.f32.mrb[2].mxu0 }
 0x193   : > { %v1029_v62 = vadd.f32 %v1427_v57, %v1020_v56  ;;  %v1429_v63 = vadd.f32 %v1426_v60, %v1396_v51  ;;  %v987_v0 = vpop.f32.mrb[3].mxu0 }
 0x194   : > { %v1027_v1 = vadd.f32 %v1428_v59, %v1010_v54  ;;  %v1430_v2 = vadd.f32 %v987_v0, %v582_v52 }
 0x195   : > { %v1033_v4 = vmax.f32 %v1029_v62, 0.0  ;;  %v1030_v5 = vadd.f32 %v1429_v63, %v1025_v61 }
 0x196   : > { %v1031_v6 = vmax.f32 %v1027_v1, 0.0  ;;  %v1028_v7 = vadd.f32 %v1430_v2, %v1015_v53 }
 0x197   : > { %v1034_v8 = vmax.f32 %v1030_v5, 0.0  ;;  %v1044_v9 = vmul.f32 %v1339_v3, %v1033_v4 }
 0x198   : > { %v1032_v10 = vmax.f32 %v1028_v7, 0.0  ;;  %v1042_v11 = vmul.f32 %v1339_v3, %v1031_v6 }
 0x199   : > { %v1045_v12 = vmul.f32 %v1339_v3, %v1034_v8  ;;  %1054 = vadd.xlane.f32.xlu0 %v1044_v9  ;;  %1048 = vst [vmem:[%s266_s16 + $0x10] sm:$0xff] %v1044_v9  ;;  %v1060_v16 = vmul.f32 %v1044_v9, %v1044_v9 }
 0x19a   : > { %1050 = vadd.xlane.f32.xlu1 %v1042_v11  ;;  %1046 = vst [vmem:[%s266_s16] sm:$0xff] %v1042_v11  ;;  %v1043_v13 = vmul.f32 %v1339_v3, %v1032_v10  ;;  %v1058_v14 = vmul.f32 %v1042_v11, %v1042_v11 }
 0x19b   : > { %1049 = vst [vmem:[%s266_s16 + $0x18] sm:$0xff] %v1045_v12  ;;  %v1061_v17 = vmul.f32 %v1045_v12, %v1045_v12 }
 0x19c   : > { %1047 = vst [vmem:[%s266_s16 + $0x8] sm:$0xff] %v1043_v13  ;;  %v1059_v15 = vmul.f32 %v1043_v13, %v1043_v13 }
 0x19d   : > { %1052 = vadd.xlane.f32.xlu0 %v1043_v13 }
 0x19e   : > { %1056 = vadd.xlane.f32.xlu1 %v1045_v12 }
 0x1a1   : > { %1062 = vadd.xlane.f32.xlu0 %v1058_v14 }
 0x1a2   : > { %1064 = vadd.xlane.f32.xlu1 %v1059_v15 }
 0x1a5   : > { %1066 = vadd.xlane.f32.xlu0 %v1060_v16 }
 0x1a6   : > { %1068 = vadd.xlane.f32.xlu1 %v1061_v17 }
 0x226   : > { %v1055_v18 = vpop.xlane.xlu0 %1054 }
 0x227   : > { %v1072_v19 = vmul.f32 0.0625, %v1055_v18  ;;  %v1051_v20 = vpop.xlane.xlu1 %1050 }
 0x228   : > { %v1070_v21 = vmul.f32 0.0625, %v1051_v20 }
 0x229   : > { %1093 = vst.msk [vmem:[%s271_s18 + $0x10] sm:$0xff] %vm1090_vm9, %v1072_v19  ;;  %v1076_v29 = vmul.f32 16.0, %v1072_v19 }
 0x22a   : > { %1091 = vst.msk [vmem:[%s271_s18] sm:$0xff] %vm1090_vm9, %v1070_v21  ;;  %v1053_v22 = vpop.xlane.xlu0 %1052  ;;  %v1074_v23 = vmul.f32 16.0, %v1070_v21 }
 0x22b   : > { %v1071_v24 = vmul.f32 0.0625, %v1053_v22  ;;  %v1057_v25 = vpop.xlane.xlu1 %1056  ;;  %v1080_v37 = vmul.f32 %v1076_v29, %v1072_v19 }
 0x22c   : > { %v1073_v26 = vmul.f32 0.0625, %v1057_v25  ;;  %v1078_v27 = vmul.f32 %v1074_v23, %v1070_v21 }
 0x22d   : > { %1092 = vst.msk [vmem:[%s271_s18 + $0x8] sm:$0xff] %vm1090_vm9, %v1071_v24  ;;  %v1075_v28 = vmul.f32 16.0, %v1071_v24 }
 0x22e   : > { %1094 = vst.msk [vmem:[%s271_s18 + $0x18] sm:$0xff] %vm1090_vm9, %v1073_v26  ;;  %v1063_v30 = vpop.xlane.xlu0 %1062  ;;  %v1077_v31 = vmul.f32 16.0, %v1073_v26 }
 0x22f   : > { %v1082_v32 = vsub.f32 %v1063_v30, %v1078_v27  ;;  %v1065_v33 = vpop.xlane.xlu1 %1064  ;;  %v1079_v34 = vmul.f32 %v1075_v28, %v1071_v24 }
 0x230   : > { %v1081_v39 = vmul.f32 %v1077_v31, %v1073_v26 }
 0x231   : > { %v1086_v35 = vmax.f32 %v1082_v32, 0.0  ;;  %v1083_v36 = vsub.f32 %v1065_v33, %v1079_v34 }
 0x232   : > { %v1067_v38 = vpop.xlane.xlu0 %1066 }
 0x233   : > { %v1095_v40 = vmul.f32 0.06666667, %v1086_v35  ;;  %v1087_v41 = vmax.f32 %v1083_v36, 0.0  ;;  %v1084_v42 = vsub.f32 %v1067_v38, %v1080_v37  ;;  %v1069_v43 = vpop.xlane.xlu1 %1068 }
 0x234   : > { %v1085_v44 = vsub.f32 %v1069_v43, %v1081_v39 }
 0x235   : > { %v1099_v45 = vadd.f32 1e-05, %v1095_v40  ;;  %v1096_v46 = vmul.f32 0.06666667, %v1087_v41  ;;  %v1088_v47 = vmax.f32 %v1084_v42, 0.0 }
 0x236   : > { %v1089_v48 = vmax.f32 %v1085_v44, 0.0 }
 0x237   : > { %1499 = vrsqrt.f32 %v1099_v45  ;;  %v1100_v49 = vadd.f32 1e-05, %v1096_v46  ;;  %v1097_v50 = vmul.f32 0.06666667, %v1088_v47  ;;  %vm1105_vm10 = vcmp.eq.f32.partialorder %v1099_v45, inf }
 0x238   : > { %v1098_v51 = vmul.f32 0.06666667, %v1089_v48  ;;  %v1108_v56 = vand.u32 2147483648, %v1099_v45  ;;  %vm1107_vm11 = vcmp.eq.f32.partialorder %v1099_v45, 0.0 }
 0x239   : > { %1501 = vrsqrt.f32 %v1100_v49  ;;  %v1101_v52 = vadd.f32 1e-05, %v1097_v50  ;;  %vm1112_vm12 = vcmp.eq.f32.partialorder %v1100_v49, inf  ;;  %v1115_v61 = vand.u32 2147483648, %v1100_v49 }
 0x23a   : > { %v1102_v53 = vadd.f32 1e-05, %v1098_v51  ;;  %vm1114_vm13 = vcmp.eq.f32.partialorder %v1100_v49, 0.0 }
 0x23b   : > { %1503 = vrsqrt.f32 %v1101_v52  ;;  %vm1119_vm14 = vcmp.eq.f32.partialorder %v1101_v52, inf  ;;  %v1122_v3 = vand.u32 2147483648, %v1101_v52  ;;  %vm1121_vm15 = vcmp.eq.f32.partialorder %v1101_v52, 0.0 }
 0x23c   : > { %1505 = vrsqrt.f32 %v1102_v53  ;;  %vm1126_vm0 = vcmp.eq.f32.partialorder %v1102_v53, inf  ;;  %v1129_v6 = vand.u32 2147483648, %v1102_v53  ;;  %vm1128_vm1 = vcmp.eq.f32.partialorder %v1102_v53, 0.0 }
 0x241   : > { %v1500_v54 = vpop.eup %1499 }
 0x242   : > { %v1104_v55 = vmul.f32 %v1500_v54, %v1099_v45 }
 0x243   : > { %v1502_v57 = vpop.eup %1501 }
 0x244   : > { %v1106_v58 = vsel %vm1105_vm10, %v1099_v45, %v1104_v55  ;;  %v1111_v60 = vmul.f32 %v1502_v57, %v1100_v49 }
 0x245   : > { %v1109_v59 = vsel %vm1107_vm11, %v1108_v56, %v1106_v58  ;;  %v1504_v62 = vpop.eup %1503 }
 0x246   : > { %1131 = vst.msk [vmem:[%s276_s23] sm:$0xff] %vm1090_vm9, %v1109_v59  ;;  %v1113_v63 = vsel %vm1112_vm12, %v1100_v49, %v1111_v60  ;;  %v1506_v0 = vpop.eup %1505  ;;  %v1118_v2 = vmul.f32 %v1504_v62, %v1101_v52 }
 0x247   : > { %v1116_v1 = vsel %vm1114_vm13, %v1115_v61, %v1113_v63  ;;  %v1125_v4 = vmul.f32 %v1506_v0, %v1102_v53 }
 0x248   : > { %1132 = vst.msk [vmem:[%s276_s23 + $0x8] sm:$0xff] %vm1090_vm9, %v1116_v1  ;;  %v1120_v5 = vsel %vm1119_vm14, %v1101_v52, %v1118_v2 }
 0x249   : > { %v1123_v7 = vsel %vm1121_vm15, %v1122_v3, %v1120_v5  ;;  %v1127_v8 = vsel %vm1126_vm0, %v1102_v53, %v1125_v4 }
 0x24a   : > { %1133 = vst.msk [vmem:[%s276_s23 + $0x10] sm:$0xff] %vm1090_vm9, %v1123_v7  ;;  %v1130_v9 = vsel %vm1128_vm1, %v1129_v6, %v1127_v8 }
 0x24b   : > { %1134 = vst.msk [vmem:[%s276_s23 + $0x18] sm:$0xff] %vm1090_vm9, %v1130_v9 }
 0x24c PF: > { %s17_s21 = sadd.s32 1, %s1513_s21  }
 0x24d   : > { %p14_p4 = scmp.ge.s32.totalorder %s17_s21, 8  }
 0x24f   :  { %16 = sbr.rel (!%p14_p4) target bundleno = 1 (0x1), region = 98 }

// kernel: style_content_loss.9
= control target key start
LH: loop header
LB: loop body
LE: loop exit
PB: predicated region body
PF: predicated region fallthrough
CT: control target
= control target key end

     0   :  { %7 = vsyncpa [#allocation4], 0  ;;  %s367_s9 = smov 0   ;;  %s434_s0 = inlined_call_operand.vmem [shape: f32[6,64,128], index: 0, kind: input, shape index: {}, may-alias: {0,1}]   ;;  %s435_s1 = inlined_call_operand.vmem [shape: f32[6,64,128], index: 1, kind: input, shape index: {}, may-alias: {0,1}]   ;;  %s436_s2 = inlined_call_operand.hbm [shape: f32[1,1], index: 2, kind: output, shape index: {}]  }
   0x1 LB: > { %s373_s10 = sadd.s32 4294967295, %s348_s9   ;;  %p283_p0 = scmp.ge.s32.totalorder %s348_s9, 1  ;;  %s348_s9 = sphi %s367_s9, %s13_s9  }
   0x2   : > { %p122_p1 = scmp.lt.s32.totalorder %s348_s9, 3 }
   0x4   : > { %p123_p2 = pnand %p283_p0, %p122_p1 }
   0x5   : > { %p145_p3 = scmp.lt.s32.totalorder (!%p123_p2), %s373_s10, 5  ;;  %s150_s11 = sadd.s32 (!%p123_p2), 4, %s373_s10 }
   0x6   : > { %126 = sbr.rel (%p123_p2) target bundleno = 235 (0xeb), region = 28  ;;  %p151_p4 = scmp.lt.s32.totalorder (!%p123_p2), %s150_s11, 5 }
   0x7   : > { %p288_p5 = scmp.ne.s32.totalorder (!%p123_p2), %s373_s10, 0 }
   0xd   : > { %s146_s12 = scalar_select %p145_p3, %s373_s10, 5 }
   0xe   : > { %s438_s11 = smov (!%p151_p4, %s150_s11), 5  ;;  %160 = sbr.rel (%p288_p5) target bundleno = 21 (0x15), region = 32 }
   0xf   : > { %s294_s13 = sshll.u32 %s146_s12, 6  ;;  %s295_s17 = sshll.u32 %s438_s11, 6  ;;  %v350_v0 = vmov (!%p288_p5), 0.0  }
  0x10   : > { %s383_s16 = scalar_lea.vmem %s434_s0, %s294_s13  ;;  %s388_s20 = scalar_lea.vmem %s435_s1, %s295_s17  ;;  %161 = vst [vmem:[#allocation2] sm:$0x1] (!%p288_p5), %v350_v0 }
  0x15 PF: > { %v162_v1 = vld [vmem:[%s383_s16] sm:$0xff]  ;;  %v163_v2 = vld [vmem:[%s383_s16 + $0x8] sm:$0xff]  ;;  %v164_v3 = vld [vmem:[%s383_s16 + $0x10] sm:$0xff]  ;;  %p289_p6 = scmp.ne.s32.totalorder %s373_s10, 1 }
  0x16   : > { %v165_v4 = vld [vmem:[%s383_s16 + $0x18] sm:$0xff]  ;;  %v166_v5 = vld [vmem:[%s383_s16 + $0x20] sm:$0xff]  ;;  %v171_v7 = vld [vmem:[%s388_s20 + $0x8] sm:$0xff]  ;;  %vm215_vm0 = vcmask (!%p289_p6), 1040384   ;;  %vm220_vm1 = vcmask (!%p289_p6), 0  }
  0x17   : > { %v170_v6 = vld [vmem:[%s388_s20] sm:$0xff]  ;;  %v172_v8 = vld [vmem:[%s388_s20 + $0x10] sm:$0xff]  ;;  %v173_v9 = vld [vmem:[%s388_s20 + $0x18] sm:$0xff]  ;;  %v179_v12 = vsub.f32 %v163_v2, %v171_v7 }
  0x18   : > { %v178_v10 = vsub.f32 %v162_v1, %v170_v6  ;;  %v174_v11 = vld [vmem:[%s388_s20 + $0x20] sm:$0xff]  ;;  %v180_v13 = vsub.f32 %v164_v3, %v172_v8  ;;  %v181_v14 = vsub.f32 %v165_v4, %v173_v9  ;;  %v167_v15 = vld [vmem:[%s383_s16 + $0x28] sm:$0xff]  ;;  %v168_v21 = vld [vmem:[%s383_s16 + $0x30] sm:$0xff] }
  0x19   : > { %v175_v16 = vld [vmem:[%s388_s20 + $0x28] sm:$0xff]  ;;  %v182_v18 = vsub.f32 %v166_v5, %v174_v11  ;;  %v188_v19 = vmul.f32 %v179_v12, %v179_v12  ;;  %v176_v22 = vld [vmem:[%s388_s20 + $0x30] sm:$0xff]  ;;  %v169_v26 = vld [vmem:[%s383_s16 + $0x38] sm:$0xff] }
  0x1a   : > { %v187_v17 = vmul.f32 %v178_v10, %v178_v10  ;;  %v189_v20 = vmul.f32 %v180_v13, %v180_v13  ;;  %v183_v23 = vsub.f32 %v167_v15, %v175_v16  ;;  %v190_v24 = vmul.f32 %v181_v14, %v181_v14  ;;  %v177_v27 = vld [vmem:[%s388_s20 + $0x38] sm:$0xff]  ;;  %v186_v45 = vld [vmem:[#allocation2] sm:$0x1] }
  0x1b   : > { %v184_v28 = vsub.f32 %v168_v21, %v176_v22  ;;  %v191_v29 = vmul.f32 %v182_v18, %v182_v18  ;;  %v185_v31 = vsub.f32 %v169_v26, %v177_v27 }
  0x1c   : > { %v195_v25 = vadd.f32 %v188_v19, %v187_v17  ;;  %v192_v32 = vmul.f32 %v183_v23, %v183_v23 }
  0x1d   : > { %v193_v34 = vmul.f32 %v184_v28, %v184_v28  ;;  %v194_v36 = vmul.f32 %v185_v31, %v185_v31 }
  0x1e   : > { %v196_v30 = vadd.f32 %v195_v25, %v189_v20 }
  0x20   : > { %v197_v33 = vadd.f32 %v196_v30, %v190_v24 }
  0x22   : > { %v198_v35 = vadd.f32 %v197_v33, %v191_v29 }
  0x24   : > { %v199_v37 = vadd.f32 %v198_v35, %v192_v32 }
  0x26   : > { %v200_v38 = vadd.f32 %v199_v37, %v193_v34 }
  0x28   : > { %v201_v39 = vadd.f32 %v200_v38, %v194_v36 }
  0x2a   : > { %v202_v40 = vrot.slane %v201_v39, 4 }
  0x2c   : > { %v203_v41 = vadd.f32 %v202_v40, %v201_v39 }
  0x2e   : > { %v204_v42 = vrot.slane %v203_v41, 2 }
  0x30   : > { %v205_v43 = vadd.f32 %v204_v42, %v203_v41 }
  0x32   : > { %v206_v44 = vrot.slane %v205_v43, 1  ;;  %213 = sbr.rel (%p289_p6) target bundleno = 210 (0xd2), region = 36 }
  0x34   : > { %v207_v46 = vadd.f32 %v206_v44, %v205_v43 }
  0x36   : > { %v208_v47 = vadd.f32 %v207_v46, %v186_v45 }
  0x38   : > { %209 = vst [vmem:[#allocation2] sm:$0x1] %v208_v47 }
  0x3f   : > { %v214_v48 = vld [vmem:[#allocation2] sm:$0x1] }
  0x40   : > { %v216_v49 = vsel %vm215_vm0, %v214_v48, 0.0 }
  0x41   : > { %217 = vadd.xlane.f32.xlu0 %v216_v49 }
  0xce   : > { %v218_v50 = vpop.xlane.xlu0 %217 }
  0xcf   : > { %v219_v51 = vmul.f32 0.001953125, %v218_v50 }
  0xd1   : > { %221 = vst.msk [vmem:[#allocation3] sm:$0x1] %vm220_vm1, %v219_v51 }
  0xd2 PF: > { %p300_p7 = scmp.eq.s32.totalorder %s373_s10, 1  ;;  %s351_s21 = smov [#allocation3]  }
  0xd3   : > { %s229_s22 = sshll.u32 %s351_s21, 4  ;;  %s230_s22 = int_to_ptr.vmem [resolvable:$true] %s229_s22 }
  0xd4   : > { %s312_s23 = scalar_lea.vmem %s230_s22, 16  ;;  %s318_s24 = scalar_lea.vmem %s230_s22, 32 }
  0xd5   : > { %p313_p8 = scmp.ne.s32.totalorder %s230_s22, %s312_s23  ;;  %p319_p11 = scmp.lt.s32.totalorder %s230_s22, %s230_s22 }
  0xd6   : > { %p320_p12 = scmp.lt.s32.totalorder %s318_s24, %s312_s23 }
  0xd7   : > { %p314_p9 = pnand %p313_p8, %p300_p7 }
  0xd8   : > { %p321_p13 = por %p320_p12, %p319_p11 }
  0xd9   : > { %p315_p10 = pneg %p314_p9 }
  0xdb   : > { %p322_p0 = pnand %p321_p13, %p315_p10 }
  0xdd   : > { %325 = shalt.err (!%p322_p0)
}
  0xde   : > { %s326_s27 = scalar_lea.hbm %s436_s2, 16 }
  0xdf   : > { %p327_p1 = scmp.ne.s32.totalorder %s436_s2, %s326_s27  ;;  %p332_p4 = scmp.lt.u32.totalorder %s326_s27, %s436_s2 }
  0xe1   : > { %p328_p2 = pnand %p327_p1, %p300_p7 }
  0xe3   : > { %p329_p3 = pneg %p328_p2 }
  0xe5   : > { %p334_p5 = pnand %p332_p4, %p329_p3 }
  0xe7   : > { %337 = shalt.err (!%p334_p5)
}
  0xe8   : > { %297 = dma.vmem_to_hbm [thread:$0]  (%p300_p7), %s230_s22, 16, %s436_s2, [#allocation4]  }
  0xe9   : > { %343 = dma.done.wait (%p300_p7), [#allocation4], 16  }
  0xea   : > { %345 = vsyncadd (%p300_p7), [#allocation4], 4294967280 }
  0xeb PF: > { %s13_s9 = sadd.s32 1, %s348_s9  }
  0xec   : > { %p10_p6 = scmp.ge.s32.totalorder %s13_s9, 4  }
  0xee   :  { %12 = sbr.rel (!%p10_p6) target bundleno = 1 (0x1), region = 66 }
  0xf5   :  { %242 = vsyncpa [#allocation4], 1 }
  0xf6   :  { %244 = vsyncpa [#allocation4 + $0x1], 1 }

// kernel: style_content_loss.8
= control target key start
LH: loop header
LB: loop body
LE: loop exit
PB: predicated region body
PF: predicated region fallthrough
CT: control target
= control target key end

     0   :  { %s2310_s21 = smov 0   ;;  %s2627_s0 = inlined_call_operand.vmem [shape: bf16[6,32,256], index: 0, kind: input, shape index: {}]   ;;  %s2628_s1 = inlined_call_operand.vmem [shape: bf16[9,64,32], index: 1, kind: input, shape index: {}]   ;;  %s2629_s2 = inlined_call_operand.vmem [shape: f32[64,1], index: 2, kind: input, shape index: {}]   ;;  %s2630_s3 = inlined_call_operand.vmem [shape: f32[1,128], index: 3, kind: input, shape index: {}]   ;;  %s2631_s4 = inlined_call_operand.vmem [shape: f32[6,64,128], index: 4, kind: output, shape index: {0}]   ;;  %s2632_s5 = inlined_call_operand.vmem [shape: f32[6,64,1], index: 5, kind: output, shape index: {1}]   ;;  %s2633_s6 = inlined_call_operand.vmem [shape: f32[6,64,1], index: 6, kind: output, shape index: {2}]  }
   0x1 LB: > { %s1791_s22 = sadd.s32 4294967295, %s2264_s21   ;;  %p1795_p0 = scmp.ge.s32.totalorder %s2264_s21, 1  ;;  %s2264_s21 = sphi %s2310_s21, %s17_s21  }
   0x2   : > { %p217_p1 = scmp.lt.s32.totalorder %s2264_s21, 7 }
   0x4   : > { %p218_p2 = pnand %p1795_p0, %p217_p1 }
   0x5   : > { %p257_p3 = scmp.lt.s32.totalorder (!%p218_p2), %s1791_s22, 5  ;;  %v2206_v0 = vld [vmem:[%s2628_s1 + $0x20] sm:$0xff] (!%p218_p2)   ;;  %vm348_vm0 = vcmask (!%p218_p2), 261120   ;;  %s2266_s29 = smov (!%p218_p2), 123   ;;  %v1415_v6 = vld [vmem:[%s2629_s2 + $0x8] sm:$0xff] (!%p218_p2)  ;;  %v2274_v8 = vmov (!%p218_p2), 0  }
   0x6   : > { %221 = sbr.rel (%p218_p2) target bundleno = 625 (0x271), region = 36  ;;  %2009 = vmatprep.mubr.msk.bf16.mxu1 (!%p218_p2), %vm348_vm0, %v2206_v0  ;;  %s2267_s30 = smov (!%p218_p2), 127   ;;  %v2208_v3 = vld [vmem:[%s2628_s1 + $0x80] sm:$0xff] (!%p218_p2)   ;;  %2199 = vset.pattern.permute.xlu1 (!%p218_p2), %v2274_v8  ;;  %v1416_v9 = vld [vmem:[%s2629_s2 + $0x10] sm:$0xff] (!%p218_p2)  ;;  %v1417_v10 = vld [vmem:[%s2629_s2 + $0x18] sm:$0xff] (!%p218_p2)  ;;  %vm816_vm1 = vcmask (!%p218_p2), 1006592  }
   0x7   : > { %2057 = vmatprep.mubr.msk.bf16.mxu0 (!%p218_p2), %vm348_vm0, %v2208_v3  ;;  %s2268_s9 = smov (!%p218_p2), 122   ;;  %s2269_s10 = smov (!%p218_p2), 120   ;;  %v1414_v7 = vld [vmem:[%s2629_s2] sm:$0xff] (!%p218_p2)  ;;  %2198 = vset.pattern.permute.xlu0 (!%p218_p2), %v2274_v8  ;;  %v1419_v12 = vld [vmem:[%s2629_s2 + $0x28] sm:$0xff] (!%p218_p2)  ;;  %v1420_v13 = vld [vmem:[%s2629_s2 + $0x30] sm:$0xff] (!%p218_p2)  ;;  %vm343_vm2 = vcmask (!%p218_p2), 1039360  }
   0x8   : > { %s2270_s11 = smov (!%p218_p2), 126   ;;  %s2271_s12 = smov (!%p218_p2), 119   ;;  %v1418_v11 = vld [vmem:[%s2629_s2 + $0x20] sm:$0xff] (!%p218_p2)  ;;  %v1421_v14 = vld [vmem:[%s2629_s2 + $0x38] sm:$0xff] (!%p218_p2)  ;;  %v2207_v24 = vld [vmem:[%s2628_s1 + $0x28] sm:$0xff] (!%p218_p2)   ;;  %vm943_vm3 = vcmask (!%p218_p2), 998400  }
   0x9   : > { %s2272_s13 = smov (!%p218_p2), 124   ;;  %s2273_s14 = smov (!%p218_p2), 118   ;;  %v2210_v25 = vld [vmem:[%s2628_s1 + $0x30] sm:$0xff] (!%p218_p2)   ;;  %v2209_v29 = vld [vmem:[%s2628_s1 + $0x88] sm:$0xff] (!%p218_p2)   ;;  %v2213_v30 = vld [vmem:[%s2628_s1 + $0xa0] sm:$0xff] (!%p218_p2)   ;;  %vm1070_vm4 = vcmask (!%p218_p2), 982016  }
   0xa   : > { %v2211_v34 = vld [vmem:[%s2628_s1 + $0x38] sm:$0xff] (!%p218_p2)   ;;  %v2212_v35 = vld [vmem:[%s2628_s1] sm:$0xff] (!%p218_p2)   ;;  %v2214_v42 = vld [vmem:[%s2628_s1 + $0x8] sm:$0xff] (!%p218_p2)   ;;  %vm562_vm5 = vcmask (!%p218_p2), 1031168   ;;  %vm1197_vm6 = vcmask (!%p218_p2), 973824   ;;  %vm689_vm7 = vcmask (!%p218_p2), 1014784  }
   0xb   : > { %v2215_v43 = vld [vmem:[%s2628_s1 + $0xa8] sm:$0xff] (!%p218_p2)   ;;  %v2216_v46 = vld [vmem:[%s2628_s1 + $0x10] sm:$0xff] (!%p218_p2)   ;;  %v2218_v52 = vld [vmem:[%s2628_s1 + $0x18] sm:$0xff] (!%p218_p2)   ;;  %vm1324_vm8 = vcmask (!%p218_p2), 965632   ;;  %vm1581_vm9 = vcmask (!%p218_p2), 7168  }
   0xc   : > { %v2217_v48 = vld [vmem:[%s2628_s1 + $0xb0] sm:$0xff] (!%p218_p2)   ;;  %v2219_v53 = vld [vmem:[%s2628_s1 + $0xb8] sm:$0xff] (!%p218_p2)   ;;  %v2220_v54 = vld [vmem:[%s2628_s1 + $0x40] sm:$0xff] (!%p218_p2)  }
   0xd   : > { %s2635_s22 = smov (!%p257_p3, %s1791_s22), 5  ;;  %v2221_v57 = vld [vmem:[%s2628_s1 + $0xc0] sm:$0xff]   ;;  %v2222_v62 = vld [vmem:[%s2628_s1 + $0x48] sm:$0xff]   ;;  %v2226_v8 = vld [vmem:[%s2628_s1 + $0x58] sm:$0xff]  }
   0xe   : > { %s1947_s23 = sshll.u32 %s2635_s22, 5  ;;  %v2223_v63 = vld [vmem:[%s2628_s1 + $0xc8] sm:$0xff]  }
   0xf   : > { %s261_s26 = scalar_lea.vmem %s2627_s0, %s1947_s23 }
  0x10   : > { %v2327_v1 = vld [vmem:[%s261_s26] ss:$8 sps:$4 sm:$0xff]   ;;  %v2202_v2 = vld [vmem:[%s261_s26 + $0x4] ss:$8 sps:$4 sm:$0xff]   ;;  %v2335_v4 = vld [vmem:[%s261_s26 + $0x10] ss:$8 sps:$4 sm:$0xff]  }
  0x11   : > { %808 = vrot.lane.b32.xlu1 %v2327_v1, %s2266_s29  ;;  %335 = vrot.lane.b32.xlu0 %v2327_v1, %s2267_s30  ;;  %v2205_v5 = vld [vmem:[%s261_s26 + $0x14] ss:$8 sps:$4 sm:$0xff]  }
  0x15   : > { %810 = vrot.lane.b32.xlu1 %v2202_v2, %s2266_s29  ;;  %337 = vrot.lane.b32.xlu0 %v2202_v2, %s2267_s30 }
  0x19   : > { %341 = vrot.lane.b32.xlu1 %v2205_v5, %s2267_s30  ;;  %339 = vrot.lane.b32.xlu0 %v2335_v4, %s2267_s30 }
  0x1d   : > { %814 = vrot.lane.b32.xlu1 %v2205_v5, %s2266_s29  ;;  %812 = vrot.lane.b32.xlu0 %v2335_v4, %s2266_s29 }
  0x21   : > { %937 = vrot.lane.b32.xlu1 %v2202_v2, %s2268_s9  ;;  %935 = vrot.lane.b32.xlu0 %v2327_v1, %s2268_s9 }
  0x25   : > { %941 = vrot.lane.b32.xlu1 %v2205_v5, %s2268_s9  ;;  %939 = vrot.lane.b32.xlu0 %v2335_v4, %s2268_s9 }
  0x29   : > { %1064 = vrot.lane.b32.xlu1 %v2202_v2, %s2269_s10  ;;  %1062 = vrot.lane.b32.xlu0 %v2327_v1, %s2269_s10 }
  0x2d   : > { %556 = vrot.lane.b32.xlu1 %v2202_v2, %s2270_s11  ;;  %554 = vrot.lane.b32.xlu0 %v2327_v1, %s2270_s11 }
  0x31   : > { %1068 = vrot.lane.b32.xlu1 %v2205_v5, %s2269_s10  ;;  %1066 = vrot.lane.b32.xlu0 %v2335_v4, %s2269_s10 }
  0x35   : > { %560 = vrot.lane.b32.xlu1 %v2205_v5, %s2270_s11  ;;  %558 = vrot.lane.b32.xlu0 %v2335_v4, %s2270_s11  ;;  %s2543_s11 = sshll.u32 %s2635_s22, 6 }
  0x36   : > { %s2552_s22 = scalar_lea.vmem %s2631_s4, %s2543_s11  ;;  %s2566_s18 = scalar_lea.vmem %s2632_s5, %s2543_s11 }
  0x37   : > { %s2594_s23 = scalar_lea.vmem %s2633_s6, %s2543_s11 }
  0x39   : > { %1191 = vrot.lane.b32.xlu1 %v2202_v2, %s2271_s12  ;;  %1189 = vrot.lane.b32.xlu0 %v2327_v1, %s2271_s12 }
  0x3d   : > { %683 = vrot.lane.b32.xlu1 %v2202_v2, %s2272_s13  ;;  %681 = vrot.lane.b32.xlu0 %v2327_v1, %s2272_s13 }
  0x41   : > { %1195 = vrot.lane.b32.xlu1 %v2205_v5, %s2271_s12  ;;  %1193 = vrot.lane.b32.xlu0 %v2335_v4, %s2271_s12 }
  0x45   : > { %687 = vrot.lane.b32.xlu1 %v2205_v5, %s2272_s13  ;;  %685 = vrot.lane.b32.xlu0 %v2335_v4, %s2272_s13 }
  0x49   : > { %1318 = vrot.lane.b32.xlu1 %v2202_v2, %s2273_s14  ;;  %1316 = vrot.lane.b32.xlu0 %v2327_v1, %s2273_s14  ;;  %v2224_v2 = vld [vmem:[%s2628_s1 + $0x50] sm:$0xff]  }
  0x4d   : > { %1322 = vrot.lane.b32.xlu1 %v2205_v5, %s2273_s14  ;;  %1320 = vrot.lane.b32.xlu0 %v2335_v4, %s2273_s14 }
  0x51   : > { %1429 = vperm.xlu1 %2199, %v1415_v6   ;;  %1424 = vperm.xlu0 %2198, %v1414_v7  }
  0x55   : > { %1434 = vperm.xlu1 %2199, %v1416_v9   ;;  %1439 = vperm.xlu0 %2198, %v1417_v10   ;;  %v2227_v9 = vld [vmem:[%s2628_s1 + $0xd8] sm:$0xff]  }
  0x59   : > { %1444 = vperm.xlu1 %2199, %v1418_v11   ;;  %1449 = vperm.xlu0 %2198, %v1419_v12   ;;  %v2228_v12 = vld [vmem:[%s2628_s1 + $0x60] sm:$0xff]  }
  0x5d   : > { %1454 = vperm.xlu1 %2199, %v1420_v13   ;;  %1459 = vperm.xlu0 %2198, %v1421_v14   ;;  %v2229_v14 = vld [vmem:[%s2628_s1 + $0xe0] sm:$0xff]  }
  0x83   : > { %v809_v15 = vpop.permute.xlu1 %808  ;;  %v336_v16 = vpop.permute.xlu0 %335 }
  0x87   : > { %v811_v17 = vpop.permute.xlu1 %810  ;;  %v338_v18 = vpop.permute.xlu0 %337 }
  0x88   : > { %v2377_v19 = vsel %vm816_vm1, %v809_v15, %v811_v17  ;;  %v344_v20 = vsel %vm343_vm2, %v336_v16, %v338_v18  ;;  %v2230_v18 = vld [vmem:[%s2628_s1 + $0x68] sm:$0xff]  }
  0x89   : > { %2005 = vmatprep.subr.bf16.mxu1 %v344_v20  ;;  %2053 = vmatprep.subr.bf16.mxu0 %v2377_v19 }
  0x8a   : > { %2006 = vmatpush3.bf16.msra.mxu1 %v344_v20  ;;  %2054 = vmatpush3.bf16.msra.mxu0 %v2377_v19  ;;  %v2231_v20 = vld [vmem:[%s2628_s1 + $0xe8] sm:$0xff]  }
  0x8b   : > { %v342_v21 = vpop.permute.xlu1 %341  ;;  %v340_v22 = vpop.permute.xlu0 %339 }
  0x8c   : > { %v345_v23 = vsel %vm343_vm2, %v340_v22, %v342_v21 }
  0x8d   : > { %2007 = vmatprep.subr.bf16.mxu1 %v345_v23 }
  0x8e   : > { %2008 = vmatpush3.bf16.msra.mxu1 %v345_v23  ;;  %v2232_v23 = vld [vmem:[%s2628_s1 + $0x70] sm:$0xff]  }
  0x8f   : > { %v815_v26 = vpop.permute.xlu1 %814  ;;  %v813_v27 = vpop.permute.xlu0 %812  ;;  %2017 = vmatprep.subr.bf16.mxu1 %v2327_v1 }
  0x90   : > { %v2389_v28 = vsel %vm816_vm1, %v813_v27, %v815_v26  ;;  %v2234_v26 = vld [vmem:[%s2628_s1 + $0x78] sm:$0xff]   ;;  %v2238_v27 = vld [vmem:[%s2628_s1 + $0x90] sm:$0xff]  }
  0x91   : > { %2010 = vmatmul.mubr.msk.bf16.vlgmr.msra.gmra.mrb[0].mxu1 %vm348_vm0, %v2207_v24  ;;  %2055 = vmatprep.subr.bf16.mxu0 %v2389_v28  ;;  %v2233_v24 = vld [vmem:[%s2628_s1 + $0xf0] sm:$0xff]  }
  0x92   : > { %2056 = vmatpush3.bf16.msra.mxu0 %v2389_v28  ;;  %2013 = vmatprep.mubr.msk.bf16.mxu1 %vm348_vm0, %v2210_v25 }
  0x93   : > { %v938_v31 = vpop.permute.xlu1 %937  ;;  %v936_v32 = vpop.permute.xlu0 %935  ;;  %2018 = vmatpush3.bf16.msra.mxu1 %v2327_v1 }
  0x94   : > { %v944_v33 = vsel %vm943_vm3, %v936_v32, %v938_v31  ;;  %2019 = vmatprep.subr.bf16.mxu1 %v2335_v4  ;;  %v2239_v31 = vld [vmem:[%s2628_s1 + $0x98] sm:$0xff]  }
  0x95   : > { %2058 = vmatmul.mubr.msk.bf16.vlgmr.msra.gmra.mrb[0].mxu0 %vm348_vm0, %v2209_v29  ;;  %2065 = vmatprep.subr.bf16.mxu0 %v944_v33  ;;  %v2236_v29 = vld [vmem:[%s2628_s1 + $0x100] sm:$0xff]   ;;  %v2241_v32 = vld [vmem:[%s2628_s1 + $0x118] sm:$0xff]  }
  0x96   : > { %2066 = vmatpush3.bf16.msra.mxu0 %v944_v33  ;;  %2069 = vmatprep.mubr.msk.bf16.mxu0 %vm348_vm0, %v2213_v30  ;;  %v2240_v30 = vld [vmem:[%s2628_s1 + $0x110] sm:$0xff]  }
  0x97   : > { %v942_v36 = vpop.permute.xlu1 %941  ;;  %v940_v37 = vpop.permute.xlu0 %939  ;;  %2020 = vmatpush3.bf16.msra.mxu1 %v2335_v4  ;;  %v2225_v4 = vld [vmem:[%s2628_s1 + $0xd0] sm:$0xff]  }
  0x98   : > { %v945_v38 = vsel %vm943_vm3, %v940_v37, %v942_v36 }
  0x99   : > { %2014 = vmatmul.mubr.msk.bf16.gmra.mrb[4].mxu1 %vm348_vm0, %v2211_v34  ;;  %2067 = vmatprep.subr.bf16.mxu0 %v945_v38 }
  0x9a   : > { %2068 = vmatpush3.bf16.msra.mxu0 %v945_v38  ;;  %2021 = vmatprep.mubr.msk.bf16.mxu1 %vm348_vm0, %v2212_v35 }
  0x9b   : > { %v1065_v39 = vpop.permute.xlu1 %1064  ;;  %v1063_v40 = vpop.permute.xlu0 %1062 }
  0x9c   : > { %v1071_v41 = vsel %vm1070_vm4, %v1063_v40, %v1065_v39 }
  0x9d   : > { %2077 = vmatprep.subr.bf16.mxu0 %v1071_v41 }
  0x9f   : > { %v557_v44 = vpop.permute.xlu1 %556  ;;  %v555_v45 = vpop.permute.xlu0 %554 }
  0xa0   : > { %v563_v47 = vsel %vm562_vm5, %v555_v45, %v557_v44 }
  0xa1   : > { %2022 = vmatmul.mubr.msk.bf16.vlgmr.msra.gmra.mrb[0].mxu1 %vm348_vm0, %v2214_v42  ;;  %2070 = vmatmul.mubr.msk.bf16.vlgmr.msra.gmra.mrb[0].mxu0 %vm348_vm0, %v2215_v43 }
  0xa2   : > { %2078 = vmatpush3.bf16.msra.mxu0 %v1071_v41  ;;  %2029 = vmatprep.subr.bf16.mxu1 %v563_v47 }
  0xa3   : > { %v1069_v49 = vpop.permute.xlu1 %1068  ;;  %v1067_v50 = vpop.permute.xlu0 %1066  ;;  %2030 = vmatpush3.bf16.msra.mxu1 %v563_v47  ;;  %2025 = vmatprep.mubr.msk.bf16.mxu1 %vm348_vm0, %v2216_v46 }
  0xa4   : > { %2073 = vmatprep.mubr.msk.bf16.mxu0 %vm348_vm0, %v2217_v48  ;;  %v1072_v51 = vsel %vm1070_vm4, %v1067_v50, %v1069_v49 }
  0xa5   : > { %2079 = vmatprep.subr.bf16.mxu0 %v1072_v51 }
  0xa6   : > { %2080 = vmatpush3.bf16.msra.mxu0 %v1072_v51 }
  0xa7   : > { %v561_v55 = vpop.permute.xlu1 %560  ;;  %v559_v56 = vpop.permute.xlu0 %558 }
  0xa8   : > { %v564_v58 = vsel %vm562_vm5, %v559_v56, %v561_v55 }
  0xa9   : > { %2026 = vmatmul.mubr.msk.bf16.gmra.mrb[4].mxu1 %vm348_vm0, %v2218_v52  ;;  %2074 = vmatmul.mubr.msk.bf16.gmra.mrb[4].mxu0 %vm348_vm0, %v2219_v53 }
  0xaa   : > { %2031 = vmatprep.subr.bf16.mxu1 %v564_v58  ;;  %2033 = vmatprep.mubr.msk.bf16.mxu1 %vm348_vm0, %v2220_v54  ;;  %v1944_v54 = vld [vmem:[%s2630_s3] ss:$0 sm:$0xff] }
  0xab   : > { %v1192_v59 = vpop.permute.xlu1 %1191  ;;  %v1190_v60 = vpop.permute.xlu0 %1189  ;;  %2032 = vmatpush3.bf16.msra.mxu1 %v564_v58  ;;  %2081 = vmatprep.mubr.msk.bf16.mxu0 %vm348_vm0, %v2221_v57 }
  0xac   : > { %v1198_v61 = vsel %vm1197_vm6, %v1190_v60, %v1192_v59 }
  0xad   : > { %2089 = vmatprep.subr.bf16.mxu0 %v1198_v61 }
  0xaf   : > { %v684_v0 = vpop.permute.xlu1 %683  ;;  %v682_v1 = vpop.permute.xlu0 %681 }
  0xb0   : > { %v690_v3 = vsel %vm689_vm7, %v682_v1, %v684_v0 }
  0xb1   : > { %2034 = vmatmul.mubr.msk.bf16.vlgmr.msra.gmra.mrb[0].mxu1 %vm348_vm0, %v2222_v62  ;;  %2082 = vmatmul.mubr.msk.bf16.vlgmr.msra.gmra.mrb[0].mxu0 %vm348_vm0, %v2223_v63 }
  0xb2   : > { %2090 = vmatpush3.bf16.msra.mxu0 %v1198_v61  ;;  %2041 = vmatprep.subr.bf16.mxu1 %v690_v3 }
  0xb3   : > { %v1196_v5 = vpop.permute.xlu1 %1195  ;;  %v1194_v6 = vpop.permute.xlu0 %1193  ;;  %2042 = vmatpush3.bf16.msra.mxu1 %v690_v3  ;;  %2037 = vmatprep.mubr.msk.bf16.mxu1 %vm348_vm0, %v2224_v2 }
  0xb4   : > { %2085 = vmatprep.mubr.msk.bf16.mxu0 %vm348_vm0, %v2225_v4  ;;  %v1199_v7 = vsel %vm1197_vm6, %v1194_v6, %v1196_v5 }
  0xb5   : > { %2091 = vmatprep.subr.bf16.mxu0 %v1199_v7 }
  0xb6   : > { %2092 = vmatpush3.bf16.msra.mxu0 %v1199_v7 }
  0xb7   : > { %v688_v10 = vpop.permute.xlu1 %687  ;;  %v686_v11 = vpop.permute.xlu0 %685 }
  0xb8   : > { %v691_v13 = vsel %vm689_vm7, %v686_v11, %v688_v10 }
  0xb9   : > { %2038 = vmatmul.mubr.msk.bf16.gmra.mrb[4].mxu1 %vm348_vm0, %v2226_v8  ;;  %2043 = vmatprep.subr.bf16.mxu1 %v691_v13 }
  0xba   : > { %2086 = vmatmul.mubr.msk.bf16.gmra.mrb[4].mxu0 %vm348_vm0, %v2227_v9  ;;  %2044 = vmatpush3.bf16.msra.mxu1 %v691_v13 }
  0xbb   : > { %2113 = vmatprep.subr.bf16.mxu1 %v2377_v19  ;;  %v1319_v15 = vpop.permute.xlu1 %1318  ;;  %v1317_v16 = vpop.permute.xlu0 %1316  ;;  %2045 = vmatprep.mubr.msk.bf16.mxu1 %vm348_vm0, %v2228_v12 }
  0xbc   : > { %2093 = vmatprep.mubr.msk.bf16.mxu0 %vm348_vm0, %v2229_v14  ;;  %v1325_v17 = vsel %vm1324_vm8, %v1317_v16, %v1319_v15 }
  0xbd   : > { %2101 = vmatprep.subr.bf16.mxu0 %v1325_v17 }
  0xbf   : > { %v1323_v21 = vpop.permute.xlu1 %1322  ;;  %v1321_v22 = vpop.permute.xlu0 %1320 }
  0xc0   : > { %v1326_v25 = vsel %vm1324_vm8, %v1321_v22, %v1323_v21 }
  0xc1   : > { %2046 = vmatmul.mubr.msk.bf16.vlgmr.msra.gmra.mrb[0].mxu1 %vm348_vm0, %v2230_v18 }
  0xc2   : > { %2115 = vmatpush3.bf16.msra.mxu1 %v2377_v19  ;;  %2094 = vmatmul.mubr.msk.bf16.vlgmr.msra.gmra.mrb[0].mxu0 %vm348_vm0, %v2231_v20  ;;  %v2235_v19 = vld [vmem:[%s2628_s1 + $0xf8] sm:$0xff]  }
  0xc3   : > { %2102 = vmatpush3.bf16.msra.mxu0 %v1325_v17  ;;  %2114 = vmatprep.subr.bf16.mxu1 %v2389_v28 }
  0xc4   : > { %2049 = vmatprep.mubr.msk.bf16.mxu1 %vm348_vm0, %v2232_v23  ;;  %2097 = vmatprep.mubr.msk.bf16.mxu0 %vm348_vm0, %v2233_v24 }
  0xc5   : > { %2103 = vmatprep.subr.bf16.mxu0 %v1326_v25 }
  0xc6   : > { %2116 = vmatpush3.bf16.msra.mxu1 %v2389_v28  ;;  %v2237_v28 = vld [vmem:[%s2628_s1 + $0x108] sm:$0xff]  }
  0xc7   : > { %2104 = vmatpush3.bf16.msra.mxu0 %v1326_v25 }
  0xc9   : > { %2050 = vmatmul.mubr.msk.bf16.gmra.mrb[4].mxu1 %vm348_vm0, %v2234_v26 }
  0xca   : > { %2098 = vmatmul.mubr.msk.bf16.gmra.mrb[4].mxu0 %vm348_vm0, %v2235_v19  ;;  %2061 = vmatprep.mubr.msk.bf16.mxu1 %vm348_vm0, %v2238_v27 }
  0xcb   : > { %2105 = vmatprep.mubr.msk.bf16.mxu0 %vm348_vm0, %v2236_v29 }
  0xd0   : > { %v1430_v37 = vpop.permute.xlu1 %1429  ;;  %v1425_v38 = vpop.permute.xlu0 %1424 }
  0xd2   : > { %2106 = vmatmul.mubr.msk.bf16.vlgmr.msra.gmra.mrb[0].mxu0 %vm348_vm0, %v2237_v28 }
  0xd3   : > { %2109 = vmatprep.mubr.msk.bf16.mxu0 %vm348_vm0, %v2240_v30 }
  0xd4   : > { %v1435_v39 = vpop.permute.xlu1 %1434  ;;  %v1440_v40 = vpop.permute.xlu0 %1439 }
  0xd5   : > { %2062 = vmatmul.mubr.msk.bf16.vlgmr.msra.gmra.mrb[4].mxu1 %vm348_vm0, %v2239_v31 }
  0xd8   : > { %v1445_v50 = vpop.permute.xlu1 %1444  ;;  %v1450_v58 = vpop.permute.xlu0 %1449 }
  0xda   : > { %2110 = vmatmul.mubr.msk.bf16.gmra.mrb[4].mxu0 %vm348_vm0, %v2241_v32 }
  0xdc   : > { %v1455_v6 = vpop.permute.xlu1 %1454  ;;  %v1460_v14 = vpop.permute.xlu0 %1459 }
 0x194   : > { %v2047_v33 = vpop.f32.mrb[0].mxu1 }
 0x195   : > { %v740_v34 = vpop.f32.mrb[1].mxu1 }
 0x196   : > { %v2048_v35 = vpop.f32.mrb[2].mxu1 }
 0x197   : > { %v743_v36 = vpop.f32.mrb[3].mxu1 }
 0x1a5   : > { %v2107_v41 = vpop.f32.mrb[0].mxu0 }
 0x1a6   : > { %v2117_v42 = vadd.f32 %v2107_v41, %v2047_v33  ;;  %v1375_v43 = vpop.f32.mrb[1].mxu0 }
 0x1a7   : > { %v2118_v44 = vadd.f32 %v1375_v43, %v740_v34  ;;  %v2108_v45 = vpop.f32.mrb[2].mxu0 }
 0x1a8   : > { %v1464_v46 = vadd.f32 %v2117_v42, %v1435_v39  ;;  %v2119_v47 = vadd.f32 %v2108_v45, %v2048_v35  ;;  %v1378_v48 = vpop.f32.mrb[3].mxu0  ;;  %v2063_v49 = vpop.f32.mrb[4].mxu1 }
 0x1a9   : > { %v1462_v51 = vadd.f32 %v2118_v44, %v1425_v38  ;;  %v2120_v52 = vadd.f32 %v1378_v48, %v743_v36  ;;  %v883_v53 = vpop.f32.mrb[5].mxu1 }
 0x1aa   : > { %v1472_v55 = vmax.f32 %v1464_v46, 0.0  ;;  %v1465_v56 = vadd.f32 %v2119_v47, %v1440_v40  ;;  %v2064_v57 = vpop.f32.mrb[6].mxu1 }
 0x1ab   : > { %v1470_v59 = vmax.f32 %v1462_v51, 0.0  ;;  %v1463_v60 = vadd.f32 %v2120_v52, %v1430_v37  ;;  %v886_v61 = vpop.f32.mrb[7].mxu1 }
 0x1ac   : > { %v1473_v62 = vmax.f32 %v1465_v56, 0.0  ;;  %v1487_v63 = vmul.f32 %v1944_v54, %v1472_v55 }
 0x1ad   : > { %v1471_v0 = vmax.f32 %v1463_v60, 0.0  ;;  %v2111_v1 = vpop.f32.mrb[4].mxu0  ;;  %v1485_v2 = vmul.f32 %v1944_v54, %v1470_v59 }
 0x1ae   : > { %v2121_v3 = vadd.f32 %v2111_v1, %v2063_v49  ;;  %1505 = vadd.xlane.f32.xlu0 %v1487_v63  ;;  %1495 = vst [vmem:[%s2552_s22 + $0x10] sm:$0xff] %v1487_v63  ;;  %v1391_v4 = vpop.f32.mrb[5].mxu0  ;;  %v1488_v5 = vmul.f32 %v1944_v54, %v1473_v62  ;;  %v1519_v13 = vmul.f32 %v1487_v63, %v1487_v63 }
 0x1af   : > { %v2122_v7 = vadd.f32 %v1391_v4, %v883_v53  ;;  %v2112_v8 = vpop.f32.mrb[6].mxu0  ;;  %1501 = vadd.xlane.f32.xlu1 %v1485_v2  ;;  %1493 = vst [vmem:[%s2552_s22] sm:$0xff] %v1485_v2  ;;  %v1486_v9 = vmul.f32 %v1944_v54, %v1471_v0  ;;  %v1517_v29 = vmul.f32 %v1485_v2, %v1485_v2 }
 0x1b0   : > { %v1468_v10 = vadd.f32 %v2121_v3, %v1455_v6  ;;  %v2123_v11 = vadd.f32 %v2112_v8, %v2064_v57  ;;  %v1394_v12 = vpop.f32.mrb[7].mxu0  ;;  %1496 = vst [vmem:[%s2552_s22 + $0x18] sm:$0xff] %v1488_v5  ;;  %v1520_v25 = vmul.f32 %v1488_v5, %v1488_v5 }
 0x1b1   : > { %v1466_v15 = vadd.f32 %v2122_v7, %v1445_v50  ;;  %v2124_v16 = vadd.f32 %v1394_v12, %v886_v61  ;;  %1494 = vst [vmem:[%s2552_s22 + $0x8] sm:$0xff] %v1486_v9  ;;  %v1518_v28 = vmul.f32 %v1486_v9, %v1486_v9 }
 0x1b2   : > { %v1476_v17 = vmax.f32 %v1468_v10, 0.0  ;;  %v1469_v18 = vadd.f32 %v2123_v11, %v1460_v14  ;;  %1529 = vadd.xlane.f32.xlu0 %v1519_v13 }
 0x1b3   : > { %v1474_v20 = vmax.f32 %v1466_v15, 0.0  ;;  %v1467_v21 = vadd.f32 %v2124_v16, %v1450_v58  ;;  %1507 = vadd.xlane.f32.xlu1 %v1488_v5 }
 0x1b4   : > { %v1477_v22 = vmax.f32 %v1469_v18, 0.0  ;;  %v1491_v23 = vmul.f32 %v1944_v54, %v1476_v17 }
 0x1b5   : > { %v1475_v24 = vmax.f32 %v1467_v21, 0.0  ;;  %v1489_v26 = vmul.f32 %v1944_v54, %v1474_v20 }
 0x1b6   : > { %1503 = vadd.xlane.f32.xlu0 %v1486_v9  ;;  %1499 = vst [vmem:[%s2552_s22 + $0x30] sm:$0xff] %v1491_v23  ;;  %v1492_v19 = vmul.f32 %v1944_v54, %v1477_v22  ;;  %v1523_v32 = vmul.f32 %v1491_v23, %v1491_v23 }
 0x1b7   : > { %1531 = vadd.xlane.f32.xlu1 %v1520_v25  ;;  %1497 = vst [vmem:[%s2552_s22 + $0x20] sm:$0xff] %v1489_v26  ;;  %v1490_v27 = vmul.f32 %v1944_v54, %v1475_v24  ;;  %v1521_v30 = vmul.f32 %v1489_v26, %v1489_v26 }
 0x1b8   : > { %1500 = vst [vmem:[%s2552_s22 + $0x38] sm:$0xff] %v1492_v19  ;;  %v1524_v33 = vmul.f32 %v1492_v19, %v1492_v19 }
 0x1b9   : > { %1498 = vst [vmem:[%s2552_s22 + $0x28] sm:$0xff] %v1490_v27  ;;  %v1522_v31 = vmul.f32 %v1490_v27, %v1490_v27 }
 0x1ba   : > { %1525 = vadd.xlane.f32.xlu0 %v1517_v29 }
 0x1bb   : > { %1527 = vadd.xlane.f32.xlu1 %v1518_v28 }
 0x1be   : > { %1513 = vadd.xlane.f32.xlu0 %v1491_v23 }
 0x1bf   : > { %1515 = vadd.xlane.f32.xlu1 %v1492_v19 }
 0x1c2   : > { %1509 = vadd.xlane.f32.xlu0 %v1489_v26 }
 0x1c3   : > { %1511 = vadd.xlane.f32.xlu1 %v1490_v27 }
 0x1c6   : > { %1533 = vadd.xlane.f32.xlu0 %v1521_v30 }
 0x1c7   : > { %1535 = vadd.xlane.f32.xlu1 %v1522_v31 }
 0x1ca   : > { %1537 = vadd.xlane.f32.xlu0 %v1523_v32 }
 0x1cb   : > { %1539 = vadd.xlane.f32.xlu1 %v1524_v33 }
 0x23b   : > { %v1506_v34 = vpop.xlane.xlu0 %1505 }
 0x23c   : > { %v1543_v35 = vmul.f32 0.25, %v1506_v34  ;;  %v1502_v36 = vpop.xlane.xlu1 %1501 }
 0x23d   : > { %v1541_v37 = vmul.f32 0.25, %v1502_v36 }
 0x23e   : > { %1584 = vst.msk [vmem:[%s2566_s18 + $0x10] sm:$0xff] %vm1581_vm9, %v1543_v35  ;;  %v1551_v38 = vmul.f32 4.0, %v1543_v35 }
 0x23f   : > { %1582 = vst.msk [vmem:[%s2566_s18] sm:$0xff] %vm1581_vm9, %v1541_v37  ;;  %v1530_v39 = vpop.xlane.xlu0 %1529  ;;  %v1549_v44 = vmul.f32 4.0, %v1541_v37 }
 0x240   : > { %v1559_v40 = vmul.f32 %v1551_v38, %v1543_v35  ;;  %v1508_v41 = vpop.xlane.xlu1 %1507 }
 0x241   : > { %v1544_v42 = vmul.f32 0.25, %v1508_v41  ;;  %v1557_v52 = vmul.f32 %v1549_v44, %v1541_v37 }
 0x242   : > { %v1567_v43 = vsub.f32 %v1530_v39, %v1559_v40 }
 0x243   : > { %1585 = vst.msk [vmem:[%s2566_s18 + $0x18] sm:$0xff] %vm1581_vm9, %v1544_v42  ;;  %v1504_v45 = vpop.xlane.xlu0 %1503  ;;  %v1552_v46 = vmul.f32 4.0, %v1544_v42 }
 0x244   : > { %v1575_v47 = vmax.f32 %v1567_v43, 0.0  ;;  %v1542_v48 = vmul.f32 0.25, %v1504_v45  ;;  %v1532_v49 = vpop.xlane.xlu1 %1531 }
 0x245   : > { %v1560_v50 = vmul.f32 %v1552_v46, %v1544_v42 }
 0x246   : > { %v1592_v51 = vmul.f32 0.33333334, %v1575_v47  ;;  %1583 = vst.msk [vmem:[%s2566_s18 + $0x8] sm:$0xff] %vm1581_vm9, %v1542_v48  ;;  %v1550_v53 = vmul.f32 4.0, %v1542_v48 }
 0x247   : > { %v1568_v54 = vsub.f32 %v1532_v49, %v1560_v50  ;;  %v1526_v55 = vpop.xlane.xlu0 %1525 }
 0x248   : > { %v1600_v56 = vadd.f32 1e-05, %v1592_v51  ;;  %v1565_v57 = vsub.f32 %v1526_v55, %v1557_v52  ;;  %v1528_v58 = vpop.xlane.xlu1 %1527  ;;  %v1558_v59 = vmul.f32 %v1550_v53, %v1542_v48 }
 0x249   : > { %v1576_v60 = vmax.f32 %v1568_v54, 0.0 }
 0x24a   : > { %2242 = vrsqrt.f32 %v1600_v56  ;;  %v1573_v62 = vmax.f32 %v1565_v57, 0.0  ;;  %v1566_v63 = vsub.f32 %v1528_v58, %v1558_v59  ;;  %vm1622_vm10 = vcmp.eq.f32.partialorder %v1600_v56, inf }
 0x24b   : > { %v1593_v61 = vmul.f32 0.33333334, %v1576_v60  ;;  %v1514_v0 = vpop.xlane.xlu0 %1513  ;;  %v1625_v23 = vand.u32 2147483648, %v1600_v56  ;;  %vm1624_vm11 = vcmp.eq.f32.partialorder %v1600_v56, 0.0 }
 0x24c   : > { %v1547_v1 = vmul.f32 0.25, %v1514_v0  ;;  %v1516_v2 = vpop.xlane.xlu1 %1515  ;;  %v1590_v4 = vmul.f32 0.33333334, %v1573_v62  ;;  %v1574_v5 = vmax.f32 %v1566_v63, 0.0 }
 0x24d   : > { %v1601_v3 = vadd.f32 1e-05, %v1593_v61  ;;  %v1548_v6 = vmul.f32 0.25, %v1516_v2 }
 0x24e   : > { %1588 = vst.msk [vmem:[%s2566_s18 + $0x30] sm:$0xff] %vm1581_vm9, %v1547_v1  ;;  %v2580_v8 = vadd.f32 1e-05, %v1590_v4  ;;  %v1591_v9 = vmul.f32 0.33333334, %v1574_v5  ;;  %v1555_v13 = vmul.f32 4.0, %v1547_v1 }
 0x24f   : > { %2244 = vrsqrt.f32 %v1601_v3  ;;  %1589 = vst.msk [vmem:[%s2566_s18 + $0x38] sm:$0xff] %vm1581_vm9, %v1548_v6  ;;  %v1510_v7 = vpop.xlane.xlu0 %1509  ;;  %v1556_v18 = vmul.f32 4.0, %v1548_v6  ;;  %vm1629_vm12 = vcmp.eq.f32.partialorder %v1601_v3, inf  ;;  %vm1631_vm13 = vcmp.eq.f32.partialorder %v1601_v3, 0.0 }
 0x250   : > { %v1545_v10 = vmul.f32 0.25, %v1510_v7  ;;  %v1512_v11 = vpop.xlane.xlu1 %1511  ;;  %2246 = vrsqrt.f32 %v2580_v8  ;;  %v2585_v14 = vadd.f32 1e-05, %v1591_v9  ;;  %v1563_v26 = vmul.f32 %v1555_v13, %v1547_v1 }
 0x251   : > { %v1546_v12 = vmul.f32 0.25, %v1512_v11  ;;  %v1564_v29 = vmul.f32 %v1556_v18, %v1548_v6  ;;  %v1632_v40 = vand.u32 2147483648, %v1601_v3  ;;  %vm1608_vm14 = vcmp.eq.f32.partialorder %v2580_v8, inf }
 0x252   : > { %1586 = vst.msk [vmem:[%s2566_s18 + $0x20] sm:$0xff] %vm1581_vm9, %v1545_v10  ;;  %v1553_v15 = vmul.f32 4.0, %v1545_v10  ;;  %2248 = vrsqrt.f32 %v2585_v14  ;;  %v1611_v49 = vand.u32 2147483648, %v2580_v8  ;;  %vm1610_vm15 = vcmp.eq.f32.partialorder %v2580_v8, 0.0 }
 0x253   : > { %1587 = vst.msk [vmem:[%s2566_s18 + $0x28] sm:$0xff] %vm1581_vm9, %v1546_v12  ;;  %v1534_v16 = vpop.xlane.xlu0 %1533  ;;  %v1554_v17 = vmul.f32 4.0, %v1546_v12  ;;  %vm1615_vm0 = vcmp.eq.f32.partialorder %v2585_v14, inf  ;;  %v1618_v59 = vand.u32 2147483648, %v2585_v14  ;;  %vm1617_vm1 = vcmp.eq.f32.partialorder %v2585_v14, 0.0 }
 0x254   : > { %v2243_v20 = vpop.eup %2242  ;;  %v1536_v21 = vpop.xlane.xlu1 %1535  ;;  %v1561_v24 = vmul.f32 %v1553_v15, %v1545_v10 }
 0x255   : > { %v1621_v22 = vmul.f32 %v2243_v20, %v1600_v56  ;;  %v1562_v25 = vmul.f32 %v1554_v17, %v1546_v12 }
 0x256   : > { %v1569_v30 = vsub.f32 %v1534_v16, %v1561_v24 }
 0x257   : > { %v1623_v19 = vsel %vm1622_vm10, %v1600_v56, %v1621_v22  ;;  %v1538_v27 = vpop.xlane.xlu0 %1537  ;;  %v1570_v31 = vsub.f32 %v1536_v21, %v1562_v25 }
 0x258   : > { %v1626_v28 = vsel %vm1624_vm11, %v1625_v23, %v1623_v19  ;;  %v1571_v32 = vsub.f32 %v1538_v27, %v1563_v26  ;;  %v1540_v33 = vpop.xlane.xlu1 %1539  ;;  %v1577_v37 = vmax.f32 %v1569_v30, 0.0 }
 0x259   : > { %v2245_v34 = vpop.eup %2244  ;;  %1664 = vst.msk [vmem:[%s2594_s23 + $0x10] sm:$0xff] %vm1581_vm9, %v1626_v28  ;;  %v1572_v35 = vsub.f32 %v1540_v33, %v1564_v29  ;;  %v1578_v38 = vmax.f32 %v1570_v31, 0.0 }
 0x25a   : > { %v1628_v36 = vmul.f32 %v2245_v34, %v1601_v3  ;;  %v1579_v39 = vmax.f32 %v1571_v32, 0.0  ;;  %v2247_v42 = vpop.eup %2246  ;;  %v1594_v44 = vmul.f32 0.33333334, %v1577_v37 }
 0x25b   : > { %v1580_v41 = vmax.f32 %v1572_v35, 0.0  ;;  %v1595_v45 = vmul.f32 0.33333334, %v1578_v38  ;;  %v1607_v48 = vmul.f32 %v2247_v42, %v2580_v8 }
 0x25c   : > { %v1630_v43 = vsel %vm1629_vm12, %v1601_v3, %v1628_v36  ;;  %v1596_v46 = vmul.f32 0.33333334, %v1579_v39  ;;  %v1602_v51 = vadd.f32 1e-05, %v1594_v44  ;;  %v2249_v54 = vpop.eup %2248 }
 0x25d   : > { %v1633_v47 = vsel %vm1631_vm13, %v1632_v40, %v1630_v43  ;;  %v1597_v50 = vmul.f32 0.33333334, %v1580_v41  ;;  %v1603_v52 = vadd.f32 1e-05, %v1595_v45  ;;  %v1609_v55 = vsel %vm1608_vm14, %v2580_v8, %v1607_v48 }
 0x25e   : > { %1665 = vst.msk [vmem:[%s2594_s23 + $0x18] sm:$0xff] %vm1581_vm9, %v1633_v47  ;;  %v1604_v53 = vadd.f32 1e-05, %v1596_v46  ;;  %v1612_v56 = vsel %vm1610_vm15, %v1611_v49, %v1609_v55  ;;  %v1614_v57 = vmul.f32 %v2249_v54, %v2585_v14  ;;  %2250 = vrsqrt.f32 %v1602_v51 }
 0x25f   : > { %v1605_v58 = vadd.f32 1e-05, %v1597_v50  ;;  %1662 = vst.msk [vmem:[%s2594_s23] sm:$0xff] %vm1581_vm9, %v1612_v56  ;;  %2252 = vrsqrt.f32 %v1603_v52  ;;  %vm1636_vm2 = vcmp.eq.f32.partialorder %v1602_v51, inf  ;;  %vm1638_vm3 = vcmp.eq.f32.partialorder %v1602_v51, 0.0 }
 0x260   : > { %v1616_v60 = vsel %vm1615_vm0, %v2585_v14, %v1614_v57  ;;  %2254 = vrsqrt.f32 %v1604_v53  ;;  %v1639_v2 = vand.u32 2147483648, %v1602_v51  ;;  %vm1643_vm4 = vcmp.eq.f32.partialorder %v1603_v52, inf }
 0x261   : > { %v1619_v61 = vsel %vm1617_vm1, %v1618_v59, %v1616_v60  ;;  %2256 = vrsqrt.f32 %v1605_v58  ;;  %vm1645_vm5 = vcmp.eq.f32.partialorder %v1603_v52, 0.0  ;;  %v1646_v5 = vand.u32 2147483648, %v1603_v52 }
 0x262   : > { %1663 = vst.msk [vmem:[%s2594_s23 + $0x8] sm:$0xff] %vm1581_vm9, %v1619_v61  ;;  %vm1650_vm6 = vcmp.eq.f32.partialorder %v1604_v53, inf  ;;  %v1653_v10 = vand.u32 2147483648, %v1604_v53  ;;  %vm1652_vm7 = vcmp.eq.f32.partialorder %v1604_v53, 0.0  ;;  %vm1657_vm8 = vcmp.eq.f32.partialorder %v1605_v58, inf }
 0x263   : > { %v1660_v15 = vand.u32 2147483648, %v1605_v58  ;;  %vm1659_vm10 = vcmp.eq.f32.partialorder %v1605_v58, 0.0 }
 0x268   : > { %v2251_v62 = vpop.eup %2250 }
 0x269   : > { %v2253_v63 = vpop.eup %2252  ;;  %v1635_v0 = vmul.f32 %v2251_v62, %v1602_v51 }
 0x26a   : > { %v2255_v1 = vpop.eup %2254  ;;  %v1642_v3 = vmul.f32 %v2253_v63, %v1603_v52 }
 0x26b   : > { %v1637_v4 = vsel %vm1636_vm2, %v1602_v51, %v1635_v0  ;;  %v1649_v6 = vmul.f32 %v2255_v1, %v1604_v53  ;;  %v2257_v7 = vpop.eup %2256 }
 0x26c   : > { %v1640_v8 = vsel %vm1638_vm3, %v1639_v2, %v1637_v4  ;;  %v1644_v9 = vsel %vm1643_vm4, %v1603_v52, %v1642_v3  ;;  %v1656_v13 = vmul.f32 %v2257_v7, %v1605_v58 }
 0x26d   : > { %1666 = vst.msk [vmem:[%s2594_s23 + $0x20] sm:$0xff] %vm1581_vm9, %v1640_v8  ;;  %v1647_v11 = vsel %vm1645_vm5, %v1646_v5, %v1644_v9  ;;  %v1651_v12 = vsel %vm1650_vm6, %v1604_v53, %v1649_v6 }
 0x26e   : > { %1667 = vst.msk [vmem:[%s2594_s23 + $0x28] sm:$0xff] %vm1581_vm9, %v1647_v11  ;;  %v1654_v14 = vsel %vm1652_vm7, %v1653_v10, %v1651_v12  ;;  %v1658_v16 = vsel %vm1657_vm8, %v1605_v58, %v1656_v13 }
 0x26f   : > { %1668 = vst.msk [vmem:[%s2594_s23 + $0x30] sm:$0xff] %vm1581_vm9, %v1654_v14  ;;  %v1661_v17 = vsel %vm1659_vm10, %v1660_v15, %v1658_v16 }
 0x270   : > { %1669 = vst.msk [vmem:[%s2594_s23 + $0x38] sm:$0xff] %vm1581_vm9, %v1661_v17 }
 0x271 PF: > { %s17_s21 = sadd.s32 1, %s2264_s21  }
 0x272   : > { %p14_p4 = scmp.ge.s32.totalorder %s17_s21, 8  }
 0x274   :  { %16 = sbr.rel (!%p14_p4) target bundleno = 1 (0x1), region = 98 }

</bundles_post_ra>
